<compile_context>
chip_gen: v6e
topology: v6e:2x2x1
jax: 0.10.0
libtpu: 0.0.40
codegen_flags: <defaults>
</compile_context>

<pallas_src>
import functools

import jax
import jax.numpy as jnp
from jax.experimental import pallas as pl
from jax.experimental.pallas import tpu as pltpu

DIM = 3            # module default dim=3
NUM_POINTS = 128   # small stand-in for num_points=500 (MaxPool1d window)
BATCH = 2
BN_EPS = 1e-5


# ---------------- fused conv1-3 + BN + ReLU + max-pool + fc1-3 kernel ----------------
def stn_kernel(x_ref, w1_ref, t1_ref, w2_ref, t2_ref, w3_ref, t3_ref,
               w4_ref, t4_ref, w5_ref, t5_ref, w6_ref, b6_ref, out_ref,
               *, batch, num_points):
    x = x_ref[...]                                                    # (B*N, DIM) bf16

    # conv1..3 (1x1 conv == matmul) with folded bias+BN, ReLU, bf16 activations.
    h = jnp.dot(x, w1_ref[...], preferred_element_type=jnp.float32) + t1_ref[...]
    h = jnp.maximum(h, 0.0).astype(jnp.bfloat16)                      # (B*N, 64)

    h = jnp.dot(h, w2_ref[...], preferred_element_type=jnp.float32) + t2_ref[...]
    h = jnp.maximum(h, 0.0).astype(jnp.bfloat16)                      # (B*N, 128)

    h = jnp.dot(h, w3_ref[...], preferred_element_type=jnp.float32) + t3_ref[...]
    h = jnp.maximum(h, 0.0)                                           # (B*N, 1024) f32

    # MaxPool1d(num_points): per-batch global max over the point axis.
    pooled = [
        jnp.max(h[b * num_points:(b + 1) * num_points, :], axis=0, keepdims=True)
        for b in range(batch)
    ]
    g = jnp.concatenate(pooled, axis=0).astype(jnp.bfloat16)          # (B, 1024)

    # fc1/fc2 with folded bias+BN, ReLU; fc3 with folded identity.
    f = jnp.dot(g, w4_ref[...], preferred_element_type=jnp.float32) + t4_ref[...]
    f = jnp.maximum(f, 0.0).astype(jnp.bfloat16)                      # (B, 512)

    f = jnp.dot(f, w5_ref[...], preferred_element_type=jnp.float32) + t5_ref[...]
    f = jnp.maximum(f, 0.0).astype(jnp.bfloat16)                      # (B, 256)

    f = jnp.dot(f, w6_ref[...], preferred_element_type=jnp.float32) + b6_ref[...]
    out_ref[...] = f                                                  # (B, DIM*DIM) f32


def _const_spec(shape):
    nd = len(shape)
    return pl.BlockSpec(shape, lambda i, _nd=nd: (0,) * _nd)


@jax.jit
def stn_forward(x, params):
    """x: (B, dim, N) float32 (PyTorch Conv1d NCW layout). Returns (B, dim, dim)."""
    B, dim, N = x.shape
    assert dim == DIM and N == NUM_POINTS

    # Points-major, batch-flattened bf16 activations (one tiny XLA transpose+cast).
    xt = jnp.transpose(x, (0, 2, 1)).reshape(B * N, DIM).astype(jnp.bfloat16)

    in_specs = [_const_spec(xt.shape)] + [_const_spec(p.shape) for p in params]

    out = pl.pallas_call(
        functools.partial(stn_kernel, batch=B, num_points=N),
        out_shape=jax.ShapeDtypeStruct((B, DIM * DIM), jnp.float32),
        grid_spec=pltpu.PrefetchScalarGridSpec(
            num_scalar_prefetch=0,
            grid=(1,),
            in_specs=in_specs,
            out_specs=pl.BlockSpec((B, DIM * DIM), lambda i: (0, 0)),
        ),
        compiler_params=pltpu.CompilerParams(
            dimension_semantics=("arbitrary",),
            vmem_limit_bytes=32 << 20,
        ),
    )(xt, *params)

    return out.reshape(B, DIM, DIM)


def make_params(key):
    """Synthetic STN parameters with conv/fc bias + eval-mode BN (and the flattened
    identity of fc3) folded in: w' = w*scale (bf16), shift' = b*scale + beta - mean*scale (f32)."""
    layer_dims = [(DIM, 64), (64, 128), (128, 1024),
                  (1024, 512), (512, 256), (256, DIM * DIM)]
    keys = jax.random.split(key, 36)
    params = []
    ki = 0
    for li, (cin, cout) in enumerate(layer_dims):
        w = 0.1 * jax.random.normal(keys[ki], (cin, cout), jnp.float32); ki += 1
        b = 0.05 * jax.random.normal(keys[ki], (1, cout), jnp.float32); ki += 1
        if li < 5:  # conv1..3, fc1..2 are followed by BN
            gamma = 1.0 + 0.1 * jax.random.normal(keys[ki], (1, cout), jnp.float32); ki += 1
            beta = 0.05 * jax.random.normal(keys[ki], (1, cout), jnp.float32); ki += 1
            mean = 0.1 * jax.random.normal(keys[ki], (1, cout), jnp.float32); ki += 1
            var = jax.random.uniform(keys[ki], (1, cout), jnp.float32, 0.5, 1.5); ki += 1
            scale = gamma / jnp.sqrt(var + BN_EPS)
            w_folded = (w * scale).astype(jnp.bfloat16)            # column-wise BN scale
            shift = b * scale + beta - mean * scale                # conv bias + BN shift, f32
            params += [w_folded, shift]
        else:  # fc3: fold the flattened identity into the bias
            iden = jnp.eye(DIM, dtype=jnp.float32).reshape(1, DIM * DIM)
            params += [w.astype(jnp.bfloat16), b + iden]
    return params


def ref_forward(x, params):
    """Pure-JAX reference with the same folded params and bf16/f32 numerics."""
    (w1, t1, w2, t2, w3, t3, w4, t4, w5, t5, w6, b6) = params
    B = x.shape[0]
    h = jnp.transpose(x, (0, 2, 1)).astype(jnp.bfloat16)           # (B, N, DIM)
    h = jnp.maximum(jnp.dot(h, w1, preferred_element_type=jnp.float32) + t1, 0.0).astype(jnp.bfloat16)
    h = jnp.maximum(jnp.dot(h, w2, preferred_element_type=jnp.float32) + t2, 0.0).astype(jnp.bfloat16)
    h = jnp.maximum(jnp.dot(h, w3, preferred_element_type=jnp.float32) + t3, 0.0)
    g = jnp.max(h, axis=1).astype(jnp.bfloat16)                    # (B, 1024)
    f = jnp.maximum(jnp.dot(g, w4, preferred_element_type=jnp.float32) + t4, 0.0).astype(jnp.bfloat16)
    f = jnp.maximum(jnp.dot(f, w5, preferred_element_type=jnp.float32) + t5, 0.0).astype(jnp.bfloat16)
    f = jnp.dot(f, w6, preferred_element_type=jnp.float32) + b6
    return f.reshape(B, DIM, DIM)


if __name__ == "__main__":
    key = jax.random.PRNGKey(0)
    kx, kp = jax.random.split(key)
    x = jax.random.normal(kx, (BATCH, DIM, NUM_POINTS), jnp.float32)  # (B, dim, N), NCW
    params = make_params(kp)

    out = stn_forward(x, params)
    out = jax.block_until_ready(out)

    ref = ref_forward(x, params)
    assert out.shape == (BATCH, DIM, DIM)
    assert jnp.allclose(out, ref, atol=2e-2, rtol=2e-2), (out, ref)
    print("KERNEL_OK")
</pallas_src>

<mosaic_0001>
module attributes {stable_mosaic.version = 11 : i64} {
  func.func @stn_kernel(%arg0: i32, %arg1: memref<256x3xbf16, #tpu.memory_space<vmem>>, %arg2: memref<3x64xbf16, #tpu.memory_space<vmem>>, %arg3: memref<1x64xf32, #tpu.memory_space<vmem>>, %arg4: memref<64x128xbf16, #tpu.memory_space<vmem>>, %arg5: memref<1x128xf32, #tpu.memory_space<vmem>>, %arg6: memref<128x1024xbf16, #tpu.memory_space<vmem>>, %arg7: memref<1x1024xf32, #tpu.memory_space<vmem>>, %arg8: memref<1024x512xbf16, #tpu.memory_space<vmem>>, %arg9: memref<1x512xf32, #tpu.memory_space<vmem>>, %arg10: memref<512x256xbf16, #tpu.memory_space<vmem>>, %arg11: memref<1x256xf32, #tpu.memory_space<vmem>>, %arg12: memref<256x9xbf16, #tpu.memory_space<vmem>>, %arg13: memref<1x9xf32, #tpu.memory_space<vmem>>, %arg14: memref<2x9xf32, #tpu.memory_space<vmem>>) attributes {dimension_semantics = [#tpu.dimension_semantics<arbitrary>], iteration_bounds = array<i64: 1>, scalar_prefetch = 0 : i64, scratch_operands = 0 : i64, tpu.core_type = #tpu.core_type<tc>, window_params = [{pipeline_mode = #tpu.pipeline_mode<synchronous>, transform_indices = @transform_0, window_bounds = array<i64: 256, 3>}, {pipeline_mode = #tpu.pipeline_mode<synchronous>, transform_indices = @transform_1, window_bounds = array<i64: 3, 64>}, {pipeline_mode = #tpu.pipeline_mode<synchronous>, transform_indices = @transform_2, window_bounds = array<i64: 1, 64>}, {pipeline_mode = #tpu.pipeline_mode<synchronous>, transform_indices = @transform_3, window_bounds = array<i64: 64, 128>}, {pipeline_mode = #tpu.pipeline_mode<synchronous>, transform_indices = @transform_4, window_bounds = array<i64: 1, 128>}, {pipeline_mode = #tpu.pipeline_mode<synchronous>, transform_indices = @transform_5, window_bounds = array<i64: 128, 1024>}, {pipeline_mode = #tpu.pipeline_mode<synchronous>, transform_indices = @transform_6, window_bounds = array<i64: 1, 1024>}, {pipeline_mode = #tpu.pipeline_mode<synchronous>, transform_indices = @transform_7, window_bounds = array<i64: 1024, 512>}, {pipeline_mode = #tpu.pipeline_mode<synchronous>, transform_indices = @transform_8, window_bounds = array<i64: 1, 512>}, {pipeline_mode = #tpu.pipeline_mode<synchronous>, transform_indices = @transform_9, window_bounds = array<i64: 512, 256>}, {pipeline_mode = #tpu.pipeline_mode<synchronous>, transform_indices = @transform_10, window_bounds = array<i64: 1, 256>}, {pipeline_mode = #tpu.pipeline_mode<synchronous>, transform_indices = @transform_11, window_bounds = array<i64: 256, 9>}, {pipeline_mode = #tpu.pipeline_mode<synchronous>, transform_indices = @transform_12, window_bounds = array<i64: 1, 9>}, {pipeline_mode = #tpu.pipeline_mode<synchronous>, transform_indices = @transform_13, window_bounds = array<i64: 2, 9>}]} {
    %c0 = arith.constant 0 : index
    %c0_0 = arith.constant 0 : index
    %0 = vector.load %arg1[%c0, %c0_0] : memref<256x3xbf16, #tpu.memory_space<vmem>>, vector<256x3xbf16>
    %c0_1 = arith.constant 0 : index
    %c0_2 = arith.constant 0 : index
    %1 = vector.load %arg2[%c0_1, %c0_2] : memref<3x64xbf16, #tpu.memory_space<vmem>>, vector<3x64xbf16>
    %cst = arith.constant dense<0.000000e+00> : vector<256x64xf32>
    %2 = tpu.matmul %0, %1, %cst {dimension_numbers = #tpu.dot_dimension_numbers<[1], [0], [0], [1], [0, 0, 1, 1], [], []>} : vector<256x3xbf16>, vector<3x64xbf16>, vector<256x64xf32> -> vector<256x64xf32>
    %c0_3 = arith.constant 0 : index
    %c0_4 = arith.constant 0 : index
    %3 = vector.load %arg3[%c0_3, %c0_4] : memref<1x64xf32, #tpu.memory_space<vmem>>, vector<1x64xf32>
    %4 = vector.broadcast %3 : vector<1x64xf32> to vector<256x64xf32>
    %5 = arith.addf %2, %4 : vector<256x64xf32>
    %cst_5 = arith.constant 0.000000e+00 : f32
    %6 = vector.broadcast %cst_5 : f32 to vector<256x64xf32>
    %7 = arith.maximumf %5, %6 : vector<256x64xf32>
    %8 = arith.truncf %7 : vector<256x64xf32> to vector<256x64xbf16>
    %c0_6 = arith.constant 0 : index
    %c0_7 = arith.constant 0 : index
    %9 = vector.load %arg4[%c0_6, %c0_7] : memref<64x128xbf16, #tpu.memory_space<vmem>>, vector<64x128xbf16>
    %cst_8 = arith.constant dense<0.000000e+00> : vector<256x128xf32>
    %10 = tpu.matmul %8, %9, %cst_8 {dimension_numbers = #tpu.dot_dimension_numbers<[1], [0], [0], [1], [0, 0, 1, 1], [], []>} : vector<256x64xbf16>, vector<64x128xbf16>, vector<256x128xf32> -> vector<256x128xf32>
    %c0_9 = arith.constant 0 : index
    %c0_10 = arith.constant 0 : index
    %11 = vector.load %arg5[%c0_9, %c0_10] : memref<1x128xf32, #tpu.memory_space<vmem>>, vector<1x128xf32>
    %12 = vector.broadcast %11 : vector<1x128xf32> to vector<256x128xf32>
    %13 = arith.addf %10, %12 : vector<256x128xf32>
    %cst_11 = arith.constant 0.000000e+00 : f32
    %14 = vector.broadcast %cst_11 : f32 to vector<256x128xf32>
    %15 = arith.maximumf %13, %14 : vector<256x128xf32>
    %16 = arith.truncf %15 : vector<256x128xf32> to vector<256x128xbf16>
    %c0_12 = arith.constant 0 : index
    %c0_13 = arith.constant 0 : index
    %17 = vector.load %arg6[%c0_12, %c0_13] : memref<128x1024xbf16, #tpu.memory_space<vmem>>, vector<128x1024xbf16>
    %cst_14 = arith.constant dense<0.000000e+00> : vector<256x1024xf32>
    %18 = tpu.matmul %16, %17, %cst_14 {dimension_numbers = #tpu.dot_dimension_numbers<[1], [0], [0], [1], [0, 0, 1, 1], [], []>} : vector<256x128xbf16>, vector<128x1024xbf16>, vector<256x1024xf32> -> vector<256x1024xf32>
    %c0_15 = arith.constant 0 : index
    %c0_16 = arith.constant 0 : index
    %19 = vector.load %arg7[%c0_15, %c0_16] : memref<1x1024xf32, #tpu.memory_space<vmem>>, vector<1x1024xf32>
    %20 = vector.broadcast %19 : vector<1x1024xf32> to vector<256x1024xf32>
    %21 = arith.addf %18, %20 : vector<256x1024xf32>
    %cst_17 = arith.constant 0.000000e+00 : f32
    %22 = vector.broadcast %cst_17 : f32 to vector<256x1024xf32>
    %23 = arith.maximumf %21, %22 : vector<256x1024xf32>
    %24 = vector.extract_strided_slice %23 {offsets = [0, 0], sizes = [128, 1024], strides = [1, 1]} : vector<256x1024xf32> to vector<128x1024xf32>
    %cst_18 = arith.constant dense<0xFF800000> : vector<1024xf32>
    %25 = vector.multi_reduction <maximumf>, %24, %cst_18 [0] : vector<128x1024xf32> to vector<1024xf32>
    %26 = vector.shape_cast %25 : vector<1024xf32> to vector<1x1024xf32>
    %27 = vector.extract_strided_slice %23 {offsets = [128, 0], sizes = [128, 1024], strides = [1, 1]} : vector<256x1024xf32> to vector<128x1024xf32>
    %cst_19 = arith.constant dense<0xFF800000> : vector<1024xf32>
    %28 = vector.multi_reduction <maximumf>, %27, %cst_19 [0] : vector<128x1024xf32> to vector<1024xf32>
    %29 = vector.shape_cast %28 : vector<1024xf32> to vector<1x1024xf32>
    %30 = tpu.concatenate %26, %29 in 0 : vector<1x1024xf32>, vector<1x1024xf32> -> vector<2x1024xf32>
    %31 = arith.truncf %30 : vector<2x1024xf32> to vector<2x1024xbf16>
    %c0_20 = arith.constant 0 : index
    %c0_21 = arith.constant 0 : index
    %32 = vector.load %arg8[%c0_20, %c0_21] : memref<1024x512xbf16, #tpu.memory_space<vmem>>, vector<1024x512xbf16>
    %cst_22 = arith.constant dense<0.000000e+00> : vector<2x512xf32>
    %33 = tpu.matmul %31, %32, %cst_22 {dimension_numbers = #tpu.dot_dimension_numbers<[1], [0], [0], [1], [0, 0, 1, 1], [], []>} : vector<2x1024xbf16>, vector<1024x512xbf16>, vector<2x512xf32> -> vector<2x512xf32>
    %c0_23 = arith.constant 0 : index
    %c0_24 = arith.constant 0 : index
    %34 = vector.load %arg9[%c0_23, %c0_24] : memref<1x512xf32, #tpu.memory_space<vmem>>, vector<1x512xf32>
    %35 = vector.broadcast %34 : vector<1x512xf32> to vector<2x512xf32>
    %36 = arith.addf %33, %35 : vector<2x512xf32>
    %cst_25 = arith.constant 0.000000e+00 : f32
    %37 = vector.broadcast %cst_25 : f32 to vector<2x512xf32>
    %38 = arith.maximumf %36, %37 : vector<2x512xf32>
    %39 = arith.truncf %38 : vector<2x512xf32> to vector<2x512xbf16>
    %c0_26 = arith.constant 0 : index
    %c0_27 = arith.constant 0 : index
    %40 = vector.load %arg10[%c0_26, %c0_27] : memref<512x256xbf16, #tpu.memory_space<vmem>>, vector<512x256xbf16>
    %cst_28 = arith.constant dense<0.000000e+00> : vector<2x256xf32>
    %41 = tpu.matmul %39, %40, %cst_28 {dimension_numbers = #tpu.dot_dimension_numbers<[1], [0], [0], [1], [0, 0, 1, 1], [], []>} : vector<2x512xbf16>, vector<512x256xbf16>, vector<2x256xf32> -> vector<2x256xf32>
    %c0_29 = arith.constant 0 : index
    %c0_30 = arith.constant 0 : index
    %42 = vector.load %arg11[%c0_29, %c0_30] : memref<1x256xf32, #tpu.memory_space<vmem>>, vector<1x256xf32>
    %43 = vector.broadcast %42 : vector<1x256xf32> to vector<2x256xf32>
    %44 = arith.addf %41, %43 : vector<2x256xf32>
    %cst_31 = arith.constant 0.000000e+00 : f32
    %45 = vector.broadcast %cst_31 : f32 to vector<2x256xf32>
    %46 = arith.maximumf %44, %45 : vector<2x256xf32>
    %47 = arith.truncf %46 : vector<2x256xf32> to vector<2x256xbf16>
    %c0_32 = arith.constant 0 : index
    %c0_33 = arith.constant 0 : index
    %48 = vector.load %arg12[%c0_32, %c0_33] : memref<256x9xbf16, #tpu.memory_space<vmem>>, vector<256x9xbf16>
    %cst_34 = arith.constant dense<0.000000e+00> : vector<2x9xf32>
    %49 = tpu.matmul %47, %48, %cst_34 {dimension_numbers = #tpu.dot_dimension_numbers<[1], [0], [0], [1], [0, 0, 1, 1], [], []>} : vector<2x256xbf16>, vector<256x9xbf16>, vector<2x9xf32> -> vector<2x9xf32>
    %c0_35 = arith.constant 0 : index
    %c0_36 = arith.constant 0 : index
    %50 = vector.load %arg13[%c0_35, %c0_36] : memref<1x9xf32, #tpu.memory_space<vmem>>, vector<1x9xf32>
    %51 = vector.broadcast %50 : vector<1x9xf32> to vector<2x9xf32>
    %52 = arith.addf %49, %51 : vector<2x9xf32>
    %c0_37 = arith.constant 0 : index
    %c0_38 = arith.constant 0 : index
    %53 = vector.load %arg14[%c0_37, %c0_38] : memref<2x9xf32, #tpu.memory_space<vmem>>, vector<2x9xf32>
    tpu.vector_store %arg14[%c0_37, %c0_38], %52 {strides = array<i32>} : memref<2x9xf32, #tpu.memory_space<vmem>>, vector<2x9xf32>,
    return
  }
  func.func @transform_0(%arg0: i32) -> (i32, i32) {
    %c0_i32 = arith.constant 0 : i32
    %c0_i32_0 = arith.constant 0 : i32
    %c0_i32_1 = arith.constant 0 : i32
    return %c0_i32, %c0_i32_0 : i32, i32
  }
  func.func @transform_1(%arg0: i32) -> (i32, i32) {
    %c0_i32 = arith.constant 0 : i32
    %c0_i32_0 = arith.constant 0 : i32
    %c0_i32_1 = arith.constant 0 : i32
    return %c0_i32, %c0_i32_0 : i32, i32
  }
  func.func @transform_2(%arg0: i32) -> (i32, i32) {
    %c0_i32 = arith.constant 0 : i32
    %c0_i32_0 = arith.constant 0 : i32
    %c0_i32_1 = arith.constant 0 : i32
    return %c0_i32, %c0_i32_0 : i32, i32
  }
  func.func @transform_3(%arg0: i32) -> (i32, i32) {
    %c0_i32 = arith.constant 0 : i32
    %c0_i32_0 = arith.constant 0 : i32
    %c0_i32_1 = arith.constant 0 : i32
    return %c0_i32, %c0_i32_0 : i32, i32
  }
  func.func @transform_4(%arg0: i32) -> (i32, i32) {
    %c0_i32 = arith.constant 0 : i32
    %c0_i32_0 = arith.constant 0 : i32
    %c0_i32_1 = arith.constant 0 : i32
    return %c0_i32, %c0_i32_0 : i32, i32
  }
  func.func @transform_5(%arg0: i32) -> (i32, i32) {
    %c0_i32 = arith.constant 0 : i32
    %c0_i32_0 = arith.constant 0 : i32
    %c0_i32_1 = arith.constant 0 : i32
    return %c0_i32, %c0_i32_0 : i32, i32
  }
  func.func @transform_6(%arg0: i32) -> (i32, i32) {
    %c0_i32 = arith.constant 0 : i32
    %c0_i32_0 = arith.constant 0 : i32
    %c0_i32_1 = arith.constant 0 : i32
    return %c0_i32, %c0_i32_0 : i32, i32
  }
  func.func @transform_7(%arg0: i32) -> (i32, i32) {
    %c0_i32 = arith.constant 0 : i32
    %c0_i32_0 = arith.constant 0 : i32
    %c0_i32_1 = arith.constant 0 : i32
    return %c0_i32, %c0_i32_0 : i32, i32
  }
  func.func @transform_8(%arg0: i32) -> (i32, i32) {
    %c0_i32 = arith.constant 0 : i32
    %c0_i32_0 = arith.constant 0 : i32
    %c0_i32_1 = arith.constant 0 : i32
    return %c0_i32, %c0_i32_0 : i32, i32
  }
  func.func @transform_9(%arg0: i32) -> (i32, i32) {
    %c0_i32 = arith.constant 0 : i32
    %c0_i32_0 = arith.constant 0 : i32
    %c0_i32_1 = arith.constant 0 : i32
    return %c0_i32, %c0_i32_0 : i32, i32
  }
  func.func @transform_10(%arg0: i32) -> (i32, i32) {
    %c0_i32 = arith.constant 0 : i32
    %c0_i32_0 = arith.constant 0 : i32
    %c0_i32_1 = arith.constant 0 : i32
    return %c0_i32, %c0_i32_0 : i32, i32
  }
  func.func @transform_11(%arg0: i32) -> (i32, i32) {
    %c0_i32 = arith.constant 0 : i32
    %c0_i32_0 = arith.constant 0 : i32
    %c0_i32_1 = arith.constant 0 : i32
    return %c0_i32, %c0_i32_0 : i32, i32
  }
  func.func @transform_12(%arg0: i32) -> (i32, i32) {
    %c0_i32 = arith.constant 0 : i32
    %c0_i32_0 = arith.constant 0 : i32
    %c0_i32_1 = arith.constant 0 : i32
    return %c0_i32, %c0_i32_0 : i32, i32
  }
  func.func @transform_13(%arg0: i32) -> (i32, i32) {
    %c0_i32 = arith.constant 0 : i32
    %c0_i32_0 = arith.constant 0 : i32
    %c0_i32_1 = arith.constant 0 : i32
    return %c0_i32, %c0_i32_0 : i32, i32
  }
}

</mosaic_0001>

<bundles_post_ra>
// kernel: stn_forward.1
= control target key start
LH: loop header
LB: loop body
LE: loop exit
PB: predicated region body
PF: predicated region fallthrough
CT: control target
= control target key end

     0   :  { %18 = vsyncpa [#allocation3], 0  ;;  %s7281_s0 = inlined_call_operand.vmem [shape: bf16[256,3], index: 0, kind: input, shape index: {}]   ;;  %s7282_s1 = inlined_call_operand.vmem [shape: bf16[3,64], index: 1, kind: input, shape index: {}]   ;;  %s7283_s2 = inlined_call_operand.vmem [shape: f32[1,64], index: 2, kind: input, shape index: {}]   ;;  %s7284_s3 = inlined_call_operand.vmem [shape: bf16[64,128], index: 3, kind: input, shape index: {}]   ;;  %s7285_s4 = inlined_call_operand.vmem [shape: f32[1,128], index: 4, kind: input, shape index: {}]   ;;  %s7286_s5 = inlined_call_operand.hbm [shape: bf16[128,1024], index: 5, kind: input, shape index: {}]   ;;  %s7287_s6 = inlined_call_operand.vmem [shape: f32[1,1024], index: 6, kind: input, shape index: {}]   ;;  %s7288_s7 = inlined_call_operand.hbm [shape: bf16[1024,512], index: 7, kind: input, shape index: {}]   ;;  %s7289_s8 = inlined_call_operand.vmem [shape: f32[1,512], index: 8, kind: input, shape index: {}]   ;;  %s7290_s9 = inlined_call_operand.hbm [shape: bf16[512,256], index: 9, kind: input, shape index: {}]   ;;  %s7291_s10 = inlined_call_operand.vmem [shape: f32[1,256], index: 10, kind: input, shape index: {}]   ;;  %s7292_s11 = inlined_call_operand.vmem [shape: bf16[256,9], index: 11, kind: input, shape index: {}]   ;;  %s7293_s12 = inlined_call_operand.vmem [shape: f32[1,9], index: 12, kind: input, shape index: {}]   ;;  %s7294_s13 = inlined_call_operand.vmem [shape: f32[2,9], index: 13, kind: output, shape index: {}]  }
   0x1   :  { %19 = vsyncpa [#allocation5], 0  ;;  %s6314_s25 = smov [#allocation4]  }
   0x2   :  { %s49_s26 = sshll.u32 %s6314_s25, 4  ;;  %s50_s26 = int_to_ptr.vmem [resolvable:$true] %s49_s26 }
   0x3   :  { %s6258_s27 = scalar_lea.vmem %s50_s26, 32768  ;;  %p6263_p1 = scmp.lt.s32.totalorder %s50_s26, %s50_s26 }
   0x4   :  { %p6259_p0 = scmp.ne.s32.totalorder %s50_s26, %s6258_s27  ;;  %p6264_p2 = scmp.lt.s32.totalorder %s6258_s27, %s6258_s27 }
   0x6   :  { %p6265_p3 = por %p6264_p2, %p6263_p1 }
   0x8   :  { %p6266_p4 = pnand %p6265_p3, %p6259_p0 }
   0xa   :  { %6269 = shalt.err (!%p6266_p4)
}
   0xb   :  { %s6315_s28 = smov 256   ;;  %s6316_s29 = smov 16  }
   0xc   :  { %55 = dma.hbm_to_vmem [thread:$0]  %s7288_s7, 32768, %s50_s26, [#allocation5], %s6315_s28, %s6315_s28, %s6316_s29  }
   0xd   :  { %s6317_s15 = smov [#allocation2]  }
   0xe   :  { %s35_s16 = sshll.u32 %s6317_s15, 4  ;;  %s36_s16 = int_to_ptr.vmem [resolvable:$true] %s35_s16 }
   0xf   :  { %s6278_s17 = scalar_lea.vmem %s36_s16, 8192  ;;  %p6283_p6 = scmp.lt.s32.totalorder %s36_s16, %s36_s16 }
  0x10   :  { %p6279_p5 = scmp.ne.s32.totalorder %s36_s16, %s6278_s17  ;;  %p6284_p7 = scmp.lt.s32.totalorder %s6278_s17, %s6278_s17 }
  0x12   :  { %p6285_p8 = por %p6284_p7, %p6283_p6 }
  0x14   :  { %p6286_p9 = pnand %p6285_p8, %p6279_p5 }
  0x16   :  { %6289 = shalt.err (!%p6286_p9)
}
  0x17   :  { %s6318_s18 = smov 512   ;;  %s6319_s19 = smov 32  }
  0x18   :  { %41 = dma.hbm_to_vmem [thread:$0]  %s7286_s5, 8192, %s36_s16, [#allocation3], %s6318_s18, %s6318_s18, %s6319_s19  }
  0x19   :  { %s6320_s22 = smov [#allocation6]  }
  0x1a   :  { %s63_s23 = sshll.u32 %s6320_s22, 4  ;;  %s64_s23 = int_to_ptr.vmem [resolvable:$true] %s63_s23 }
  0x1b   :  { %s6298_s7 = scalar_lea.vmem %s64_s23, 8192  ;;  %p6303_p11 = scmp.lt.s32.totalorder %s64_s23, %s64_s23 }
  0x1c   :  { %p6299_p10 = scmp.ne.s32.totalorder %s64_s23, %s6298_s7  ;;  %p6304_p12 = scmp.lt.s32.totalorder %s6298_s7, %s6298_s7 }
  0x1e   :  { %p6305_p13 = por %p6304_p12, %p6303_p11 }
  0x20   :  { %p6306_p0 = pnand %p6305_p13, %p6299_p10 }
  0x22   :  { %6309 = shalt.err (!%p6306_p0)
}
  0x23   :  { %s6321_s24 = smov 128   ;;  %s6322_s25 = smov 8  }
  0x24   :  { %69 = dma.hbm_to_vmem [thread:$0]  %s7290_s9, 8192, %s64_s23, [#allocation5], %s6321_s24, %s6321_s24, %s6322_s25  }
  0x25   :  { %6310 = dma.done.wait [#allocation3], 8192  }
  0x26   :  { %6311 = vsyncadd [#allocation3], 4294959104 }
  0x27   :  { %6312 = dma.done.wait [#allocation5], 40960  }
  0x28   :  { %6313 = vsyncadd [#allocation5], 4294926336  ;;  %vm255_vm0 = vcmask 1040384   ;;  %vm256_vm1 = vcmask 1041408   ;;  %v6323_v0 = vmov 65535   ;;  %vm206_vm2 = vcmask 23552  }
  0x29   :  { %v257_v1 = vsel %vm255_vm0, 4294967295, %v6323_v0  ;;  %v118_v3 = vld [vmem:[%s7282_s1] sm:$0x3]  ;;  %v5735_v6 = vld [vmem:[%s7281_s0 + $0x8] sm:$0xff]   ;;  %v5736_v7 = vld [vmem:[%s7281_s0 + $0x10] sm:$0xff]   ;;  %vm510_vm3 = vcmask 523264  }
  0x2a   :  { %v258_v2 = vsel %vm256_vm1, %v257_v1, 0  ;;  %v5734_v5 = vld [vmem:[%s7281_s0] sm:$0xff]   ;;  %v5737_v8 = vld [vmem:[%s7281_s0 + $0x18] sm:$0xff]   ;;  %v5747_v11 = vld [vmem:[%s7281_s0 + $0x68] sm:$0xff]   ;;  %vm5125_vm4 = vcmask 66560  }
  0x2b   :  { %v260_v4 = vand.u32 %v258_v2, %v118_v3  ;;  %5649 = vmatprep.mubr.msk.bf16.mxu0 %vm206_vm2, %v5734_v5  ;;  %v5738_v9 = vld [vmem:[%s7281_s0 + $0x20] sm:$0xff]   ;;  %v5748_v12 = vld [vmem:[%s7281_s0 + $0x70] sm:$0xff]   ;;  %v5739_v13 = vld [vmem:[%s7281_s0 + $0x28] sm:$0xff]  }
  0x2c   :  { %v5746_v10 = vld [vmem:[%s7281_s0 + $0x60] sm:$0xff]   ;;  %v5750_v14 = vld [vmem:[%s7284_s3 + $0x18] sm:$0xff]   ;;  %v5740_v15 = vld [vmem:[%s7281_s0 + $0x30] sm:$0xff]  }
  0x2d   :  { %5647 = vmatprep.subr.bf16.mxu0 %v260_v4  ;;  %5721 = vmatprep.subr.bf16.mxu1 %v260_v4  ;;  %v5749_v16 = vld [vmem:[%s7281_s0 + $0x78] sm:$0xff]   ;;  %v5742_v18 = vld [vmem:[%s7281_s0 + $0x40] sm:$0xff]   ;;  %v5743_v19 = vld [vmem:[%s7281_s0 + $0x48] sm:$0xff]  }
  0x2e   :  { %5648 = vmatpush3.bf16.msra.mxu0 %v260_v4  ;;  %5722 = vmatpush3.bf16.msra.mxu1 %v260_v4  ;;  %v5741_v17 = vld [vmem:[%s7281_s0 + $0x38] sm:$0xff]   ;;  %v5744_v20 = vld [vmem:[%s7281_s0 + $0x50] sm:$0xff]   ;;  %v5752_v23 = vld [vmem:[%s7284_s3 + $0x8] sm:$0xff]  }
  0x2f   :  { %5673 = vmatprep.mubr.msk.bf16.mxu1 %vm206_vm2, %v5746_v10  ;;  %5681 = vmatprep.subr.bf16.mxu1 %v5750_v14  ;;  %v5745_v21 = vld [vmem:[%s7281_s0 + $0x58] sm:$0xff]   ;;  %v5751_v22 = vld [vmem:[%s7284_s3 + $0x10] sm:$0xff]   ;;  %v5753_v24 = vld [vmem:[%s7284_s3] sm:$0xff]  }
  0x30   :  { %v6484_v25 = vld [vmem:[#allocation2 + $0x1c8] sm:$0xff]  ;;  %v824_v29 = vld [vmem:[#allocation2 + $0x1c0] sm:$0xff] }
  0x31   :  { %5650 = vmatmul.mubr.msk.bf16.vlgmr.msra.gmra.mxu0 %vm206_vm2, %v5735_v6  ;;  %5674 = vmatmul.mubr.msk.bf16.vlgmr.msra.gmra.mxu1 %vm206_vm2, %v5747_v11  ;;  %v6486_v26 = vld [vmem:[#allocation2 + $0x1e8] sm:$0xff]  ;;  %v828_v30 = vld [vmem:[#allocation2 + $0x1e0] sm:$0xff] }
  0x32   :  { %5653 = vmatprep.mubr.msk.bf16.mxu0 %vm206_vm2, %v5736_v7  ;;  %5677 = vmatprep.mubr.msk.bf16.mxu1 %vm206_vm2, %v5748_v12  ;;  %v5245_v27 = vcombine.low %v6484_v25, %v6486_v26  ;;  %v5246_v28 = vcombine.high %v6484_v25, %v6486_v26  ;;  %v5243_v31 = vcombine.low %v824_v29, %v828_v30  ;;  %v816_v33 = vld [vmem:[#allocation2 + $0x180] sm:$0xff]  ;;  %v817_v2 = vld [vmem:[#allocation2 + $0x188] sm:$0xff] }
  0x33   :  { %5682 = vmatpush3.bf16.msra.mxu1 %v5750_v14  ;;  %v5244_v32 = vcombine.high %v824_v29, %v828_v30  ;;  %v820_v34 = vld [vmem:[#allocation2 + $0x1a0] sm:$0xff]  ;;  %v821_v3 = vld [vmem:[#allocation2 + $0x1a8] sm:$0xff] }
  0x34   :  { %5683 = vmatprep.subr.bf16.mxu1 %v5751_v22  ;;  %v5236_v35 = vcombine.high %v816_v33, %v820_v34  ;;  %v808_v36 = vld [vmem:[#allocation2 + $0x140] sm:$0xff]  ;;  %v5235_v38 = vcombine.low %v816_v33, %v820_v34  ;;  %v5238_v11 = vcombine.high %v817_v2, %v821_v3  ;;  %v813_v14 = vld [vmem:[#allocation2 + $0x168] sm:$0xff] }
  0x35   :  { %1194 = vmatprep.subr.bf16.mxu0 %v5244_v32  ;;  %v812_v37 = vld [vmem:[#allocation2 + $0x160] sm:$0xff] }
  0x36   :  { %1195 = vmatpush1.bf16.msra.mxu0 %v5243_v31  ;;  %v5228_v39 = vcombine.high %v808_v36, %v812_v37  ;;  %v800_v40 = vld [vmem:[#allocation2 + $0x100] sm:$0xff]  ;;  %v5227_v42 = vcombine.low %v808_v36, %v812_v37  ;;  %v797_v36 = vld [vmem:[#allocation2 + $0xe8] sm:$0xff] }
  0x37   :  { %5684 = vmatpush3.bf16.msra.mxu1 %v5751_v22  ;;  %1196 = vmatprep.subr.bf16.mxu0 %v5236_v35  ;;  %v804_v41 = vld [vmem:[#allocation2 + $0x120] sm:$0xff] }
  0x38   :  { %5685 = vmatprep.subr.bf16.mxu1 %v5752_v23  ;;  %v5220_v43 = vcombine.high %v800_v40, %v804_v41  ;;  %v792_v44 = vld [vmem:[#allocation2 + $0xc0] sm:$0xff]  ;;  %v5219_v46 = vcombine.low %v800_v40, %v804_v41 }
  0x39   :  { %5654 = vmatmul.mubr.msk.bf16.gmra.mxu0 %vm206_vm2, %v5737_v8  ;;  %5678 = vmatmul.mubr.msk.bf16.gmra.mxu1 %vm206_vm2, %v5749_v16  ;;  %v796_v45 = vld [vmem:[#allocation2 + $0xe0] sm:$0xff] }
  0x3a   :  { %5657 = vmatprep.mubr.msk.bf16.mxu0 %vm206_vm2, %v5738_v9  ;;  %1197 = vmatpush1.bf16.msra.mxu0 %v5235_v38  ;;  %v5212_v47 = vcombine.high %v792_v44, %v796_v45  ;;  %v784_v48 = vld [vmem:[#allocation2 + $0x80] sm:$0xff]  ;;  %v5211_v50 = vcombine.low %v792_v44, %v796_v45 }
  0x3b   :  { %5686 = vmatpush3.bf16.msra.mxu1 %v5752_v23  ;;  %1198 = vmatprep.subr.bf16.mxu0 %v5228_v39  ;;  %v788_v49 = vld [vmem:[#allocation2 + $0xa0] sm:$0xff] }
  0x3c   :  { %5687 = vmatprep.subr.bf16.mxu1 %v5753_v24  ;;  %v5204_v51 = vcombine.high %v784_v48, %v788_v49  ;;  %v5203_v52 = vcombine.low %v784_v48, %v788_v49  ;;  %v6495_v55 = vld [vmem:[%s7283_s2] ss:$0 sm:$0xff]  ;;  %v789_v48 = vld [vmem:[#allocation2 + $0xa8] sm:$0xff] }
  0x3e   :  { %1199 = vmatpush1.bf16.msra.mxu0 %v5227_v42 }
  0x3f   :  { %5688 = vmatpush3.bf16.msra.mxu1 %v5753_v24  ;;  %1200 = vmatprep.subr.bf16.mxu0 %v5220_v43  ;;  %v801_v24 = vld [vmem:[#allocation2 + $0x108] sm:$0xff] }
  0x40   :  { %1387 = vmatprep.subr.bf16.mxu1 %v5246_v28  ;;  %v805_v28 = vld [vmem:[#allocation2 + $0x128] sm:$0xff] }
  0x41   :  { %5658 = vmatmul.mubr.msk.bf16.gmra.mxu0 %vm206_vm2, %v5739_v13  ;;  %v809_v13 = vld [vmem:[#allocation2 + $0x148] sm:$0xff]  ;;  %v5222_v25 = vcombine.high %v801_v24, %v805_v28  ;;  %v5221_v43 = vcombine.low %v801_v24, %v805_v28 }
  0x42   :  { %5661 = vmatprep.mubr.msk.bf16.mxu0 %vm206_vm2, %v5740_v15  ;;  %1201 = vmatpush1.bf16.msra.mxu0 %v5219_v46  ;;  %v5230_v22 = vcombine.high %v809_v13, %v813_v14  ;;  %v5229_v34 = vcombine.low %v809_v13, %v813_v14 }
  0x43   :  { %1202 = vmatprep.subr.bf16.mxu0 %v5212_v47  ;;  %v785_v47 = vld [vmem:[#allocation2 + $0x88] sm:$0xff] }
  0x46   :  { %1203 = vmatpush1.bf16.msra.mxu0 %v5211_v50 }
  0x47   :  { %1204 = vmatprep.subr.bf16.mxu0 %v5204_v51 }
  0x49   :  { %5662 = vmatmul.mubr.msk.bf16.gmra.mxu0 %vm206_vm2, %v5741_v17 }
  0x4a   :  { %5665 = vmatprep.mubr.msk.bf16.mxu0 %vm206_vm2, %v5742_v18  ;;  %1205 = vmatpush1.bf16.msra.mxu0 %v5203_v52 }
  0x51   :  { %5666 = vmatmul.mubr.msk.bf16.gmra.mxu0 %vm206_vm2, %v5743_v19 }
  0x52   :  { %5669 = vmatprep.mubr.msk.bf16.mxu0 %vm206_vm2, %v5744_v20  ;;  %v5237_v20 = vcombine.low %v817_v2, %v821_v3 }
  0x59   :  { %5670 = vmatmul.mubr.msk.bf16.gmra.mxu0 %vm206_vm2, %v5745_v21 }
  0xf1   :  { %v5651_v53 = vpop.f32.mrf.mxu0  ;;  %v6515_v39 = vpop.f32.mrf.mxu1 }
  0xf2   :  { %v305_v59 = vadd.f32 %v5651_v53, %v6495_v55 }
  0xf3   :  { %v296_v54 = vpop.f32.mrf.mxu0  ;;  %v392_v52 = vpop.f32.mrf.mxu1 }
  0xf4   :  { %v297_v57 = vadd.f32 %v6495_v55, %v296_v54  ;;  %v425_v4 = vmax.f32 %v305_v59, 0.0 }
  0xf5   :  { %v5652_v56 = vpop.f32.mrf.mxu0 }
  0xf6   :  { %v308_v58 = vadd.f32 %v5652_v56, %v6495_v55  ;;  %v423_v0 = vmax.f32 %v297_v57, 0.0 }
  0xf7   :  { %v299_v60 = vpop.f32.mrf.mxu0 }
  0xf8   :  { %v300_v61 = vadd.f32 %v6495_v55, %v299_v60  ;;  %v426_v62 = vmax.f32 %v308_v58, 0.0  ;;  %v5206_v58 = vcombine.high %v785_v47, %v789_v48  ;;  %v777_v60 = vld [vmem:[#allocation2 + $0x48] sm:$0xff] }
  0xf9   :  { %v5655_v63 = vpop.f32.mrf.mxu0 }
  0xfa   :  { %v424_v1 = vmax.f32 %v300_v61, 0.0  ;;  %v321_v5 = vadd.f32 %v5655_v63, %v6495_v55  ;;  %v456_v9 = vpack.c.bf16 %v426_v62, %v425_v4  ;;  %v781_v61 = vld [vmem:[#allocation2 + $0x68] sm:$0xff]  ;;  %v5205_v4 = vcombine.low %v785_v47, %v789_v48 }
  0xfb   :  { %v312_v6 = vpop.f32.mrf.mxu0  ;;  %v5197_v14 = vcombine.low %v777_v60, %v781_v61  ;;  %v401_v47 = vadd.f32 %v6515_v39, %v6495_v55 }
  0xfc   :  { %v455_v7 = vpack.c.bf16 %v424_v1, %v423_v0  ;;  %v313_v8 = vadd.f32 %v6495_v55, %v312_v6  ;;  %v429_v15 = vmax.f32 %v321_v5, 0.0  ;;  %v5676_v0 = vpop.f32.mrf.mxu1  ;;  %v5198_v6 = vcombine.high %v777_v60, %v781_v61 }
  0xfd   :  { %v5656_v10 = vpop.f32.mrf.mxu0  ;;  %v404_v48 = vadd.f32 %v5676_v0, %v6495_v55  ;;  %v776_v0 = vld [vmem:[#allocation2 + $0x40] sm:$0xff] }
  0xfe   :  { %v324_v12 = vadd.f32 %v5656_v10, %v6495_v55  ;;  %5689 = vmatprep.mubr.msk.bf16.mxu1 %vm510_vm3, %v455_v7  ;;  %v427_v17 = vmax.f32 %v313_v8, 0.0 }
  0xff   :  { %v315_v16 = vpop.f32.mrf.mxu0  ;;  %5690 = vmatmul.mubr.msk.bf16.vlgmr.msra.gmra.mxu1 %vm510_vm3, %v456_v9 }
 0x100   :  { %v430_v18 = vmax.f32 %v324_v12, 0.0  ;;  %v316_v19 = vadd.f32 %v6495_v55, %v315_v16  ;;  %1388 = vmatpush1.bf16.msra.mxu1 %v5245_v27  ;;  %v793_v27 = vld [vmem:[#allocation2 + $0xc8] sm:$0xff] }
 0x101   :  { %v5659_v21 = vpop.f32.mrf.mxu0  ;;  %1389 = vmatprep.subr.bf16.mxu1 %v5238_v11  ;;  %v5214_v45 = vcombine.high %v793_v27, %v797_v36  ;;  %v5213_v56 = vcombine.low %v793_v27, %v797_v36  ;;  %v395_v11 = vpop.f32.mrf.mxu1 }
 0x102   :  { %v428_v23 = vmax.f32 %v316_v19, 0.0  ;;  %v458_v29 = vpack.c.bf16 %v430_v18, %v429_v15  ;;  %v337_v30 = vadd.f32 %v5659_v21, %v6495_v55 }
 0x103   :  { %v328_v31 = vpop.f32.mrf.mxu0  ;;  %v5679_v16 = vpop.f32.mrf.mxu1 }
 0x104   :  { %v457_v32 = vpack.c.bf16 %v428_v23, %v427_v17  ;;  %v329_v33 = vadd.f32 %v6495_v55, %v328_v31  ;;  %1390 = vmatpush1.bf16.msra.mxu1 %v5237_v20  ;;  %v433_v37 = vmax.f32 %v337_v30, 0.0  ;;  %v417_v39 = vadd.f32 %v5679_v16, %v6495_v55  ;;  %v827_v16 = vld [vmem:[#allocation2 + $0x1d8] sm:$0xff] }
 0x105   :  { %v5660_v35 = vpop.f32.mrf.mxu0  ;;  %1391 = vmatprep.subr.bf16.mxu1 %v5230_v22  ;;  %v408_v24 = vpop.f32.mrf.mxu1 }
 0x106   :  { %5693 = vmatprep.mubr.msk.bf16.mxu1 %vm510_vm3, %v457_v32  ;;  %v340_v26 = vadd.f32 %v5660_v35, %v6495_v55  ;;  %v431_v40 = vmax.f32 %v329_v33, 0.0  ;;  %v393_v32 = vadd.f32 %v6495_v55, %v392_v52  ;;  %v396_v35 = vadd.f32 %v6495_v55, %v395_v11 }
 0x107   :  { %5694 = vmatmul.mubr.msk.bf16.gmra.mxu1 %vm510_vm3, %v458_v29  ;;  %v331_v38 = vpop.f32.mrf.mxu0  ;;  %v453_v61 = vmax.f32 %v417_v39, 0.0  ;;  %v6324_v11 = vmov 0  }
 0x108   :  { %v434_v41 = vmax.f32 %v340_v26, 0.0  ;;  %v332_v42 = vadd.f32 %v6495_v55, %v331_v38  ;;  %1392 = vmatpush1.bf16.msra.mxu1 %v5229_v34  ;;  %v5680_v26 = vpop.f32.mrf.mxu1  ;;  %v447_v38 = vmax.f32 %v393_v32, 0.0  ;;  %1226 = vmatprep.mubr.bf16.mxu0 %v6324_v11 }
 0x109   :  { %v5663_v44 = vpop.f32.mrf.mxu0  ;;  %1393 = vmatprep.subr.bf16.mxu1 %v5222_v25 }
 0x10a   :  { %v432_v46 = vmax.f32 %v332_v42, 0.0  ;;  %v460_v49 = vpack.c.bf16 %v434_v41, %v433_v37  ;;  %v353_v50 = vadd.f32 %v5663_v44, %v6495_v55  ;;  %v411_v44 = vpop.f32.mrf.mxu1 }
 0x10b   :  { %v344_v51 = vpop.f32.mrf.mxu0  ;;  %v412_v52 = vadd.f32 %v6495_v55, %v411_v44  ;;  %v815_v44 = vld [vmem:[#allocation2 + $0x178] sm:$0xff] }
 0x10c   :  { %v459_v53 = vpack.c.bf16 %v432_v46, %v431_v40  ;;  %v345_v54 = vadd.f32 %v6495_v55, %v344_v51  ;;  %1394 = vmatpush1.bf16.msra.mxu1 %v5221_v43  ;;  %v437_v62 = vmax.f32 %v353_v50, 0.0  ;;  %v448_v43 = vmax.f32 %v396_v35, 0.0  ;;  %v819_v35 = vld [vmem:[#allocation2 + $0x198] sm:$0xff] }
 0x10d   :  { %v5664_v57 = vpop.f32.mrf.mxu0  ;;  %1395 = vmatprep.subr.bf16.mxu1 %v5214_v45  ;;  %v409_v51 = vadd.f32 %v6495_v55, %v408_v24 }
 0x10e   :  { %5697 = vmatprep.mubr.msk.bf16.mxu1 %vm510_vm3, %v459_v53  ;;  %v356_v59 = vadd.f32 %v5664_v57, %v6495_v55  ;;  %v435_v1 = vmax.f32 %v345_v54, 0.0  ;;  %v467_v50 = vpack.c.bf16 %v448_v43, %v447_v38  ;;  %v449_v53 = vmax.f32 %v401_v47, 0.0  ;;  %v811_v43 = vld [vmem:[#allocation2 + $0x158] sm:$0xff] }
 0x10f   :  { %5698 = vmatmul.mubr.msk.bf16.gmra.mxu1 %vm510_vm3, %v460_v49  ;;  %v347_v63 = vpop.f32.mrf.mxu0  ;;  %v450_v54 = vmax.f32 %v404_v48, 0.0  ;;  %v452_v57 = vmax.f32 %v412_v52, 0.0  ;;  %v802_v52 = vld [vmem:[#allocation2 + $0x110] sm:$0xff] }
 0x110   :  { %v438_v2 = vmax.f32 %v356_v59, 0.0  ;;  %v348_v3 = vadd.f32 %v6495_v55, %v347_v63  ;;  %1396 = vmatpush1.bf16.msra.mxu1 %v5213_v56  ;;  %v451_v56 = vmax.f32 %v409_v51, 0.0  ;;  %v420_v59 = vadd.f32 %v5680_v26, %v6495_v55 }
 0x111   :  { %v5667_v5 = vpop.f32.mrf.mxu0  ;;  %1397 = vmatprep.subr.bf16.mxu1 %v5206_v58  ;;  %v468_v58 = vpack.c.bf16 %v450_v54, %v449_v53  ;;  %v806_v54 = vld [vmem:[#allocation2 + $0x130] sm:$0xff] }
 0x112   :  { %v436_v7 = vmax.f32 %v348_v3, 0.0  ;;  %v462_v8 = vpack.c.bf16 %v438_v2, %v437_v62  ;;  %v369_v9 = vadd.f32 %v5667_v5, %v6495_v55  ;;  %v469_v60 = vpack.c.bf16 %v452_v57, %v451_v56  ;;  %v772_v5 = vld [vmem:[#allocation2 + $0x20] sm:$0xff]  ;;  %v803_v56 = vld [vmem:[#allocation2 + $0x118] sm:$0xff] }
 0x113   :  { %v360_v10 = vpop.f32.mrf.mxu0  ;;  %v454_v62 = vmax.f32 %v420_v59, 0.0  ;;  %v807_v57 = vld [vmem:[#allocation2 + $0x138] sm:$0xff] }
 0x114   :  { %v461_v12 = vpack.c.bf16 %v436_v7, %v435_v1  ;;  %v361_v13 = vadd.f32 %v6495_v55, %v360_v10  ;;  %1398 = vmatpush1.bf16.msra.mxu1 %v5205_v4  ;;  %v441_v18 = vmax.f32 %v369_v9, 0.0  ;;  %v780_v1 = vld [vmem:[#allocation2 + $0x60] sm:$0xff]  ;;  %v773_v7 = vld [vmem:[#allocation2 + $0x28] sm:$0xff] }
 0x115   :  { %v5668_v15 = vpop.f32.mrf.mxu0  ;;  %1399 = vmatprep.subr.bf16.mxu1 %v5198_v6  ;;  %v470_v63 = vpack.c.bf16 %v454_v62, %v453_v61  ;;  %v5195_v2 = vcombine.low %v776_v0, %v780_v1  ;;  %v5196_v3 = vcombine.high %v776_v0, %v780_v1  ;;  %v768_v4 = vld [vmem:[#allocation2] sm:$0xff]  ;;  %v769_v6 = vld [vmem:[#allocation2 + $0x8] sm:$0xff]  ;;  %v5224_v62 = vcombine.high %v802_v52, %v806_v54  ;;  %v794_v0 = vld [vmem:[#allocation2 + $0xd0] sm:$0xff] }
 0x116   :  { %5701 = vmatprep.mubr.msk.bf16.mxu1 %vm510_vm3, %v461_v12  ;;  %v372_v17 = vadd.f32 %v5668_v15, %v6495_v55  ;;  %v439_v20 = vmax.f32 %v361_v13, 0.0  ;;  %v5189_v9 = vcombine.low %v769_v6, %v773_v7  ;;  %v5190_v10 = vcombine.high %v769_v6, %v773_v7  ;;  %v826_v12 = vld [vmem:[#allocation2 + $0x1d0] sm:$0xff] }
 0x117   :  { %5702 = vmatmul.mubr.msk.bf16.gmra.mxu1 %vm510_vm3, %v462_v8  ;;  %v363_v19 = vpop.f32.mrf.mxu0  ;;  %1206 = vmatprep.subr.bf16.mxu0 %v5196_v3  ;;  %v5187_v8 = vcombine.low %v768_v4, %v772_v5  ;;  %v830_v13 = vld [vmem:[#allocation2 + $0x1f0] sm:$0xff]  ;;  %v795_v3 = vld [vmem:[#allocation2 + $0xd8] sm:$0xff]  ;;  %v5223_v6 = vcombine.low %v802_v52, %v806_v54 }
 0x118   :  { %v442_v21 = vmax.f32 %v372_v17, 0.0  ;;  %v364_v22 = vadd.f32 %v6495_v55, %v363_v19  ;;  %1400 = vmatpush1.bf16.msra.mxu1 %v5197_v14  ;;  %1207 = vmatpush1.bf16.msra.mxu0 %v5195_v2  ;;  %v5247_v14 = vcombine.low %v826_v12, %v830_v13  ;;  %v5248_v15 = vcombine.high %v826_v12, %v830_v13  ;;  %v831_v17 = vld [vmem:[#allocation2 + $0x1f8] sm:$0xff]  ;;  %v798_v2 = vld [vmem:[#allocation2 + $0xf0] sm:$0xff] }
 0x119   :  { %v5671_v23 = vpop.f32.mrf.mxu0  ;;  %1401 = vmatprep.subr.bf16.mxu1 %v5190_v10  ;;  %v5250_v19 = vcombine.high %v827_v16, %v831_v17  ;;  %v786_v10 = vld [vmem:[#allocation2 + $0x90] sm:$0xff] }
 0x11a   :  { %v440_v28 = vmax.f32 %v364_v22, 0.0  ;;  %v464_v29 = vpack.c.bf16 %v442_v21, %v441_v18  ;;  %v385_v30 = vadd.f32 %v5671_v23, %v6495_v55  ;;  %v5249_v18 = vcombine.low %v827_v16, %v831_v17  ;;  %v6556_v22 = vld [vmem:[%s7285_s4] ss:$0 sm:$0xff]  ;;  %v790_v13 = vld [vmem:[#allocation2 + $0xb0] sm:$0xff] }
 0x11b   :  { %v376_v31 = vpop.f32.mrf.mxu0  ;;  %v5215_v16 = vcombine.low %v794_v0, %v798_v2 }
 0x11c   :  { %v463_v33 = vpack.c.bf16 %v440_v28, %v439_v20  ;;  %v377_v34 = vadd.f32 %v6495_v55, %v376_v31  ;;  %v445_v36 = vmax.f32 %v385_v30, 0.0  ;;  %1402 = vmatpush1.bf16.msra.mxu1 %v5189_v9  ;;  %v818_v31 = vld [vmem:[#allocation2 + $0x190] sm:$0xff] }
 0x11d   :  { %v5672_v25 = vpop.f32.mrf.mxu0  ;;  %1773 = vmatprep.subr.bf16.mxu1 %v5250_v19 }
 0x11e   :  { %5705 = vmatprep.mubr.msk.bf16.mxu1 %vm510_vm3, %v463_v33  ;;  %v388_v27 = vadd.f32 %v5672_v25, %v6495_v55  ;;  %v443_v40 = vmax.f32 %v377_v34, 0.0  ;;  %v822_v34 = vld [vmem:[#allocation2 + $0x1b0] sm:$0xff]  ;;  %v823_v25 = vld [vmem:[#allocation2 + $0x1b8] sm:$0xff] }
 0x11f   :  { %5706 = vmatmul.mubr.msk.bf16.gmra.mxu1 %vm510_vm3, %v464_v29  ;;  %v379_v37 = vpop.f32.mrf.mxu0  ;;  %v5241_v47 = vcombine.low %v819_v35, %v823_v25 }
 0x120   :  { %v446_v41 = vmax.f32 %v388_v27, 0.0  ;;  %v380_v42 = vadd.f32 %v6495_v55, %v379_v37  ;;  %v5188_v55 = vcombine.high %v768_v4, %v772_v5  ;;  %v810_v37 = vld [vmem:[#allocation2 + $0x150] sm:$0xff]  ;;  %v799_v4 = vld [vmem:[#allocation2 + $0xf8] sm:$0xff] }
 0x121   :  { %v5218_v9 = vcombine.high %v795_v3, %v799_v4  ;;  %v5217_v19 = vcombine.low %v795_v3, %v799_v4 }
 0x122   :  { %v444_v45 = vmax.f32 %v380_v42, 0.0  ;;  %v466_v46 = vpack.c.bf16 %v446_v41, %v445_v36  ;;  %1208 = vmatprep.subr.bf16.mxu0 %v5188_v55  ;;  %v5242_v41 = vcombine.high %v819_v35, %v823_v25  ;;  %v814_v42 = vld [vmem:[#allocation2 + $0x170] sm:$0xff]  ;;  %v5225_v55 = vcombine.low %v803_v56, %v807_v57 }
 0x123   :  { %1209 = vmatpush1.bf16.msra.mxu0 %v5187_v8  ;;  %v5216_v8 = vcombine.high %v794_v0, %v798_v2 }
 0x124   :  { %v465_v49 = vpack.c.bf16 %v444_v45, %v443_v40  ;;  %1580 = vmatprep.subr.bf16.mxu0 %v5248_v15  ;;  %v5240_v40 = vcombine.high %v818_v31, %v822_v34  ;;  %v791_v15 = vld [vmem:[#allocation2 + $0xb8] sm:$0xff] }
 0x126   :  { %5709 = vmatprep.mubr.msk.bf16.mxu1 %vm510_vm3, %v465_v49  ;;  %v5232_v49 = vcombine.high %v810_v37, %v814_v42 }
 0x127   :  { %5710 = vmatmul.mubr.msk.bf16.gmra.mxu1 %vm510_vm3, %v466_v46  ;;  %v5239_v46 = vcombine.low %v818_v31, %v822_v34  ;;  %v779_v31 = vld [vmem:[#allocation2 + $0x58] sm:$0xff]  ;;  %v5207_v34 = vcombine.low %v786_v10, %v790_v13 }
 0x128   :  { %5713 = vmatprep.mubr.msk.bf16.mxu1 %vm510_vm3, %v467_v50  ;;  %v5234_v50 = vcombine.high %v811_v43, %v815_v44 }
 0x12f   :  { %5714 = vmatmul.mubr.msk.bf16.gmra.mxu1 %vm510_vm3, %v468_v58  ;;  %v5231_v58 = vcombine.low %v810_v37, %v814_v42 }
 0x130   :  { %5717 = vmatprep.mubr.msk.bf16.mxu1 %vm510_vm3, %v469_v60  ;;  %v5233_v60 = vcombine.low %v811_v43, %v815_v44 }
 0x137   :  { %5718 = vmatmul.mubr.msk.bf16.gmra.mxu1 %vm510_vm3, %v470_v63  ;;  %v5226_v63 = vcombine.high %v803_v56, %v807_v57 }
 0x138   :  { %1419 = vmatprep.mubr.bf16.mxu1 %v6324_v11 }
 0x1bf   :  { %v5691_v20 = vpop.f32.mrf.mxu1 }
 0x1c0   :  { %v602_v45 = vadd.f32 %v5691_v20, %v6556_v22 }
 0x1c1   :  { %v593_v21 = vpop.f32.mrf.mxu1 }
 0x1c2   :  { %v594_v24 = vadd.f32 %v6556_v22, %v593_v21  ;;  %v722_v53 = vmax.f32 %v602_v45, 0.0  ;;  %v5208_v21 = vcombine.high %v786_v10, %v790_v13 }
 0x1c3   :  { %v5692_v23 = vpop.f32.mrf.mxu1 }
 0x1c4   :  { %v720_v32 = vmax.f32 %v594_v24, 0.0  ;;  %v605_v27 = vadd.f32 %v5692_v23, %v6556_v22  ;;  %v778_v24 = vld [vmem:[#allocation2 + $0x50] sm:$0xff] }
 0x1c5   :  { %v596_v28 = vpop.f32.mrf.mxu1 }
 0x1c6   :  { %v597_v29 = vadd.f32 %v6556_v22, %v596_v28  ;;  %v723_v48 = vmax.f32 %v605_v27, 0.0  ;;  %v770_v27 = vld [vmem:[#allocation2 + $0x10] sm:$0xff] }
 0x1c7   :  { %v6560_v30 = vpop.f32.mrf.mxu1 }
 0x1c8   :  { %v721_v33 = vmax.f32 %v597_v29, 0.0  ;;  %v6570_v39 = vpack.c.bf16 %v723_v48, %v722_v53  ;;  %v618_v28 = vadd.f32 %v6560_v30, %v6556_v22  ;;  %v782_v29 = vld [vmem:[#allocation2 + $0x70] sm:$0xff] }
 0x1c9   :  { %v609_v26 = vpop.f32.mrf.mxu1  ;;  %v5200_v30 = vcombine.high %v778_v24, %v782_v29  ;;  %v5199_v42 = vcombine.low %v778_v24, %v782_v29 }
 0x1ca   :  { %v6563_v36 = vpack.c.bf16 %v721_v33, %v720_v32  ;;  %v610_v1 = vadd.f32 %v6556_v22, %v609_v26  ;;  %v783_v32 = vld [vmem:[#allocation2 + $0x78] sm:$0xff]  ;;  %v726_v37 = vmax.f32 %v618_v28, 0.0 }
 0x1cb   :  { %v5696_v38 = vpop.f32.mrf.mxu1  ;;  %v5202_v26 = vcombine.high %v779_v31, %v783_v32  ;;  %v5201_v43 = vcombine.low %v779_v31, %v783_v32 }
 0x1cc   :  { %1227 = vmatmul.mubr.bf16.vlgmr.msra.gmra.mxu0 %v6563_v36  ;;  %1420 = vmatmul.mubr.bf16.vlgmr.msra.gmra.mxu1 %v6563_v36  ;;  %v724_v12 = vmax.f32 %v610_v1, 0.0  ;;  %v621_v17 = vadd.f32 %v5696_v38, %v6556_v22  ;;  %v774_v38 = vld [vmem:[#allocation2 + $0x30] sm:$0xff] }
 0x1cd   :  { %1581 = vmatpush1.bf16.msra.mxu0 %v5247_v14  ;;  %1774 = vmatpush1.bf16.msra.mxu1 %v5249_v18  ;;  %v612_v51 = vpop.f32.mrf.mxu1  ;;  %v787_v14 = vld [vmem:[#allocation2 + $0x98] sm:$0xff]  ;;  %v5192_v48 = vcombine.high %v770_v27, %v774_v38  ;;  %v5191_v52 = vcombine.low %v770_v27, %v774_v38 }
 0x1ce   :  { %1236 = vmatprep.mubr.bf16.mxu0 %v6324_v11  ;;  %1429 = vmatprep.mubr.bf16.mxu1 %v6324_v11  ;;  %v613_v59 = vadd.f32 %v6556_v22, %v612_v51  ;;  %v5210_v23 = vcombine.high %v787_v14, %v791_v15  ;;  %v727_v33 = vmax.f32 %v621_v17, 0.0  ;;  %v5209_v35 = vcombine.low %v787_v14, %v791_v15 }
 0x1cf   :  { %1582 = vmatprep.subr.bf16.mxu0 %v5240_v40  ;;  %1775 = vmatprep.subr.bf16.mxu1 %v5242_v41  ;;  %v6573_v61 = vpop.f32.mrf.mxu1  ;;  %v771_v40 = vld [vmem:[#allocation2 + $0x18] sm:$0xff] }
 0x1d0   :  { %v725_v5 = vmax.f32 %v613_v59, 0.0  ;;  %v775_v41 = vld [vmem:[#allocation2 + $0x38] sm:$0xff]  ;;  %v6589_v44 = vpack.c.bf16 %v727_v33, %v726_v37  ;;  %v634_v56 = vadd.f32 %v6573_v61, %v6556_v22 }
 0x1d1   :  { %1583 = vmatpush1.bf16.msra.mxu0 %v5239_v46  ;;  %1776 = vmatpush1.bf16.msra.mxu1 %v5241_v47  ;;  %v625_v7 = vpop.f32.mrf.mxu1  ;;  %v5193_v53 = vcombine.low %v771_v40, %v775_v41 }
 0x1d2   :  { %1584 = vmatprep.subr.bf16.mxu0 %v5232_v49  ;;  %1777 = vmatprep.subr.bf16.mxu1 %v5234_v50  ;;  %v6581_v18 = vpack.c.bf16 %v725_v5, %v724_v12  ;;  %v626_v45 = vadd.f32 %v6556_v22, %v625_v7  ;;  %v5194_v49 = vcombine.high %v771_v40, %v775_v41 }
 0x1d3   :  { %v5700_v20 = vpop.f32.mrf.mxu1 }
 0x1d4   :  { %1237 = vmatmul.mubr.bf16.gmra.mxu0 %v6570_v39  ;;  %1430 = vmatmul.mubr.bf16.gmra.mxu1 %v6570_v39  ;;  %v728_v50 = vmax.f32 %v626_v45, 0.0  ;;  %v637_v57 = vadd.f32 %v5700_v20, %v6556_v22 }
 0x1d5   :  { %1246 = vmatprep.mubr.bf16.mxu0 %v6324_v11  ;;  %1439 = vmatprep.mubr.bf16.mxu1 %v6324_v11  ;;  %v628_v25 = vpop.f32.mrf.mxu1 }
 0x1d6   :  { %1585 = vmatpush1.bf16.msra.mxu0 %v5231_v58  ;;  %1778 = vmatpush1.bf16.msra.mxu1 %v5233_v60  ;;  %v629_v46 = vadd.f32 %v6556_v22, %v628_v25  ;;  %v730_v60 = vmax.f32 %v634_v56, 0.0 }
 0x1d7   :  { %1586 = vmatprep.subr.bf16.mxu0 %v5224_v62  ;;  %1779 = vmatprep.subr.bf16.mxu1 %v5226_v63  ;;  %v5703_v47 = vpop.f32.mrf.mxu1  ;;  %v731_v62 = vmax.f32 %v637_v57, 0.0 }
 0x1d8   :  { %v729_v51 = vmax.f32 %v629_v46, 0.0 }
 0x1d9   :  { %v641_v54 = vpop.f32.mrf.mxu1  ;;  %v6606_v0 = vpack.c.bf16 %v731_v62, %v730_v60 }
 0x1da   :  { %1587 = vmatpush1.bf16.msra.mxu0 %v5223_v6  ;;  %1780 = vmatpush1.bf16.msra.mxu1 %v5225_v55  ;;  %v6600_v58 = vpack.c.bf16 %v729_v51, %v728_v50  ;;  %v642_v61 = vadd.f32 %v6556_v22, %v641_v54  ;;  %v650_v6 = vadd.f32 %v5703_v47, %v6556_v22 }
 0x1db   :  { %1588 = vmatprep.subr.bf16.mxu0 %v5216_v8  ;;  %1781 = vmatprep.subr.bf16.mxu1 %v5218_v9  ;;  %v5704_v59 = vpop.f32.mrf.mxu1 }
 0x1dc   :  { %1247 = vmatmul.mubr.bf16.gmra.mxu0 %v6581_v18  ;;  %1440 = vmatmul.mubr.bf16.gmra.mxu1 %v6581_v18  ;;  %v732_v3 = vmax.f32 %v642_v61, 0.0  ;;  %v653_v55 = vadd.f32 %v5704_v59, %v6556_v22  ;;  %v734_v9 = vmax.f32 %v650_v6, 0.0 }
 0x1dd   :  { %1256 = vmatprep.mubr.bf16.mxu0 %v6324_v11  ;;  %1449 = vmatprep.mubr.bf16.mxu1 %v6324_v11  ;;  %v644_v63 = vpop.f32.mrf.mxu1 }
 0x1de   :  { %1589 = vmatpush1.bf16.msra.mxu0 %v5215_v16  ;;  %1782 = vmatpush1.bf16.msra.mxu1 %v5217_v19  ;;  %v645_v1 = vadd.f32 %v6556_v22, %v644_v63  ;;  %v735_v10 = vmax.f32 %v653_v55, 0.0 }
 0x1df   :  { %1590 = vmatprep.subr.bf16.mxu0 %v5208_v21  ;;  %1783 = vmatprep.subr.bf16.mxu1 %v5210_v23  ;;  %v5707_v2 = vpop.f32.mrf.mxu1 }
 0x1e0   :  { %v733_v4 = vmax.f32 %v645_v1, 0.0  ;;  %v6622_v13 = vpack.c.bf16 %v735_v10, %v734_v9  ;;  %v666_v21 = vadd.f32 %v5707_v2, %v6556_v22  ;;  %v5754_v10 = vld [vmem:[#allocation4 + $0xe0] ss:$16 sps:$4 sm:$0xff]  }
 0x1e1   :  { %v657_v5 = vpop.f32.mrf.mxu1 }
 0x1e2   :  { %1591 = vmatpush1.bf16.msra.mxu0 %v5207_v34  ;;  %1784 = vmatpush1.bf16.msra.mxu1 %v5209_v35  ;;  %v6616_v7 = vpack.c.bf16 %v733_v4, %v732_v3  ;;  %v658_v14 = vadd.f32 %v6556_v22, %v657_v5  ;;  %v738_v29 = vmax.f32 %v666_v21, 0.0  ;;  %v5777_v21 = vld [vmem:[#allocation4 + $0x284] ss:$16 sps:$4 sm:$0xff]  }
 0x1e3   :  { %1592 = vmatprep.subr.bf16.mxu0 %v5200_v30  ;;  %1785 = vmatprep.subr.bf16.mxu1 %v5202_v26  ;;  %v5708_v8 = vpop.f32.mrf.mxu1 }
 0x1e4   :  { %1257 = vmatmul.mubr.bf16.gmra.mxu0 %v6589_v44  ;;  %1450 = vmatmul.mubr.bf16.gmra.mxu1 %v6589_v44  ;;  %v736_v17 = vmax.f32 %v658_v14, 0.0  ;;  %v669_v23 = vadd.f32 %v5708_v8, %v6556_v22  ;;  %v5760_v14 = vld [vmem:[#allocation4 + $0xc0] ss:$16 sps:$4 sm:$0xff]  }
 0x1e5   :  { %1266 = vmatprep.mubr.bf16.mxu0 %v6324_v11  ;;  %1459 = vmatprep.mubr.bf16.mxu1 %v6324_v11  ;;  %v660_v12 = vpop.f32.mrf.mxu1 }
 0x1e6   :  { %1593 = vmatpush1.bf16.msra.mxu0 %v5199_v42  ;;  %1786 = vmatpush1.bf16.msra.mxu1 %v5201_v43  ;;  %v661_v15 = vadd.f32 %v6556_v22, %v660_v12  ;;  %v739_v31 = vmax.f32 %v669_v23, 0.0  ;;  %v5757_v12 = vld [vmem:[#allocation4 + $0x2e0] ss:$16 sps:$4 sm:$0xff]  }
 0x1e7   :  { %1594 = vmatprep.subr.bf16.mxu0 %v5192_v48  ;;  %1787 = vmatprep.subr.bf16.mxu1 %v5194_v49  ;;  %v5711_v16 = vpop.f32.mrf.mxu1  ;;  %v5772_v23 = vld [vmem:[#allocation4 + $0x80] ss:$16 sps:$4 sm:$0xff]  }
 0x1e8   :  { %v737_v19 = vmax.f32 %v661_v15, 0.0  ;;  %v6638_v33 = vpack.c.bf16 %v739_v31, %v738_v29  ;;  %v682_v37 = vadd.f32 %v5711_v16, %v6556_v22  ;;  %v5763_v15 = vld [vmem:[#allocation4 + $0x2c0] ss:$16 sps:$4 sm:$0xff]   ;;  %v5768_v16 = vld [vmem:[#allocation4 + $0xa4] ss:$16 sps:$4 sm:$0xff]  }
 0x1e9   :  { %v673_v20 = vpop.f32.mrf.mxu1  ;;  %v5780_v29 = vld [vmem:[#allocation4 + $0x64] ss:$16 sps:$4 sm:$0xff]  }
 0x1ea   :  { %1595 = vmatpush1.bf16.msra.mxu0 %v5191_v52  ;;  %1788 = vmatpush1.bf16.msra.mxu1 %v5193_v53  ;;  %v6632_v24 = vpack.c.bf16 %v737_v19, %v736_v17  ;;  %v674_v34 = vadd.f32 %v6556_v22, %v673_v20  ;;  %v742_v42 = vmax.f32 %v682_v37, 0.0  ;;  %v5771_v17 = vld [vmem:[#allocation4 + $0x2a4] ss:$16 sps:$4 sm:$0xff]   ;;  %v5766_v19 = vld [vmem:[#allocation4 + $0xa0] ss:$16 sps:$4 sm:$0xff]  }
 0x1eb   :  { %v5712_v28 = vpop.f32.mrf.mxu1  ;;  %v5774_v20 = vld [vmem:[#allocation4 + $0x84] ss:$16 sps:$4 sm:$0xff]   ;;  %v5790_v37 = vld [vmem:[#allocation4 + $0x20] ss:$16 sps:$4 sm:$0xff]  }
 0x1ec   :  { %1267 = vmatmul.mubr.bf16.gmra.mxu0 %v6600_v58  ;;  %1460 = vmatmul.mubr.bf16.gmra.mxu1 %v6600_v58  ;;  %v740_v30 = vmax.f32 %v674_v34, 0.0  ;;  %v685_v38 = vadd.f32 %v5712_v28, %v6556_v22  ;;  %v5775_v28 = vld [vmem:[#allocation4 + $0x280] ss:$16 sps:$4 sm:$0xff]   ;;  %v5783_v31 = vld [vmem:[#allocation4 + $0x264] ss:$16 sps:$4 sm:$0xff]  }
 0x1ed   :  { %1276 = vmatprep.mubr.bf16.mxu0 %v6324_v11  ;;  %1469 = vmatprep.mubr.bf16.mxu1 %v6324_v11  ;;  %v676_v32 = vpop.f32.mrf.mxu1  ;;  %v5786_v34 = vld [vmem:[#allocation4 + $0x44] ss:$16 sps:$4 sm:$0xff]  }
 0x1ee   :  { %v677_v35 = vadd.f32 %v6556_v22, %v676_v32  ;;  %v743_v43 = vmax.f32 %v685_v38, 0.0  ;;  %v5778_v32 = vld [vmem:[#allocation4 + $0x60] ss:$16 sps:$4 sm:$0xff]   ;;  %v834_v38 = vlaneseq }
 0x1ef   :  { %v5715_v25 = vpop.f32.mrf.mxu1 }
 0x1f0   :  { %v741_v26 = vmax.f32 %v677_v35, 0.0  ;;  %v6654_v46 = vpack.c.bf16 %v743_v43, %v742_v42  ;;  %v698_v53 = vadd.f32 %v5715_v25, %v6556_v22  ;;  %v5789_v35 = vld [vmem:[#allocation4 + $0x244] ss:$16 sps:$4 sm:$0xff]   ;;  %v5784_v25 = vld [vmem:[#allocation4 + $0x40] ss:$16 sps:$4 sm:$0xff]  }
 0x1f1   :  { %v689_v27 = vpop.f32.mrf.mxu1  ;;  %v5801_v42 = vld [vmem:[#allocation4 + $0x204] ss:$16 sps:$4 sm:$0xff]   ;;  %v5796_v43 = vld [vmem:[#allocation4] ss:$16 sps:$4 sm:$0xff]  }
 0x1f2   :  { %v6648_v40 = vpack.c.bf16 %v741_v26, %v740_v30  ;;  %v690_v47 = vadd.f32 %v6556_v22, %v689_v27  ;;  %v746_v59 = vmax.f32 %v698_v53, 0.0  ;;  %v5787_v30 = vld [vmem:[#allocation4 + $0x240] ss:$16 sps:$4 sm:$0xff]   ;;  %v5792_v26 = vld [vmem:[#allocation4 + $0x24] ss:$16 sps:$4 sm:$0xff]  }
 0x1f3   :  { %v5716_v41 = vpop.f32.mrf.mxu1  ;;  %v5795_v27 = vld [vmem:[#allocation4 + $0x224] ss:$16 sps:$4 sm:$0xff]  }
 0x1f4   :  { %1277 = vmatmul.mubr.bf16.gmra.mxu0 %v6606_v0  ;;  %1470 = vmatmul.mubr.bf16.gmra.mxu1 %v6606_v0  ;;  %v744_v50 = vmax.f32 %v690_v47, 0.0  ;;  %v701_v54 = vadd.f32 %v5716_v41, %v6556_v22  ;;  %v5798_v41 = vld [vmem:[#allocation4 + $0x4] ss:$16 sps:$4 sm:$0xff]   ;;  %v6720_v47 = vshrl.u32 %v834_v38, 7 }
 0x1f5   :  { %1286 = vmatprep.mubr.bf16.mxu0 %v6324_v11  ;;  %1479 = vmatprep.mubr.bf16.mxu1 %v6324_v11  ;;  %v692_v45 = vpop.f32.mrf.mxu1  ;;  %v5810_v53 = vld [vmem:[#allocation4 + $0x1c4] ss:$16 sps:$4 sm:$0xff]  }
 0x1f6   :  { %v693_v48 = vadd.f32 %v6556_v22, %v692_v45  ;;  %v747_v60 = vmax.f32 %v701_v54, 0.0  ;;  %v5799_v45 = vld [vmem:[#allocation4 + $0x200] ss:$16 sps:$4 sm:$0xff]   ;;  %v5813_v54 = vld [vmem:[#allocation4 + $0x3c4] ss:$16 sps:$4 sm:$0xff]  }
 0x1f7   :  { %v5719_v49 = vpop.f32.mrf.mxu1 }
 0x1f8   :  { %v745_v51 = vmax.f32 %v693_v48, 0.0  ;;  %v6670_v63 = vpack.c.bf16 %v747_v60, %v746_v59  ;;  %v714_v4 = vadd.f32 %v5719_v49, %v6556_v22  ;;  %v5804_v48 = vld [vmem:[#allocation4 + $0x1e4] ss:$16 sps:$4 sm:$0xff]   ;;  %v5811_v59 = vld [vmem:[#allocation4 + $0x3c0] ss:$16 sps:$4 sm:$0xff]   ;;  %v6736_v60 = vsub.s32 1, %v6720_v47 }
 0x1f9   :  { %v705_v52 = vpop.f32.mrf.mxu1  ;;  %v5807_v49 = vld [vmem:[#allocation4 + $0x3e4] ss:$16 sps:$4 sm:$0xff]  }
 0x1fa   :  { %v6664_v56 = vpack.c.bf16 %v745_v51, %v744_v50  ;;  %v706_v61 = vadd.f32 %v6556_v22, %v705_v52  ;;  %v750_v55 = vmax.f32 %v714_v4, 0.0  ;;  %v5805_v50 = vld [vmem:[#allocation4 + $0x3e0] ss:$16 sps:$4 sm:$0xff]   ;;  %v6727_v51 = vsub.s32 0, %v6720_v47 }
 0x1fb   :  { %v5720_v57 = vpop.f32.mrf.mxu1  ;;  %v844_v52 = vsub.s32 2, %v6720_v47  ;;  %v5814_v4 = vld [vmem:[#allocation4 + $0x1a0] ss:$16 sps:$4 sm:$0xff]  }
 0x1fc   :  { %1287 = vmatmul.mubr.bf16.gmra.mxu0 %v6616_v7  ;;  %1480 = vmatmul.mubr.bf16.gmra.mxu1 %v6616_v7  ;;  %v748_v2 = vmax.f32 %v706_v61, 0.0  ;;  %v717_v5 = vadd.f32 %v5720_v57, %v6556_v22  ;;  %v6733_v57 = vld [vmem:[%s7287_s6] sm:$0xff] }
 0x1fd   :  { %1296 = vmatprep.mubr.bf16.mxu0 %v6324_v11  ;;  %1489 = vmatprep.mubr.bf16.mxu1 %v6324_v11  ;;  %v708_v62 = vpop.f32.mrf.mxu1  ;;  %v6741_v61 = vrot.slane %v6733_v57, %v6727_v51 }
 0x1fe   :  { %v709_v1 = vadd.f32 %v6556_v22, %v708_v62  ;;  %v751_v8 = vmax.f32 %v717_v5, 0.0  ;;  %v5756_v22 = vld [vmem:[#allocation4 + $0xe4] ss:$16 sps:$4 sm:$0xff]   ;;  %v848_v62 = vsub.s32 3, %v6720_v47  ;;  %v5817_v5 = vld [vmem:[#allocation4 + $0x3a0] ss:$16 sps:$4 sm:$0xff]  }
 0x1ff   :  { %4132 = vmatprep.subr.bf16.mxu0 %v5756_v22  ;;  %v6752_v22 = vrot.slane %v6733_v57, %v6736_v60 }
 0x200   :  { %v749_v3 = vmax.f32 %v709_v1, 0.0  ;;  %v6686_v9 = vpack.c.bf16 %v751_v8, %v750_v55  ;;  %v6746_v1 = vrot.slane %v6733_v57, %v844_v52 }
 0x202   :  { %v6680_v6 = vpack.c.bf16 %v749_v3, %v748_v2  ;;  %v5816_v2 = vld [vmem:[#allocation4 + $0x1a4] ss:$16 sps:$4 sm:$0xff]  }
 0x203   :  { %v5819_v3 = vld [vmem:[#allocation4 + $0x3a4] ss:$16 sps:$4 sm:$0xff]  }
 0x204   :  { %1297 = vmatmul.mubr.bf16.gmra.mxu0 %v6622_v13  ;;  %1490 = vmatmul.mubr.bf16.gmra.mxu1 %v6622_v13 }
 0x205   :  { %1306 = vmatprep.mubr.bf16.mxu0 %v6324_v11  ;;  %1499 = vmatprep.mubr.bf16.mxu1 %v6324_v11 }
 0x20c   :  { %1307 = vmatmul.mubr.bf16.gmra.mxu0 %v6632_v24  ;;  %1500 = vmatmul.mubr.bf16.gmra.mxu1 %v6632_v24 }
 0x20d   :  { %1316 = vmatprep.mubr.bf16.mxu0 %v6324_v11  ;;  %1509 = vmatprep.mubr.bf16.mxu1 %v6324_v11 }
 0x214   :  { %1317 = vmatmul.mubr.bf16.gmra.mxu0 %v6638_v33  ;;  %1510 = vmatmul.mubr.bf16.gmra.mxu1 %v6638_v33 }
 0x215   :  { %1326 = vmatprep.mubr.bf16.mxu0 %v6324_v11  ;;  %1519 = vmatprep.mubr.bf16.mxu1 %v6324_v11 }
 0x21c   :  { %1327 = vmatmul.mubr.bf16.gmra.mxu0 %v6648_v40  ;;  %1520 = vmatmul.mubr.bf16.gmra.mxu1 %v6648_v40 }
 0x21d   :  { %1336 = vmatprep.mubr.bf16.mxu0 %v6324_v11  ;;  %1529 = vmatprep.mubr.bf16.mxu1 %v6324_v11 }
 0x224   :  { %1337 = vmatmul.mubr.bf16.gmra.mxu0 %v6654_v46  ;;  %1530 = vmatmul.mubr.bf16.gmra.mxu1 %v6654_v46 }
 0x225   :  { %1346 = vmatprep.mubr.bf16.mxu0 %v6324_v11  ;;  %1539 = vmatprep.mubr.bf16.mxu1 %v6324_v11 }
 0x22c   :  { %1347 = vmatmul.mubr.bf16.gmra.mxu0 %v6664_v56  ;;  %1540 = vmatmul.mubr.bf16.gmra.mxu1 %v6664_v56 }
 0x22d   :  { %1356 = vmatprep.mubr.bf16.mxu0 %v6324_v11  ;;  %1549 = vmatprep.mubr.bf16.mxu1 %v6324_v11 }
 0x234   :  { %1357 = vmatmul.mubr.bf16.gmra.mxu0 %v6670_v63  ;;  %1550 = vmatmul.mubr.bf16.gmra.mxu1 %v6670_v63 }
 0x235   :  { %1366 = vmatprep.mubr.bf16.mxu0 %v6324_v11  ;;  %1559 = vmatprep.mubr.bf16.mxu1 %v6324_v11 }
 0x23c   :  { %1367 = vmatmul.mubr.bf16.gmra.mxu0 %v6680_v6  ;;  %1560 = vmatmul.mubr.bf16.gmra.mxu1 %v6680_v6 }
 0x23d   :  { %1376 = vmatprep.mubr.bf16.mxu0 %v6324_v11  ;;  %1569 = vmatprep.mubr.bf16.mxu1 %v6324_v11 }
 0x244   :  { %1377 = vmatmul.mubr.bf16.gmra.mxu0 %v6686_v9  ;;  %1570 = vmatmul.mubr.bf16.gmra.mxu1 %v6686_v9 }
 0x245   :  { %1612 = vmatprep.mubr.bf16.mxu0 %v6324_v11  ;;  %1805 = vmatprep.mubr.bf16.mxu1 %v6324_v11 }
 0x24c   :  { %1613 = vmatmul.mubr.bf16.vlgmr.msra.gmra.mxu0 %v6563_v36  ;;  %1806 = vmatmul.mubr.bf16.vlgmr.msra.gmra.mxu1 %v6563_v36  ;;  %v5759_v36 = vld [vmem:[#allocation4 + $0x2e4] ss:$16 sps:$4 sm:$0xff]  }
 0x24d   :  { %1622 = vmatprep.mubr.bf16.mxu0 %v6324_v11  ;;  %1815 = vmatprep.mubr.bf16.mxu1 %v6324_v11 }
 0x24e   :  { %4173 = vmatprep.subr.bf16.mxu1 %v5759_v36  ;;  %4133 = vmatpush1.bf16.msra.mxu0 %v5754_v10  ;;  %v6757_v36 = vrot.slane %v6733_v57, %v848_v62 }
 0x24f   :  { %4174 = vmatpush1.bf16.msra.mxu1 %v5757_v12 }
 0x254   :  { %1623 = vmatmul.mubr.bf16.gmra.mxu0 %v6570_v39  ;;  %1816 = vmatmul.mubr.bf16.gmra.mxu1 %v6570_v39  ;;  %v5762_v39 = vld [vmem:[#allocation4 + $0xc4] ss:$16 sps:$4 sm:$0xff]  }
 0x255   :  { %1632 = vmatprep.mubr.bf16.mxu0 %v6324_v11  ;;  %1825 = vmatprep.mubr.bf16.mxu1 %v6324_v11 }
 0x256   :  { %4134 = vmatprep.subr.bf16.mxu0 %v5762_v39 }
 0x257   :  { %4135 = vmatpush1.bf16.msra.mxu0 %v5760_v14  ;;  %v5825_v14 = vld [vmem:[#allocation4 + $0x384] ss:$16 sps:$4 sm:$0xff]  }
 0x258   :  { %4136 = vmatprep.subr.bf16.mxu0 %v5768_v16  ;;  %v5823_v16 = vld [vmem:[#allocation4 + $0x380] ss:$16 sps:$4 sm:$0xff]  }
 0x25b   :  { %4137 = vmatpush1.bf16.msra.mxu0 %v5766_v19 }
 0x25c   :  { %1633 = vmatmul.mubr.bf16.gmra.mxu0 %v6581_v18  ;;  %1826 = vmatmul.mubr.bf16.gmra.mxu1 %v6581_v18  ;;  %v5765_v18 = vld [vmem:[#allocation4 + $0x2c4] ss:$16 sps:$4 sm:$0xff]  }
 0x25d   :  { %1642 = vmatprep.mubr.bf16.mxu0 %v6324_v11  ;;  %1835 = vmatprep.mubr.bf16.mxu1 %v6324_v11 }
 0x25e   :  { %4175 = vmatprep.subr.bf16.mxu1 %v5765_v18  ;;  %4138 = vmatprep.subr.bf16.mxu0 %v5774_v20 }
 0x25f   :  { %4176 = vmatpush1.bf16.msra.mxu1 %v5763_v15  ;;  %4139 = vmatpush1.bf16.msra.mxu0 %v5772_v23  ;;  %v5820_v15 = vld [vmem:[#allocation4 + $0x180] ss:$16 sps:$4 sm:$0xff]  }
 0x260   :  { %4177 = vmatprep.subr.bf16.mxu1 %v5771_v17  ;;  %4140 = vmatprep.subr.bf16.mxu0 %v5780_v29 }
 0x263   :  { %4141 = vmatpush1.bf16.msra.mxu0 %v5778_v32 }
 0x264   :  { %1643 = vmatmul.mubr.bf16.gmra.mxu0 %v6589_v44  ;;  %1836 = vmatmul.mubr.bf16.gmra.mxu1 %v6589_v44  ;;  %v5769_v44 = vld [vmem:[#allocation4 + $0x2a0] ss:$16 sps:$4 sm:$0xff]  }
 0x265   :  { %1652 = vmatprep.mubr.bf16.mxu0 %v6324_v11  ;;  %1845 = vmatprep.mubr.bf16.mxu1 %v6324_v11 }
 0x266   :  { %4178 = vmatpush1.bf16.msra.mxu1 %v5769_v44  ;;  %4142 = vmatprep.subr.bf16.mxu0 %v5786_v34  ;;  %v5831_v34 = vld [vmem:[#allocation4 + $0x364] ss:$16 sps:$4 sm:$0xff]  }
 0x267   :  { %4179 = vmatprep.subr.bf16.mxu1 %v5777_v21  ;;  %4143 = vmatpush1.bf16.msra.mxu0 %v5784_v25 }
 0x268   :  { %4144 = vmatprep.subr.bf16.mxu0 %v5792_v26 }
 0x26a   :  { %4180 = vmatpush1.bf16.msra.mxu1 %v5775_v28 }
 0x26b   :  { %4181 = vmatprep.subr.bf16.mxu1 %v5783_v31  ;;  %4145 = vmatpush1.bf16.msra.mxu0 %v5790_v37 }
 0x26c   :  { %1653 = vmatmul.mubr.bf16.gmra.mxu0 %v6600_v58  ;;  %1846 = vmatmul.mubr.bf16.gmra.mxu1 %v6600_v58  ;;  %v5781_v58 = vld [vmem:[#allocation4 + $0x260] ss:$16 sps:$4 sm:$0xff]  }
 0x26d   :  { %1662 = vmatprep.mubr.bf16.mxu0 %v6324_v11  ;;  %1855 = vmatprep.mubr.bf16.mxu1 %v6324_v11 }
 0x26e   :  { %4182 = vmatpush1.bf16.msra.mxu1 %v5781_v58  ;;  %4146 = vmatprep.subr.bf16.mxu0 %v5798_v41  ;;  %v5828_v58 = vld [vmem:[#allocation4 + $0x164] ss:$16 sps:$4 sm:$0xff]  }
 0x26f   :  { %4183 = vmatprep.subr.bf16.mxu1 %v5789_v35  ;;  %4147 = vmatpush1.bf16.msra.mxu0 %v5796_v43 }
 0x270   :  { %4148 = vmatprep.subr.bf16.mxu0 %v5804_v48 }
 0x272   :  { %4184 = vmatpush1.bf16.msra.mxu1 %v5787_v30 }
 0x273   :  { %4185 = vmatprep.subr.bf16.mxu1 %v5795_v27  ;;  %v5826_v27 = vld [vmem:[#allocation4 + $0x160] ss:$16 sps:$4 sm:$0xff]  }
 0x274   :  { %1663 = vmatmul.mubr.bf16.gmra.mxu0 %v6606_v0  ;;  %1856 = vmatmul.mubr.bf16.gmra.mxu1 %v6606_v0  ;;  %v5793_v0 = vld [vmem:[#allocation4 + $0x220] ss:$16 sps:$4 sm:$0xff]  }
 0x275   :  { %1672 = vmatprep.mubr.bf16.mxu0 %v6324_v11  ;;  %1865 = vmatprep.mubr.bf16.mxu1 %v6324_v11 }
 0x276   :  { %4186 = vmatpush1.bf16.msra.mxu1 %v5793_v0 }
 0x277   :  { %4187 = vmatprep.subr.bf16.mxu1 %v5801_v42  ;;  %v5829_v42 = vld [vmem:[#allocation4 + $0x360] ss:$16 sps:$4 sm:$0xff]  }
 0x27a   :  { %4188 = vmatpush1.bf16.msra.mxu1 %v5799_v45 }
 0x27b   :  { %4189 = vmatprep.subr.bf16.mxu1 %v5807_v49 }
 0x27c   :  { %1673 = vmatmul.mubr.bf16.gmra.mxu0 %v6616_v7  ;;  %1866 = vmatmul.mubr.bf16.gmra.mxu1 %v6616_v7  ;;  %v5802_v7 = vld [vmem:[#allocation4 + $0x1e0] ss:$16 sps:$4 sm:$0xff]  }
 0x27d   :  { %1682 = vmatprep.mubr.bf16.mxu0 %v6324_v11  ;;  %1875 = vmatprep.mubr.bf16.mxu1 %v6324_v11 }
 0x27e   :  { %4149 = vmatpush2.bf16.msra.mxu0 %v5802_v7  ;;  %4190 = vmatpush2.bf16.msra.mxu1 %v5805_v50 }
 0x27f   :  { %4150 = vmatprep.subr.bf16.mxu0 %v5810_v53  ;;  %4191 = vmatprep.subr.bf16.mxu1 %v5813_v54 }
 0x282   :  { %4192 = vmatpush2.bf16.msra.mxu1 %v5811_v59  ;;  %v5837_v59 = vld [vmem:[#allocation4 + $0x344] ss:$16 sps:$4 sm:$0xff]  }
 0x283   :  { %4193 = vmatprep.subr.bf16.mxu1 %v5819_v3 }
 0x284   :  { %1683 = vmatmul.mubr.bf16.gmra.mxu0 %v6622_v13  ;;  %1876 = vmatmul.mubr.bf16.gmra.mxu1 %v6622_v13  ;;  %v5808_v13 = vld [vmem:[#allocation4 + $0x1c0] ss:$16 sps:$4 sm:$0xff]  }
 0x285   :  { %1692 = vmatprep.mubr.bf16.mxu0 %v6324_v11  ;;  %1885 = vmatprep.mubr.bf16.mxu1 %v6324_v11 }
 0x286   :  { %4151 = vmatpush2.bf16.msra.mxu0 %v5808_v13  ;;  %4194 = vmatpush2.bf16.msra.mxu1 %v5817_v5  ;;  %v5834_v13 = vld [vmem:[#allocation4 + $0x144] ss:$16 sps:$4 sm:$0xff]   ;;  %v5832_v5 = vld [vmem:[#allocation4 + $0x140] ss:$16 sps:$4 sm:$0xff]  }
 0x287   :  { %4152 = vmatprep.subr.bf16.mxu0 %v5816_v2  ;;  %4195 = vmatprep.subr.bf16.mxu1 %v5825_v14 }
 0x28a   :  { %4153 = vmatpush2.bf16.msra.mxu0 %v5814_v4  ;;  %4196 = vmatpush2.bf16.msra.mxu1 %v5823_v16 }
 0x28b   :  { %4197 = vmatprep.subr.bf16.mxu1 %v5831_v34 }
 0x28c   :  { %v1228_v55 = vpop.f32.mrf.mxu0  ;;  %v1421_v8 = vpop.f32.mrf.mxu1  ;;  %1693 = vmatmul.mubr.bf16.gmra.mxu0 %v6632_v24  ;;  %1886 = vmatmul.mubr.bf16.gmra.mxu1 %v6632_v24  ;;  %v5822_v24 = vld [vmem:[#allocation4 + $0x184] ss:$16 sps:$4 sm:$0xff]  }
 0x28d   :  { %1702 = vmatprep.mubr.bf16.mxu0 %v6324_v11  ;;  %1895 = vmatprep.mubr.bf16.mxu1 %v6324_v11  ;;  %v1229_v10 = vadd.f32 %v1228_v55, %v6741_v61  ;;  %v1422_v12 = vadd.f32 %v1421_v8, %v6746_v1 }
 0x28e   :  { %v1230_v39 = vpop.f32.mrf.mxu0  ;;  %v1423_v18 = vpop.f32.mrf.mxu1  ;;  %4154 = vmatprep.subr.bf16.mxu0 %v5822_v24  ;;  %4198 = vmatpush2.bf16.msra.mxu1 %v5829_v42 }
 0x28f   :  { %v1231_v17 = vadd.f32 %v1230_v39, %v6752_v22  ;;  %v1424_v19 = vadd.f32 %v1423_v18, %v6757_v36  ;;  %v1966_v28 = vmax.f32 %v1229_v10, 0.0  ;;  %v1968_v29 = vmax.f32 %v1422_v12, 0.0  ;;  %4155 = vmatpush2.bf16.msra.mxu0 %v5820_v15  ;;  %4199 = vmatprep.subr.bf16.mxu1 %v5837_v59 }
 0x290   :  { %v1232_v44 = vpop.f32.mrf.mxu0  ;;  %v1425_v20 = vpop.f32.mrf.mxu1  ;;  %4156 = vmatprep.subr.bf16.mxu0 %v5828_v58 }
 0x291   :  { %v1233_v21 = vadd.f32 %v1232_v44, %v6741_v61  ;;  %v1426_v23 = vadd.f32 %v1425_v20, %v6746_v1  ;;  %v1967_v37 = vmax.f32 %v1231_v17, 0.0  ;;  %v1969_v0 = vmax.f32 %v1424_v19, 0.0  ;;  %v5835_v44 = vld [vmem:[#allocation4 + $0x340] ss:$16 sps:$4 sm:$0xff]  }
 0x292   :  { %v1234_v31 = vpop.f32.mrf.mxu0  ;;  %v1427_v32 = vpop.f32.mrf.mxu1  ;;  %4200 = vmatpush2.bf16.msra.mxu1 %v5835_v44 }
 0x293   :  { %v1974_v35 = vmax.f32 %v1233_v21, 0.0  ;;  %v1976_v25 = vmax.f32 %v1426_v23, 0.0  ;;  %v1235_v30 = vadd.f32 %v1234_v31, %v6752_v22  ;;  %v1428_v26 = vadd.f32 %v1427_v32, %v6757_v36  ;;  %4157 = vmatpush2.bf16.msra.mxu0 %v5826_v27  ;;  %v5843_v31 = vld [vmem:[#allocation4 + $0x324] ss:$16 sps:$4 sm:$0xff]  }
 0x294   :  { %v1238_v38 = vpop.f32.mrf.mxu0  ;;  %v1431_v41 = vpop.f32.mrf.mxu1  ;;  %1703 = vmatmul.mubr.bf16.gmra.mxu0 %v6638_v33  ;;  %1896 = vmatmul.mubr.bf16.gmra.mxu1 %v6638_v33 }
 0x295   :  { %v2222_v43 = vmax.f32 %v1966_v28, %v1974_v35  ;;  %v2264_v45 = vmax.f32 %v1968_v29, %v1976_v25  ;;  %v1975_v48 = vmax.f32 %v1235_v30, 0.0  ;;  %v1977_v49 = vmax.f32 %v1428_v26, 0.0  ;;  %1712 = vmatprep.mubr.bf16.mxu0 %v6324_v11  ;;  %1905 = vmatprep.mubr.bf16.mxu1 %v6324_v11  ;;  %v5840_v29 = vld [vmem:[#allocation4 + $0x124] ss:$16 sps:$4 sm:$0xff]   ;;  %v5838_v25 = vld [vmem:[#allocation4 + $0x120] ss:$16 sps:$4 sm:$0xff]  }
 0x296   :  { %v1239_v7 = vadd.f32 %v1238_v38, %v6741_v61  ;;  %v1432_v50 = vadd.f32 %v1431_v41, %v6746_v1  ;;  %v1240_v53 = vpop.f32.mrf.mxu0  ;;  %v1433_v54 = vpop.f32.mrf.mxu1  ;;  %4158 = vmatprep.subr.bf16.mxu0 %v5834_v13  ;;  %4201 = vmatprep.subr.bf16.mxu1 %v5843_v31 }
 0x297   :  { %v2243_v33 = vmax.f32 %v1967_v37, %v1975_v48  ;;  %v2285_v2 = vmax.f32 %v1969_v0, %v1977_v49  ;;  %v1241_v3 = vadd.f32 %v1240_v53, %v6752_v22  ;;  %v1434_v4 = vadd.f32 %v1433_v54, %v6757_v36  ;;  %4159 = vmatpush2.bf16.msra.mxu0 %v5832_v5 }
 0x298   :  { %v1982_v55 = vmax.f32 %v1239_v7, 0.0  ;;  %v1984_v8 = vmax.f32 %v1432_v50, 0.0  ;;  %v1242_v10 = vpop.f32.mrf.mxu0  ;;  %v1435_v12 = vpop.f32.mrf.mxu1  ;;  %4160 = vmatprep.subr.bf16.mxu0 %v5840_v29  ;;  %v5849_v50 = vld [vmem:[#allocation4 + $0x304] ss:$16 sps:$4 sm:$0xff]  }
 0x299   :  { %v1983_v39 = vmax.f32 %v1241_v3, 0.0  ;;  %v1985_v18 = vmax.f32 %v1434_v4, 0.0  ;;  %v1243_v24 = vadd.f32 %v1242_v10, %v6741_v61  ;;  %v1436_v14 = vadd.f32 %v1435_v12, %v6746_v1  ;;  %v5844_v12 = vld [vmem:[#allocation4 + $0x100] ss:$16 sps:$4 sm:$0xff]  }
 0x29a   :  { %v2223_v15 = vmax.f32 %v2222_v43, %v1982_v55  ;;  %v2265_v16 = vmax.f32 %v2264_v45, %v1984_v8  ;;  %v1244_v17 = vpop.f32.mrf.mxu0  ;;  %v1437_v19 = vpop.f32.mrf.mxu1  ;;  %v5841_v43 = vld [vmem:[#allocation4 + $0x320] ss:$16 sps:$4 sm:$0xff]   ;;  %v5846_v45 = vld [vmem:[#allocation4 + $0x104] ss:$16 sps:$4 sm:$0xff]  }
 0x29b   :  { %v2244_v20 = vmax.f32 %v2243_v33, %v1983_v39  ;;  %v2286_v21 = vmax.f32 %v2285_v2, %v1985_v18  ;;  %v1990_v23 = vmax.f32 %v1243_v24, 0.0  ;;  %v1992_v28 = vmax.f32 %v1436_v14, 0.0  ;;  %4161 = vmatpush2.bf16.msra.mxu0 %v5838_v25  ;;  %4202 = vmatpush2.bf16.msra.mxu1 %v5841_v43  ;;  %v5847_v39 = vld [vmem:[#allocation4 + $0x300] ss:$16 sps:$4 sm:$0xff]  }
 0x29c   :  { %v1245_v32 = vadd.f32 %v1244_v17, %v6752_v22  ;;  %v1438_v58 = vadd.f32 %v1437_v19, %v6757_v36  ;;  %v1248_v34 = vpop.f32.mrf.mxu0  ;;  %v1441_v35 = vpop.f32.mrf.mxu1  ;;  %1713 = vmatmul.mubr.bf16.gmra.mxu0 %v6648_v40  ;;  %1906 = vmatmul.mubr.bf16.gmra.mxu1 %v6648_v40 }
 0x29d   :  { %v2224_v30 = vmax.f32 %v2223_v15, %v1990_v23  ;;  %v2266_v26 = vmax.f32 %v2265_v16, %v1992_v28  ;;  %v1249_v27 = vadd.f32 %v1248_v34, %v6741_v61  ;;  %v1442_v37 = vadd.f32 %v1441_v35, %v6746_v1  ;;  %1722 = vmatprep.mubr.bf16.mxu0 %v6324_v11 }
 0x29e   :  { %v1991_v0 = vmax.f32 %v1245_v32, 0.0  ;;  %v1993_v38 = vmax.f32 %v1438_v58, 0.0  ;;  %v1250_v41 = vpop.f32.mrf.mxu0  ;;  %v1443_v42 = vpop.f32.mrf.mxu1  ;;  %1915 = vmatprep.mubr.bf16.mxu1 %v6324_v11  ;;  %4162 = vmatprep.subr.bf16.mxu0 %v5846_v45 }
 0x29f   :  { %v1998_v48 = vmax.f32 %v1249_v27, 0.0  ;;  %v2000_v40 = vmax.f32 %v1442_v37, 0.0  ;;  %v1251_v49 = vadd.f32 %v1250_v41, %v6752_v22  ;;  %v1444_v7 = vadd.f32 %v1443_v42, %v6757_v36  ;;  %4203 = vmatprep.subr.bf16.mxu1 %v5849_v50  ;;  %4163 = vmatpush2.bf16.msra.mxu0 %v5844_v12 }
 0x2a0   :  { %v2245_v53 = vmax.f32 %v2244_v20, %v1991_v0  ;;  %v2287_v54 = vmax.f32 %v2286_v21, %v1993_v38  ;;  %v1252_v13 = vpop.f32.mrf.mxu0  ;;  %v1445_v59 = vpop.f32.mrf.mxu1  ;;  %4204 = vmatpush2.bf16.msra.mxu1 %v5847_v39 }
 0x2a1   :  { %v2225_v33 = vmax.f32 %v2224_v30, %v1998_v48  ;;  %v2267_v2 = vmax.f32 %v2266_v26, %v2000_v40  ;;  %v1999_v3 = vmax.f32 %v1251_v49, 0.0  ;;  %v2001_v4 = vmax.f32 %v1444_v7, 0.0 }
 0x2a2   :  { %v1253_v5 = vadd.f32 %v1252_v13, %v6741_v61  ;;  %v1446_v55 = vadd.f32 %v1445_v59, %v6746_v1  ;;  %v1254_v8 = vpop.f32.mrf.mxu0  ;;  %v1447_v10 = vpop.f32.mrf.mxu1 }
 0x2a3   :  { %v2246_v18 = vmax.f32 %v2245_v53, %v1999_v3  ;;  %v2288_v24 = vmax.f32 %v2287_v54, %v2001_v4  ;;  %v1255_v14 = vadd.f32 %v1254_v8, %v6752_v22  ;;  %v1448_v15 = vadd.f32 %v1447_v10, %v6757_v36 }
 0x2a4   :  { %v2006_v16 = vmax.f32 %v1253_v5, 0.0  ;;  %v2008_v17 = vmax.f32 %v1446_v55, 0.0  ;;  %v1258_v19 = vpop.f32.mrf.mxu0  ;;  %v1451_v44 = vpop.f32.mrf.mxu1  ;;  %1723 = vmatmul.mubr.bf16.gmra.mxu0 %v6654_v46  ;;  %1916 = vmatmul.mubr.bf16.gmra.mxu1 %v6654_v46 }
 0x2a5   :  { %v2007_v20 = vmax.f32 %v1255_v14, 0.0  ;;  %v2009_v21 = vmax.f32 %v1448_v15, 0.0  ;;  %v1259_v23 = vadd.f32 %v1258_v19, %v6741_v61  ;;  %v1452_v28 = vadd.f32 %v1451_v44, %v6746_v1  ;;  %1732 = vmatprep.mubr.bf16.mxu0 %v6324_v11  ;;  %1925 = vmatprep.mubr.bf16.mxu1 %v6324_v11 }
 0x2a6   :  { %v2226_v29 = vmax.f32 %v2225_v33, %v2006_v16  ;;  %v2268_v31 = vmax.f32 %v2267_v2, %v2008_v17  ;;  %v1260_v32 = vpop.f32.mrf.mxu0  ;;  %v1453_v58 = vpop.f32.mrf.mxu1 }
 0x2a7   :  { %v2247_v34 = vmax.f32 %v2246_v18, %v2007_v20  ;;  %v2289_v35 = vmax.f32 %v2288_v24, %v2009_v21  ;;  %v2014_v25 = vmax.f32 %v1259_v23, 0.0  ;;  %v2016_v46 = vmax.f32 %v1452_v28, 0.0 }
 0x2a8   :  { %v1261_v30 = vadd.f32 %v1260_v32, %v6752_v22  ;;  %v1454_v26 = vadd.f32 %v1453_v58, %v6757_v36  ;;  %v1262_v27 = vpop.f32.mrf.mxu0  ;;  %v1455_v37 = vpop.f32.mrf.mxu1 }
 0x2a9   :  { %v2227_v0 = vmax.f32 %v2226_v29, %v2014_v25  ;;  %v2269_v38 = vmax.f32 %v2268_v31, %v2016_v46  ;;  %v1263_v41 = vadd.f32 %v1262_v27, %v6741_v61  ;;  %v1456_v42 = vadd.f32 %v1455_v37, %v6746_v1 }
 0x2aa   :  { %v2015_v43 = vmax.f32 %v1261_v30, 0.0  ;;  %v2017_v45 = vmax.f32 %v1454_v26, 0.0  ;;  %v1264_v48 = vpop.f32.mrf.mxu0  ;;  %v1457_v40 = vpop.f32.mrf.mxu1 }
 0x2ab   :  { %v2022_v49 = vmax.f32 %v1263_v41, 0.0  ;;  %v2024_v7 = vmax.f32 %v1456_v42, 0.0  ;;  %v1265_v50 = vadd.f32 %v1264_v48, %v6752_v22  ;;  %v1458_v53 = vadd.f32 %v1457_v40, %v6757_v36 }
 0x2ac   :  { %v2248_v54 = vmax.f32 %v2247_v34, %v2015_v43  ;;  %v2290_v13 = vmax.f32 %v2289_v35, %v2017_v45  ;;  %v1268_v59 = vpop.f32.mrf.mxu0  ;;  %v1461_v33 = vpop.f32.mrf.mxu1  ;;  %1733 = vmatmul.mubr.bf16.gmra.mxu0 %v6664_v56  ;;  %1926 = vmatmul.mubr.bf16.gmra.mxu1 %v6664_v56 }
 0x2ad   :  { %v2228_v2 = vmax.f32 %v2227_v0, %v2022_v49  ;;  %v2270_v3 = vmax.f32 %v2269_v38, %v2024_v7  ;;  %v2023_v4 = vmax.f32 %v1265_v50, 0.0  ;;  %v2025_v5 = vmax.f32 %v1458_v53, 0.0  ;;  %1742 = vmatprep.mubr.bf16.mxu0 %v6324_v11  ;;  %1935 = vmatprep.mubr.bf16.mxu1 %v6324_v11 }
 0x2ae   :  { %v1269_v55 = vadd.f32 %v1268_v59, %v6741_v61  ;;  %v1462_v8 = vadd.f32 %v1461_v33, %v6746_v1  ;;  %v1270_v10 = vpop.f32.mrf.mxu0  ;;  %v1463_v12 = vpop.f32.mrf.mxu1 }
 0x2af   :  { %v2249_v39 = vmax.f32 %v2248_v54, %v2023_v4  ;;  %v2291_v18 = vmax.f32 %v2290_v13, %v2025_v5  ;;  %v1271_v24 = vadd.f32 %v1270_v10, %v6752_v22  ;;  %v1464_v56 = vadd.f32 %v1463_v12, %v6757_v36 }
 0x2b0   :  { %v2030_v14 = vmax.f32 %v1269_v55, 0.0  ;;  %v2032_v15 = vmax.f32 %v1462_v8, 0.0  ;;  %v1272_v16 = vpop.f32.mrf.mxu0  ;;  %v1465_v17 = vpop.f32.mrf.mxu1 }
 0x2b1   :  { %v2031_v19 = vmax.f32 %v1271_v24, 0.0  ;;  %v2033_v44 = vmax.f32 %v1464_v56, 0.0  ;;  %v1273_v20 = vadd.f32 %v1272_v16, %v6741_v61  ;;  %v1466_v21 = vadd.f32 %v1465_v17, %v6746_v1 }
 0x2b2   :  { %v2229_v23 = vmax.f32 %v2228_v2, %v2030_v14  ;;  %v2271_v28 = vmax.f32 %v2270_v3, %v2032_v15  ;;  %v1274_v29 = vpop.f32.mrf.mxu0  ;;  %v1467_v31 = vpop.f32.mrf.mxu1 }
 0x2b3   :  { %v2250_v32 = vmax.f32 %v2249_v39, %v2031_v19  ;;  %v2292_v58 = vmax.f32 %v2291_v18, %v2033_v44  ;;  %v2038_v34 = vmax.f32 %v1273_v20, 0.0  ;;  %v2040_v35 = vmax.f32 %v1466_v21, 0.0 }
 0x2b4   :  { %v1275_v25 = vadd.f32 %v1274_v29, %v6752_v22  ;;  %v1468_v46 = vadd.f32 %v1467_v31, %v6757_v36  ;;  %v1278_v30 = vpop.f32.mrf.mxu0  ;;  %v1471_v26 = vpop.f32.mrf.mxu1  ;;  %1743 = vmatmul.mubr.bf16.gmra.mxu0 %v6670_v63  ;;  %1936 = vmatmul.mubr.bf16.gmra.mxu1 %v6670_v63 }
 0x2b5   :  { %v2230_v27 = vmax.f32 %v2229_v23, %v2038_v34  ;;  %v2272_v37 = vmax.f32 %v2271_v28, %v2040_v35  ;;  %v1279_v0 = vadd.f32 %v1278_v30, %v6741_v61  ;;  %v1472_v38 = vadd.f32 %v1471_v26, %v6746_v1  ;;  %1752 = vmatprep.mubr.bf16.mxu0 %v6324_v11 }
 0x2b6   :  { %v2039_v41 = vmax.f32 %v1275_v25, 0.0  ;;  %v2041_v42 = vmax.f32 %v1468_v46, 0.0  ;;  %v1280_v43 = vpop.f32.mrf.mxu0  ;;  %v1473_v45 = vpop.f32.mrf.mxu1  ;;  %1945 = vmatprep.mubr.bf16.mxu1 %v6324_v11 }
 0x2b7   :  { %v2046_v48 = vmax.f32 %v1279_v0, 0.0  ;;  %v2048_v40 = vmax.f32 %v1472_v38, 0.0  ;;  %v1281_v49 = vadd.f32 %v1280_v43, %v6752_v22  ;;  %v1474_v63 = vadd.f32 %v1473_v45, %v6757_v36 }
 0x2b8   :  { %v2251_v7 = vmax.f32 %v2250_v32, %v2039_v41  ;;  %v2293_v50 = vmax.f32 %v2292_v58, %v2041_v42  ;;  %v1282_v53 = vpop.f32.mrf.mxu0  ;;  %v1475_v54 = vpop.f32.mrf.mxu1 }
 0x2b9   :  { %v2231_v13 = vmax.f32 %v2230_v27, %v2046_v48  ;;  %v2273_v59 = vmax.f32 %v2272_v37, %v2048_v40  ;;  %v2047_v33 = vmax.f32 %v1281_v49, 0.0  ;;  %v2049_v2 = vmax.f32 %v1474_v63, 0.0 }
 0x2ba   :  { %v1283_v3 = vadd.f32 %v1282_v53, %v6741_v61  ;;  %v1476_v4 = vadd.f32 %v1475_v54, %v6746_v1  ;;  %v1284_v5 = vpop.f32.mrf.mxu0  ;;  %v1477_v55 = vpop.f32.mrf.mxu1 }
 0x2bb   :  { %v2252_v8 = vmax.f32 %v2251_v7, %v2047_v33  ;;  %v2294_v10 = vmax.f32 %v2293_v50, %v2049_v2  ;;  %v1285_v12 = vadd.f32 %v1284_v5, %v6752_v22  ;;  %v1478_v39 = vadd.f32 %v1477_v55, %v6757_v36 }
 0x2bc   :  { %v2054_v18 = vmax.f32 %v1283_v3, 0.0  ;;  %v2056_v24 = vmax.f32 %v1476_v4, 0.0  ;;  %v1288_v56 = vpop.f32.mrf.mxu0  ;;  %v1481_v14 = vpop.f32.mrf.mxu1  ;;  %1753 = vmatmul.mubr.bf16.gmra.mxu0 %v6680_v6  ;;  %1946 = vmatmul.mubr.bf16.gmra.mxu1 %v6680_v6 }
 0x2bd   :  { %v1289_v15 = vadd.f32 %v1288_v56, %v6741_v61  ;;  %v1482_v16 = vadd.f32 %v1481_v14, %v6746_v1  ;;  %1762 = vmatprep.mubr.bf16.mxu0 %v6324_v11  ;;  %1955 = vmatprep.mubr.bf16.mxu1 %v6324_v11  ;;  %v2055_v44 = vmax.f32 %v1285_v12, 0.0  ;;  %v2057_v20 = vmax.f32 %v1478_v39, 0.0 }
 0x2be   :  { %v2232_v17 = vmax.f32 %v2231_v13, %v2054_v18  ;;  %v2274_v19 = vmax.f32 %v2273_v59, %v2056_v24  ;;  %v1290_v21 = vpop.f32.mrf.mxu0  ;;  %v1483_v23 = vpop.f32.mrf.mxu1 }
 0x2bf   :  { %v2062_v28 = vmax.f32 %v1289_v15, 0.0  ;;  %v2064_v29 = vmax.f32 %v1482_v16, 0.0  ;;  %v1291_v31 = vadd.f32 %v1290_v21, %v6752_v22  ;;  %v1484_v6 = vadd.f32 %v1483_v23, %v6757_v36 }
 0x2c0   :  { %v1292_v32 = vpop.f32.mrf.mxu0  ;;  %v1485_v58 = vpop.f32.mrf.mxu1  ;;  %v2253_v46 = vmax.f32 %v2252_v8, %v2055_v44  ;;  %v2295_v30 = vmax.f32 %v2294_v10, %v2057_v20 }
 0x2c1   :  { %v2233_v34 = vmax.f32 %v2232_v17, %v2062_v28  ;;  %v2275_v35 = vmax.f32 %v2274_v19, %v2064_v29  ;;  %v1293_v25 = vadd.f32 %v1292_v32, %v6741_v61  ;;  %v1486_v11 = vadd.f32 %v1485_v58, %v6746_v1 }
 0x2c2   :  { %v2063_v26 = vmax.f32 %v1291_v31, 0.0  ;;  %v2065_v27 = vmax.f32 %v1484_v6, 0.0  ;;  %v1294_v37 = vpop.f32.mrf.mxu0  ;;  %v1487_v0 = vpop.f32.mrf.mxu1 }
 0x2c3   :  { %v2070_v38 = vmax.f32 %v1293_v25, 0.0  ;;  %v2072_v41 = vmax.f32 %v1486_v11, 0.0  ;;  %v1295_v42 = vadd.f32 %v1294_v37, %v6752_v22  ;;  %v1488_v43 = vadd.f32 %v1487_v0, %v6757_v36 }
 0x2c4   :  { %v2254_v45 = vmax.f32 %v2253_v46, %v2063_v26  ;;  %v2296_v48 = vmax.f32 %v2295_v30, %v2065_v27  ;;  %v1298_v40 = vpop.f32.mrf.mxu0  ;;  %v1491_v49 = vpop.f32.mrf.mxu1  ;;  %1763 = vmatmul.mubr.bf16.gmra.mxu0 %v6686_v9  ;;  %1956 = vmatmul.mubr.bf16.gmra.mxu1 %v6686_v9 }
 0x2c5   :  { %v2234_v63 = vmax.f32 %v2233_v34, %v2070_v38  ;;  %v2276_v7 = vmax.f32 %v2275_v35, %v2072_v41  ;;  %v2071_v50 = vmax.f32 %v1295_v42, 0.0  ;;  %v2073_v53 = vmax.f32 %v1488_v43, 0.0 }
 0x2c6   :  { %v1299_v54 = vadd.f32 %v1298_v40, %v6741_v61  ;;  %v1492_v13 = vadd.f32 %v1491_v49, %v6746_v1  ;;  %v1300_v59 = vpop.f32.mrf.mxu0  ;;  %v1493_v33 = vpop.f32.mrf.mxu1 }
 0x2c7   :  { %v1301_v2 = vadd.f32 %v1300_v59, %v6752_v22  ;;  %v1494_v3 = vadd.f32 %v1493_v33, %v6757_v36  ;;  %v2255_v4 = vmax.f32 %v2254_v45, %v2071_v50  ;;  %v2297_v5 = vmax.f32 %v2296_v48, %v2073_v53 }
 0x2c8   :  { %v2078_v55 = vmax.f32 %v1299_v54, 0.0  ;;  %v2080_v8 = vmax.f32 %v1492_v13, 0.0  ;;  %v1302_v10 = vpop.f32.mrf.mxu0  ;;  %v1495_v9 = vpop.f32.mrf.mxu1  ;;  %v856_v54 = vsub.s32 5, %v6720_v47  ;;  %v864_v13 = vsub.s32 7, %v6720_v47 }
 0x2c9   :  { %v2079_v12 = vmax.f32 %v1301_v2, 0.0  ;;  %v2081_v39 = vmax.f32 %v1494_v3, 0.0  ;;  %v1303_v18 = vadd.f32 %v1302_v10, %v6741_v61  ;;  %v1496_v24 = vadd.f32 %v1495_v9, %v6746_v1 }
 0x2ca   :  { %v2235_v56 = vmax.f32 %v2234_v63, %v2078_v55  ;;  %v2277_v14 = vmax.f32 %v2276_v7, %v2080_v8  ;;  %v1304_v15 = vpop.f32.mrf.mxu0  ;;  %v1497_v16 = vpop.f32.mrf.mxu1  ;;  %v852_v63 = vsub.s32 4, %v6720_v47  ;;  %v860_v7 = vsub.s32 6, %v6720_v47 }
 0x2cb   :  { %v2256_v17 = vmax.f32 %v2255_v4, %v2079_v12  ;;  %v2298_v19 = vmax.f32 %v2297_v5, %v2081_v39  ;;  %v2086_v44 = vmax.f32 %v1303_v18, 0.0  ;;  %v2088_v20 = vmax.f32 %v1496_v24, 0.0 }
 0x2cc   :  { %v1308_v21 = vpop.f32.mrf.mxu0  ;;  %v1501_v23 = vpop.f32.mrf.mxu1  ;;  %v1305_v31 = vadd.f32 %v1304_v15, %v6752_v22  ;;  %v1498_v6 = vadd.f32 %v1497_v16, %v6757_v36  ;;  %v6862_v18 = vrot.slane %v6733_v57, %v852_v63  ;;  %v6865_v24 = vrot.slane %v6733_v57, %v860_v7 }
 0x2cd   :  { %v2236_v28 = vmax.f32 %v2235_v56, %v2086_v44  ;;  %v2278_v29 = vmax.f32 %v2277_v14, %v2088_v20  ;;  %v1309_v4 = vadd.f32 %v1308_v21, %v6741_v61  ;;  %v1502_v5 = vadd.f32 %v1501_v23, %v6746_v1 }
 0x2ce   :  { %v1310_v32 = vpop.f32.mrf.mxu0  ;;  %v1503_v58 = vpop.f32.mrf.mxu1  ;;  %v2087_v25 = vmax.f32 %v1305_v31, 0.0  ;;  %v2089_v11 = vmax.f32 %v1498_v6, 0.0  ;;  %v6868_v15 = vrot.slane %v6733_v57, %v856_v54  ;;  %v6871_v16 = vrot.slane %v6733_v57, %v864_v13 }
 0x2cf   :  { %v2237_v26 = vrot.slane %v2236_v28, 4  ;;  %v2279_v27 = vrot.slane %v2278_v29, 4  ;;  %v1311_v55 = vadd.f32 %v1310_v32, %v6752_v22  ;;  %v1504_v8 = vadd.f32 %v1503_v58, %v6757_v36 }
 0x2d0   :  { %v1312_v34 = vpop.f32.mrf.mxu0  ;;  %v1505_v35 = vpop.f32.mrf.mxu1  ;;  %v2257_v38 = vmax.f32 %v2256_v17, %v2087_v25  ;;  %v2299_v41 = vmax.f32 %v2298_v19, %v2089_v11 }
 0x2d1   :  { %v2238_v45 = vmax.f32 %v2236_v28, %v2237_v26  ;;  %v2280_v48 = vmax.f32 %v2278_v29, %v2279_v27  ;;  %v1313_v59 = vadd.f32 %v1312_v34, %v6741_v61  ;;  %v1506_v33 = vadd.f32 %v1505_v35, %v6746_v1 }
 0x2d2   :  { %v1314_v46 = vpop.f32.mrf.mxu0  ;;  %v1507_v30 = vpop.f32.mrf.mxu1  ;;  %v2258_v50 = vrot.slane %v2257_v38, 4  ;;  %v2300_v53 = vrot.slane %v2299_v41, 4  ;;  %v2094_v28 = vmax.f32 %v1309_v4, 0.0  ;;  %v2096_v29 = vmax.f32 %v1502_v5, 0.0 }
 0x2d3   :  { %v2239_v10 = vrot.slane %v2238_v45, 2  ;;  %v2281_v9 = vrot.slane %v2280_v48, 2  ;;  %v2102_v17 = vmax.f32 %v1313_v59, 0.0  ;;  %v2104_v19 = vmax.f32 %v1506_v33, 0.0 }
 0x2d4   :  { %v1318_v37 = vpop.f32.mrf.mxu0  ;;  %v1511_v0 = vpop.f32.mrf.mxu1  ;;  %v2259_v56 = vmax.f32 %v2257_v38, %v2258_v50  ;;  %v2301_v14 = vmax.f32 %v2299_v41, %v2300_v53  ;;  %v1315_v44 = vadd.f32 %v1314_v46, %v6752_v22  ;;  %v1508_v20 = vadd.f32 %v1507_v30, %v6757_v36 }
 0x2d5   :  { %v2095_v31 = vmax.f32 %v1311_v55, 0.0  ;;  %v2097_v6 = vmax.f32 %v1504_v8, 0.0  ;;  %v6875_v32 = vmax.f32 %v2238_v45, %v2239_v10  ;;  %v6877_v58 = vmax.f32 %v2280_v48, %v2281_v9  ;;  %v5852_v55 = vld [vmem:[#allocation4 + $0x4e4] ss:$16 sps:$4 sm:$0xff]  }
 0x2d6   :  { %v1320_v42 = vpop.f32.mrf.mxu0  ;;  %v1513_v43 = vpop.f32.mrf.mxu1  ;;  %v1319_v34 = vadd.f32 %v1318_v37, %v6741_v61  ;;  %v1512_v57 = vadd.f32 %v1511_v0, %v6746_v1  ;;  %v2260_v11 = vrot.slane %v2259_v56, 2  ;;  %v2302_v46 = vrot.slane %v2301_v14, 2  ;;  %4214 = vmatprep.subr.bf16.mxu0 %v5852_v55 }
 0x2d7   :  { %v1321_v30 = vadd.f32 %v1320_v42, %v6752_v22  ;;  %v1514_v26 = vadd.f32 %v1513_v43, %v6757_v36  ;;  %v2390_v27 = vmax.f32 %v2094_v28, %v2102_v17  ;;  %v2432_v38 = vmax.f32 %v2096_v29, %v2104_v19  ;;  %v5855_v17 = vld [vmem:[#allocation4 + $0x6e4] ss:$16 sps:$4 sm:$0xff]  }
 0x2d8   :  { %v1322_v40 = vpop.f32.mrf.mxu0  ;;  %v1515_v49 = vpop.f32.mrf.mxu1  ;;  %v2103_v41 = vmax.f32 %v1315_v44, 0.0  ;;  %v2105_v63 = vmax.f32 %v1508_v20, 0.0  ;;  %v2241_v53 = vrot.slane %v6875_v32, 1  ;;  %v2283_v42 = vrot.slane %v6877_v58, 1  ;;  %4255 = vmatprep.subr.bf16.mxu1 %v5855_v17 }
 0x2d9   :  { %v1323_v48 = vadd.f32 %v1322_v40, %v6741_v61  ;;  %v1516_v37 = vadd.f32 %v1515_v49, %v6746_v1  ;;  %v2110_v54 = vmax.f32 %v1319_v34, 0.0  ;;  %v2112_v43 = vmax.f32 %v1512_v57, 0.0 }
 0x2da   :  { %v1324_v2 = vpop.f32.mrf.mxu0  ;;  %v1517_v3 = vpop.f32.mrf.mxu1  ;;  %v6889_v33 = vmax.f32 %v2259_v56, %v2260_v11  ;;  %v6891_v4 = vmax.f32 %v2301_v14, %v2302_v46  ;;  %v2111_v5 = vmax.f32 %v1321_v30, 0.0  ;;  %v2113_v40 = vmax.f32 %v1514_v26, 0.0 }
 0x2db   :  { %v1325_v0 = vadd.f32 %v1324_v2, %v6752_v22  ;;  %v1518_v50 = vadd.f32 %v1517_v3, %v6757_v36  ;;  %v2411_v49 = vmax.f32 %v2095_v31, %v2103_v41  ;;  %v2453_v8 = vmax.f32 %v2097_v6, %v2105_v63 }
 0x2dc   :  { %v1328_v12 = vpop.f32.mrf.mxu0  ;;  %v1521_v39 = vpop.f32.mrf.mxu1  ;;  %v2118_v19 = vmax.f32 %v1323_v48, 0.0  ;;  %v2120_v44 = vmax.f32 %v1516_v37, 0.0  ;;  %v2391_v56 = vmax.f32 %v2390_v27, %v2110_v54  ;;  %v2433_v14 = vmax.f32 %v2432_v38, %v2112_v43 }
 0x2dd   :  { %v1329_v2 = vadd.f32 %v1328_v12, %v6741_v61  ;;  %v1522_v3 = vadd.f32 %v1521_v39, %v6746_v1  ;;  %v2119_v20 = vmax.f32 %v1325_v0, 0.0  ;;  %v2121_v28 = vmax.f32 %v1518_v50, 0.0 }
 0x2de   :  { %v1330_v21 = vpop.f32.mrf.mxu0  ;;  %v1523_v23 = vpop.f32.mrf.mxu1  ;;  %v2412_v12 = vmax.f32 %v2411_v49, %v2111_v5  ;;  %v2454_v57 = vmax.f32 %v2453_v8, %v2113_v40  ;;  %v2434_v63 = vmax.f32 %v2433_v14, %v2120_v44 }
 0x2df   :  { %v1331_v29 = vadd.f32 %v1330_v21, %v6752_v22  ;;  %v1524_v34 = vadd.f32 %v1523_v23, %v6757_v36  ;;  %v2126_v46 = vmax.f32 %v1329_v2, 0.0  ;;  %v2128_v30 = vmax.f32 %v1522_v3, 0.0 }
 0x2e0   :  { %v1332_v35 = vpop.f32.mrf.mxu0  ;;  %v1525_v25 = vpop.f32.mrf.mxu1  ;;  %v2392_v21 = vmax.f32 %v2391_v56, %v2118_v19  ;;  %v2413_v23 = vmax.f32 %v2412_v12, %v2119_v20  ;;  %v2455_v48 = vmax.f32 %v2454_v57, %v2121_v28 }
 0x2e1   :  { %v1333_v39 = vadd.f32 %v1332_v35, %v6741_v61  ;;  %v1526_v11 = vadd.f32 %v1525_v25, %v6746_v1  ;;  %v2127_v37 = vmax.f32 %v1331_v29, 0.0  ;;  %v2129_v0 = vmax.f32 %v1524_v34, 0.0 }
 0x2e2   :  { %v1334_v45 = vpop.f32.mrf.mxu0  ;;  %v1527_v7 = vpop.f32.mrf.mxu1  ;;  %v2393_v40 = vmax.f32 %v2392_v21, %v2126_v46  ;;  %v2435_v55 = vmax.f32 %v2434_v63, %v2128_v30 }
 0x2e3   :  { %v1335_v26 = vadd.f32 %v1334_v45, %v6752_v22  ;;  %v1528_v27 = vadd.f32 %v1527_v7, %v6757_v36  ;;  %v2134_v43 = vmax.f32 %v1333_v39, 0.0  ;;  %v2136_v5 = vmax.f32 %v1526_v11, 0.0 }
 0x2e4   :  { %v1338_v13 = vpop.f32.mrf.mxu0  ;;  %v1531_v59 = vpop.f32.mrf.mxu1  ;;  %v2414_v44 = vmax.f32 %v2413_v23, %v2127_v37  ;;  %v2456_v20 = vmax.f32 %v2455_v48, %v2129_v0 }
 0x2e5   :  { %v1339_v50 = vadd.f32 %v1338_v13, %v6741_v61  ;;  %v1532_v35 = vadd.f32 %v1531_v59, %v6746_v1  ;;  %v2135_v49 = vmax.f32 %v1335_v26, 0.0  ;;  %v2137_v8 = vmax.f32 %v1528_v27, 0.0 }
 0x2e6   :  { %v1340_v10 = vpop.f32.mrf.mxu0  ;;  %v1533_v9 = vpop.f32.mrf.mxu1  ;;  %v2394_v14 = vmax.f32 %v2393_v40, %v2134_v43  ;;  %v2436_v29 = vmax.f32 %v2435_v55, %v2136_v5 }
 0x2e7   :  { %v1341_v45 = vadd.f32 %v1340_v10, %v6752_v22  ;;  %v1534_v7 = vadd.f32 %v1533_v9, %v6757_v36  ;;  %v2142_v28 = vmax.f32 %v1339_v50, 0.0  ;;  %v2144_v10 = vmax.f32 %v1532_v35, 0.0 }
 0x2e8   :  { %v1342_v31 = vpop.f32.mrf.mxu0  ;;  %v1535_v6 = vpop.f32.mrf.mxu1  ;;  %v2415_v57 = vmax.f32 %v2414_v44, %v2135_v49  ;;  %v2457_v39 = vmax.f32 %v2456_v20, %v2137_v8 }
 0x2e9   :  { %v1343_v17 = vadd.f32 %v1342_v31, %v6741_v61  ;;  %v1536_v13 = vadd.f32 %v1535_v6, %v6746_v1  ;;  %v2143_v34 = vmax.f32 %v1341_v45, 0.0  ;;  %v2145_v12 = vmax.f32 %v1534_v7, 0.0 }
 0x2ea   :  { %v1344_v38 = vpop.f32.mrf.mxu0  ;;  %v1537_v41 = vpop.f32.mrf.mxu1  ;;  %v2437_v21 = vmax.f32 %v2436_v29, %v2144_v10 }
 0x2eb   :  { %v1345_v59 = vadd.f32 %v1344_v38, %v6752_v22  ;;  %v1538_v19 = vadd.f32 %v1537_v41, %v6757_v36  ;;  %v2150_v30 = vmax.f32 %v1343_v17, 0.0  ;;  %v2152_v26 = vmax.f32 %v1536_v13, 0.0 }
 0x2ec   :  { %v1348_v54 = vpop.f32.mrf.mxu0  ;;  %v1541_v25 = vpop.f32.mrf.mxu1  ;;  %v2395_v41 = vmax.f32 %v2394_v14, %v2142_v28  ;;  %v2416_v0 = vmax.f32 %v2415_v57, %v2143_v34  ;;  %v2458_v50 = vmax.f32 %v2457_v39, %v2145_v12 }
 0x2ed   :  { %v1349_v31 = vadd.f32 %v1348_v54, %v6741_v61  ;;  %v1542_v6 = vadd.f32 %v1541_v25, %v6746_v1  ;;  %v2151_v27 = vmax.f32 %v1345_v59, 0.0  ;;  %v2153_v38 = vmax.f32 %v1538_v19, 0.0 }
 0x2ee   :  { %v1350_v2 = vpop.f32.mrf.mxu0  ;;  %v1543_v3 = vpop.f32.mrf.mxu1  ;;  %v2396_v55 = vmax.f32 %v2395_v41, %v2150_v30  ;;  %v2438_v49 = vmax.f32 %v2437_v21, %v2152_v26 }
 0x2ef   :  { %v1351_v63 = vadd.f32 %v1350_v2, %v6752_v22  ;;  %v1544_v23 = vadd.f32 %v1543_v3, %v6757_v36  ;;  %v2158_v25 = vmax.f32 %v1349_v31, 0.0  ;;  %v2160_v43 = vmax.f32 %v1542_v6, 0.0 }
 0x2f0   :  { %v1352_v56 = vpop.f32.mrf.mxu0  ;;  %v1545_v9 = vpop.f32.mrf.mxu1  ;;  %v2417_v8 = vmax.f32 %v2416_v0, %v2151_v27  ;;  %v2459_v2 = vmax.f32 %v2458_v50, %v2153_v38 }
 0x2f1   :  { %v1353_v35 = vadd.f32 %v1352_v56, %v6741_v61  ;;  %v1546_v54 = vadd.f32 %v1545_v9, %v6746_v1  ;;  %v2159_v3 = vmax.f32 %v1351_v63, 0.0  ;;  %v2161_v17 = vmax.f32 %v1544_v23, 0.0 }
 0x2f2   :  { %v1354_v11 = vpop.f32.mrf.mxu0  ;;  %v1547_v46 = vpop.f32.mrf.mxu1  ;;  %v2397_v9 = vmax.f32 %v2396_v55, %v2158_v25  ;;  %v2439_v14 = vmax.f32 %v2438_v49, %v2160_v43 }
 0x2f3   :  { %v1355_v5 = vadd.f32 %v1354_v11, %v6752_v22  ;;  %v1548_v45 = vadd.f32 %v1547_v46, %v6757_v36  ;;  %v2166_v20 = vmax.f32 %v1353_v35, 0.0  ;;  %v2168_v28 = vmax.f32 %v1546_v54, 0.0 }
 0x2f4   :  { %v1358_v48 = vpop.f32.mrf.mxu0  ;;  %v1551_v37 = vpop.f32.mrf.mxu1  ;;  %v2418_v46 = vmax.f32 %v2417_v8, %v2159_v3  ;;  %v2460_v30 = vmax.f32 %v2459_v2, %v2161_v17 }
 0x2f5   :  { %v1359_v13 = vadd.f32 %v1358_v48, %v6741_v61  ;;  %v1552_v59 = vadd.f32 %v1551_v37, %v6746_v1  ;;  %v2167_v29 = vmax.f32 %v1355_v5, 0.0  ;;  %v2169_v34 = vmax.f32 %v1548_v45, 0.0 }
 0x2f6   :  { %v1360_v7 = vpop.f32.mrf.mxu0  ;;  %v1553_v40 = vpop.f32.mrf.mxu1  ;;  %v2398_v21 = vmax.f32 %v2397_v9, %v2166_v20  ;;  %v2440_v63 = vmax.f32 %v2439_v14, %v2168_v28  ;;  %v6939_v20 = vmax.f32 %v6877_v58, %v2283_v42 }
 0x2f7   :  { %v1361_v10 = vadd.f32 %v1360_v7, %v6752_v22  ;;  %v1554_v56 = vadd.f32 %v1553_v40, %v6757_v36  ;;  %v2174_v26 = vmax.f32 %v1359_v13, 0.0  ;;  %v2176_v27 = vmax.f32 %v1552_v59, 0.0 }
 0x2f8   :  { %v1362_v19 = vpop.f32.mrf.mxu0  ;;  %v1555_v44 = vpop.f32.mrf.mxu1  ;;  %v2419_v37 = vmax.f32 %v2418_v46, %v2167_v29  ;;  %v2461_v0 = vmax.f32 %v2460_v30, %v2169_v34 }
 0x2f9   :  { %v1363_v39 = vadd.f32 %v1362_v19, %v6741_v61  ;;  %v1556_v31 = vadd.f32 %v1555_v44, %v6746_v1  ;;  %v2175_v23 = vmax.f32 %v1361_v10, 0.0  ;;  %v2177_v48 = vmax.f32 %v1554_v56, 0.0 }
 0x2fa   :  { %v1364_v12 = vpop.f32.mrf.mxu0  ;;  %v1557_v57 = vpop.f32.mrf.mxu1  ;;  %v2399_v40 = vmax.f32 %v2398_v21, %v2174_v26  ;;  %v2441_v55 = vmax.f32 %v2440_v63, %v2176_v27  ;;  %v6934_v44 = vmax.f32 %v6875_v32, %v2241_v53 }
 0x2fb   :  { %v1365_v6 = vadd.f32 %v1364_v12, %v6752_v22  ;;  %v1558_v11 = vadd.f32 %v1557_v57, %v6757_v36  ;;  %v2182_v43 = vmax.f32 %v1363_v39, 0.0  ;;  %v2184_v5 = vmax.f32 %v1556_v31, 0.0 }
 0x2fc   :  { %v1368_v38 = vpop.f32.mrf.mxu0  ;;  %v1561_v41 = vpop.f32.mrf.mxu1  ;;  %v2420_v17 = vmax.f32 %v2419_v37, %v2175_v23  ;;  %v2462_v13 = vmax.f32 %v2461_v0, %v2177_v48  ;;  %v2262_v0 = vrot.slane %v6889_v33, 1 }
 0x2fd   :  { %v1369_v50 = vadd.f32 %v1368_v38, %v6741_v61  ;;  %v1562_v35 = vadd.f32 %v1561_v41, %v6746_v1  ;;  %v2183_v45 = vmax.f32 %v1365_v6, 0.0  ;;  %v2185_v7 = vmax.f32 %v1558_v11, 0.0 }
 0x2fe   :  { %v1370_v54 = vpop.f32.mrf.mxu0  ;;  %v1563_v25 = vpop.f32.mrf.mxu1  ;;  %v2400_v14 = vmax.f32 %v2399_v40, %v2182_v43  ;;  %v2442_v29 = vmax.f32 %v2441_v55, %v2184_v5 }
 0x2ff   :  { %v1371_v49 = vadd.f32 %v1370_v54, %v6752_v22  ;;  %v1564_v8 = vadd.f32 %v1563_v25, %v6757_v36  ;;  %v2190_v28 = vmax.f32 %v1369_v50, 0.0  ;;  %v2192_v10 = vmax.f32 %v1562_v35, 0.0 }
 0x300   :  { %v1372_v2 = vpop.f32.mrf.mxu0  ;;  %v1565_v3 = vpop.f32.mrf.mxu1  ;;  %v2421_v34 = vmax.f32 %v2420_v17, %v2183_v45  ;;  %v2463_v12 = vmax.f32 %v2462_v13, %v2185_v7  ;;  %v2304_v50 = vrot.slane %v6891_v4, 1 }
 0x301   :  { %v1373_v59 = vadd.f32 %v1372_v2, %v6741_v61  ;;  %v1566_v19 = vadd.f32 %v1565_v3, %v6746_v1  ;;  %v2191_v57 = vmax.f32 %v1371_v49, 0.0  ;;  %v2193_v39 = vmax.f32 %v1564_v8, 0.0 }
 0x302   :  { %v1374_v56 = vpop.f32.mrf.mxu0  ;;  %v1567_v9 = vpop.f32.mrf.mxu1  ;;  %v2401_v30 = vmax.f32 %v2400_v14, %v2190_v28  ;;  %v2443_v26 = vmax.f32 %v2442_v29, %v2192_v10 }
 0x303   :  { %v1375_v31 = vadd.f32 %v1374_v56, %v6752_v22  ;;  %v1568_v32 = vadd.f32 %v1567_v9, %v6757_v36  ;;  %v2198_v11 = vmax.f32 %v1373_v59, 0.0  ;;  %v2200_v46 = vmax.f32 %v1566_v19, 0.0 }
 0x304   :  { %v1378_v53 = vpop.f32.mrf.mxu0  ;;  %v1571_v6 = vpop.f32.mrf.mxu1  ;;  %v2422_v35 = vmax.f32 %v2421_v34, %v2191_v57  ;;  %v2464_v54 = vmax.f32 %v2463_v12, %v2193_v39 }
 0x305   :  { %v1379_v58 = vadd.f32 %v1378_v53, %v6741_v61  ;;  %v1572_v42 = vadd.f32 %v1571_v6, %v6746_v1  ;;  %v2199_v27 = vmax.f32 %v1375_v31, 0.0  ;;  %v2201_v38 = vmax.f32 %v1568_v32, 0.0 }
 0x306   :  { %v1380_v41 = vpop.f32.mrf.mxu0  ;;  %v1573_v21 = vpop.f32.mrf.mxu1  ;;  %v2402_v5 = vmax.f32 %v2401_v30, %v2198_v11  ;;  %v2444_v45 = vmax.f32 %v2443_v26, %v2200_v46 }
 0x307   :  { %v2206_v63 = vmax.f32 %v1379_v58, 0.0  ;;  %v2208_v23 = vmax.f32 %v1572_v42, 0.0  ;;  %v1381_v48 = vadd.f32 %v1380_v41, %v6752_v22  ;;  %v1574_v37 = vadd.f32 %v1573_v21, %v6757_v36 }
 0x308   :  { %v1382_v25 = vpop.f32.mrf.mxu0  ;;  %v1575_v43 = vpop.f32.mrf.mxu1  ;;  %v2423_v55 = vmax.f32 %v2422_v35, %v2199_v27  ;;  %v2465_v49 = vmax.f32 %v2464_v54, %v2201_v38 }
 0x309   :  { %v2207_v7 = vmax.f32 %v1381_v48, 0.0  ;;  %v2209_v40 = vmax.f32 %v1574_v37, 0.0  ;;  %v1383_v8 = vadd.f32 %v1382_v25, %v6741_v61  ;;  %v1576_v2 = vadd.f32 %v1575_v43, %v6746_v1 }
 0x30a   :  { %v1384_v3 = vpop.f32.mrf.mxu0  ;;  %v1577_v17 = vpop.f32.mrf.mxu1  ;;  %v2403_v13 = vmax.f32 %v2402_v5, %v2206_v63  ;;  %v2445_v59 = vmax.f32 %v2444_v45, %v2208_v23 }
 0x30b   :  { %v1385_v19 = vadd.f32 %v1384_v3, %v6752_v22  ;;  %v1578_v28 = vadd.f32 %v1577_v17, %v6757_v36  ;;  %v2424_v10 = vmax.f32 %v2423_v55, %v2207_v7  ;;  %v2466_v56 = vmax.f32 %v2465_v49, %v2209_v40 }
 0x30c   :  { %v2214_v9 = vmax.f32 %v1383_v8, 0.0  ;;  %v2216_v14 = vmax.f32 %v1576_v2, 0.0  ;;  %v1614_v29 = vpop.f32.mrf.mxu0  ;;  %v1807_v34 = vpop.f32.mrf.mxu1  ;;  %v6956_v22 = vmax.f32 %v6889_v33, %v2262_v0  ;;  %v6959_v36 = vmax.f32 %v6891_v4, %v2304_v50 }
 0x30d   :  { %v2215_v12 = vmax.f32 %v1385_v19, 0.0  ;;  %v2217_v57 = vmax.f32 %v1578_v28, 0.0  ;;  %v1615_v61 = vadd.f32 %v1614_v29, %v6862_v18  ;;  %v1808_v1 = vadd.f32 %v1807_v34, %v6865_v24 }
 0x30e   :  { %v2404_v39 = vmax.f32 %v2403_v13, %v2214_v9  ;;  %v2446_v31 = vmax.f32 %v2445_v59, %v2216_v14  ;;  %v1616_v32 = vpop.f32.mrf.mxu0  ;;  %v1809_v53 = vpop.f32.mrf.mxu1 }
 0x30f   :  { %v2425_v6 = vmax.f32 %v2424_v10, %v2215_v12  ;;  %v2467_v11 = vmax.f32 %v2466_v56, %v2217_v57  ;;  %v1970_v46 = vmax.f32 %v1615_v61, 0.0  ;;  %v1972_v58 = vmax.f32 %v1808_v1, 0.0 }
 0x310   :  { %v2405_v42 = vrot.slane %v2404_v39, 4  ;;  %v2447_v30 = vrot.slane %v2446_v31, 4  ;;  %v1617_v26 = vadd.f32 %v1616_v32, %v6868_v15  ;;  %v1810_v27 = vadd.f32 %v1809_v53, %v6871_v16  ;;  %v1618_v38 = vpop.f32.mrf.mxu0  ;;  %v1811_v41 = vpop.f32.mrf.mxu1 }
 0x311   :  { %v2426_v21 = vrot.slane %v2425_v6, 4  ;;  %v2468_v63 = vrot.slane %v2467_v11, 4  ;;  %v1619_v33 = vadd.f32 %v1618_v38, %v6862_v18  ;;  %v1812_v23 = vadd.f32 %v1811_v41, %v6865_v24 }
 0x312   :  { %v2406_v4 = vmax.f32 %v2404_v39, %v2405_v42  ;;  %v2448_v48 = vmax.f32 %v2446_v31, %v2447_v30  ;;  %v1971_v37 = vmax.f32 %v1617_v26, 0.0  ;;  %v1973_v0 = vmax.f32 %v1810_v27, 0.0  ;;  %v1620_v50 = vpop.f32.mrf.mxu0  ;;  %v1813_v35 = vpop.f32.mrf.mxu1 }
 0x313   :  { %v2427_v54 = vmax.f32 %v2425_v6, %v2426_v21  ;;  %v2469_v25 = vmax.f32 %v2467_v11, %v2468_v63  ;;  %v1978_v43 = vmax.f32 %v1619_v33, 0.0  ;;  %v1980_v5 = vmax.f32 %v1812_v23, 0.0 }
 0x314   :  { %v2407_v45 = vrot.slane %v2406_v4, 2  ;;  %v2449_v7 = vrot.slane %v2448_v48, 2  ;;  %v1621_v40 = vadd.f32 %v1620_v50, %v6868_v15  ;;  %v1814_v55 = vadd.f32 %v1813_v35, %v6871_v16  ;;  %v1624_v49 = vpop.f32.mrf.mxu0  ;;  %v1817_v8 = vpop.f32.mrf.mxu1 }
 0x315   :  { %v2428_v2 = vrot.slane %v2427_v54, 2  ;;  %v2470_v3 = vrot.slane %v2469_v25, 2  ;;  %v2306_v17 = vmax.f32 %v1970_v46, %v1978_v43  ;;  %v2348_v13 = vmax.f32 %v1972_v58, %v1980_v5 }
 0x316   :  { %v2408_v59 = vmax.f32 %v2406_v4, %v2407_v45  ;;  %v2450_v19 = vmax.f32 %v2448_v48, %v2449_v7  ;;  %v1979_v28 = vmax.f32 %v1621_v40, 0.0  ;;  %v1981_v10 = vmax.f32 %v1814_v55, 0.0  ;;  %v1626_v56 = vpop.f32.mrf.mxu0  ;;  %v1819_v9 = vpop.f32.mrf.mxu1 }
 0x317   :  { %v6967_v14 = vmax.f32 %v2427_v54, %v2428_v2  ;;  %v6969_v29 = vmax.f32 %v2469_v25, %v2470_v3  ;;  %v1625_v34 = vadd.f32 %v1624_v49, %v6862_v18  ;;  %v1818_v12 = vadd.f32 %v1817_v8, %v6865_v24 }
 0x318   :  { %v2409_v57 = vrot.slane %v2408_v59, 1  ;;  %v2451_v61 = vrot.slane %v2450_v19, 1  ;;  %v2327_v1 = vmax.f32 %v1971_v37, %v1979_v28  ;;  %v2369_v39 = vmax.f32 %v1973_v0, %v1981_v10  ;;  %v1628_v31 = vpop.f32.mrf.mxu0  ;;  %v1821_v32 = vpop.f32.mrf.mxu1 }
 0x319   :  { %v2430_v53 = vrot.slane %v6967_v14, 1  ;;  %v2472_v6 = vrot.slane %v6969_v29, 1  ;;  %v1986_v11 = vmax.f32 %v1625_v34, 0.0  ;;  %v1988_v46 = vmax.f32 %v1818_v12, 0.0 }
 0x31a   :  { %v2410_v58 = vmax.f32 %v2408_v59, %v2409_v57  ;;  %v2452_v42 = vmax.f32 %v2450_v19, %v2451_v61  ;;  %v1627_v30 = vadd.f32 %v1626_v56, %v6868_v15  ;;  %v1820_v26 = vadd.f32 %v1819_v9, %v6871_v16  ;;  %v1630_v27 = vpop.f32.mrf.mxu0  ;;  %v1823_v38 = vpop.f32.mrf.mxu1 }
 0x31b   :  { %v2307_v41 = vmax.f32 %v2306_v17, %v1986_v11  ;;  %v2349_v21 = vmax.f32 %v2348_v13, %v1988_v46  ;;  %v1629_v63 = vadd.f32 %v1628_v31, %v6862_v18  ;;  %v1822_v33 = vadd.f32 %v1821_v32, %v6865_v24 }
 0x31c   :  { %v2558_v23 = vsel %vm255_vm0, %v6934_v44, %v2410_v58  ;;  %v2560_v4 = vsel %vm255_vm0, %v6939_v20, %v2452_v42  ;;  %v1987_v48 = vmax.f32 %v1627_v30, 0.0  ;;  %v1989_v37 = vmax.f32 %v1820_v26, 0.0  ;;  %v1634_v0 = vpop.f32.mrf.mxu0  ;;  %v1827_v50 = vpop.f32.mrf.mxu1 }
 0x31d   :  { %v6983_v35 = vpack.c.bf16 %v2558_v23, %v2558_v23  ;;  %v6985_v54 = vpack.c.bf16 %v2560_v4, %v2560_v4  ;;  %v1994_v25 = vmax.f32 %v1629_v63, 0.0  ;;  %v1996_v43 = vmax.f32 %v1822_v33, 0.0 }
 0x31e   :  { %v2328_v5 = vmax.f32 %v2327_v1, %v1987_v48  ;;  %v2370_v45 = vmax.f32 %v2369_v39, %v1989_v37  ;;  %v1631_v7 = vadd.f32 %v1630_v27, %v6868_v15  ;;  %v1824_v40 = vadd.f32 %v1823_v38, %v6871_v16  ;;  %v1636_v44 = vpop.f32.mrf.mxu0  ;;  %v1829_v55 = vpop.f32.mrf.mxu1 }
 0x31f   :  { %v2308_v49 = vmax.f32 %v2307_v41, %v1994_v25  ;;  %v2350_v20 = vmax.f32 %v2349_v21, %v1996_v43  ;;  %v1635_v8 = vadd.f32 %v1634_v0, %v6862_v18  ;;  %v1828_v2 = vadd.f32 %v1827_v50, %v6865_v24  ;;  %v5850_v43 = vld [vmem:[#allocation4 + $0x4e0] ss:$16 sps:$4 sm:$0xff]  }
 0x320   :  { %v1995_v3 = vmax.f32 %v1631_v7, 0.0  ;;  %v1997_v17 = vmax.f32 %v1824_v40, 0.0  ;;  %v1637_v13 = vadd.f32 %v1636_v44, %v6868_v15  ;;  %v1830_v59 = vadd.f32 %v1829_v55, %v6871_v16  ;;  %v1638_v19 = vpop.f32.mrf.mxu0  ;;  %v1831_v28 = vpop.f32.mrf.mxu1  ;;  %v5858_v55 = vld [vmem:[#allocation4 + $0x4c4] ss:$16 sps:$4 sm:$0xff]  }
 0x321   :  { %v2002_v10 = vmax.f32 %v1635_v8, 0.0  ;;  %v2004_v56 = vmax.f32 %v1828_v2, 0.0  ;;  %v1639_v9 = vadd.f32 %v1638_v19, %v6862_v18  ;;  %v1832_v34 = vadd.f32 %v1831_v28, %v6865_v24 }
 0x322   :  { %v2329_v12 = vmax.f32 %v2328_v5, %v1995_v3  ;;  %v2371_v57 = vmax.f32 %v2370_v45, %v1997_v17  ;;  %v2003_v61 = vmax.f32 %v1637_v13, 0.0  ;;  %v2005_v1 = vmax.f32 %v1830_v59, 0.0  ;;  %v1640_v39 = vpop.f32.mrf.mxu0  ;;  %v1833_v31 = vpop.f32.mrf.mxu1  ;;  %v5853_v5 = vld [vmem:[#allocation4 + $0x6e0] ss:$16 sps:$4 sm:$0xff]  }
 0x323   :  { %v2309_v32 = vmax.f32 %v2308_v49, %v2002_v10  ;;  %v2351_v11 = vmax.f32 %v2350_v20, %v2004_v56  ;;  %v2010_v46 = vmax.f32 %v1639_v9, 0.0  ;;  %v2012_v58 = vmax.f32 %v1832_v34, 0.0  ;;  %v5861_v49 = vld [vmem:[#allocation4 + $0x6c4] ss:$16 sps:$4 sm:$0xff]  }
 0x324   :  { %v2330_v42 = vmax.f32 %v2329_v12, %v2003_v61  ;;  %v2372_v30 = vmax.f32 %v2371_v57, %v2005_v1  ;;  %v2431_v26 = vmax.f32 %v6967_v14, %v2430_v53  ;;  %v2473_v27 = vmax.f32 %v6969_v29, %v2472_v6  ;;  %v1644_v38 = vpop.f32.mrf.mxu0  ;;  %v1837_v41 = vpop.f32.mrf.mxu1  ;;  %v5856_v12 = vld [vmem:[#allocation4 + $0x4c0] ss:$16 sps:$4 sm:$0xff]  }
 0x325   :  { %v2310_v21 = vmax.f32 %v2309_v32, %v2010_v46  ;;  %v2352_v63 = vmax.f32 %v2351_v11, %v2012_v58  ;;  %v1641_v33 = vadd.f32 %v1640_v39, %v6868_v15  ;;  %v1834_v23 = vadd.f32 %v1833_v31, %v6871_v16  ;;  %v5859_v31 = vld [vmem:[#allocation4 + $0x6c0] ss:$16 sps:$4 sm:$0xff]   ;;  %v5864_v32 = vld [vmem:[#allocation4 + $0x4a4] ss:$16 sps:$4 sm:$0xff]  }
 0x326   :  { %v2559_v4 = vsel %vm255_vm0, %v6956_v22, %v2431_v26  ;;  %v2561_v48 = vsel %vm255_vm0, %v6959_v36, %v2473_v27  ;;  %v1645_v37 = vadd.f32 %v1644_v38, %v6862_v18  ;;  %v1838_v14 = vadd.f32 %v1837_v41, %v6865_v24  ;;  %v1646_v53 = vpop.f32.mrf.mxu0  ;;  %v1839_v29 = vpop.f32.mrf.mxu1 }
 0x327   :  { %v7005_v6 = vpack.c.bf16 %v2559_v4, %v2559_v4  ;;  %v7007_v0 = vpack.c.bf16 %v2561_v48, %v2561_v48  ;;  %v2011_v50 = vmax.f32 %v1641_v33, 0.0  ;;  %v2013_v25 = vmax.f32 %v1834_v23, 0.0  ;;  %v5862_v4 = vld [vmem:[#allocation4 + $0x4a0] ss:$16 sps:$4 sm:$0xff]  }
 0x328   :  { %v2018_v45 = vmax.f32 %v1645_v37, 0.0  ;;  %v2020_v7 = vmax.f32 %v1838_v14, 0.0  ;;  %v1647_v22 = vadd.f32 %v1646_v53, %v6868_v15  ;;  %v1840_v36 = vadd.f32 %v1839_v29, %v6871_v16  ;;  %v1648_v40 = vpop.f32.mrf.mxu0  ;;  %v1841_v44 = vpop.f32.mrf.mxu1 }
 0x329   :  { %4164 = vmatprep.mubr.bf16.mxu0 %v7005_v6  ;;  %4205 = vmatprep.mubr.bf16.mxu1 %v7007_v0  ;;  %v2331_v20 = vmax.f32 %v2330_v42, %v2011_v50  ;;  %v2373_v8 = vmax.f32 %v2372_v30, %v2013_v25  ;;  %v1649_v2 = vadd.f32 %v1648_v40, %v6862_v18  ;;  %v5867_v30 = vld [vmem:[#allocation4 + $0x6a4] ss:$16 sps:$4 sm:$0xff]   ;;  %v5865_v50 = vld [vmem:[#allocation4 + $0x6a0] ss:$16 sps:$4 sm:$0xff]  }
 0x32a   :  { %4165 = vmatmul.mubr.bf16.vlgmr.msra.gmra.mxu0 %v6983_v35  ;;  %4206 = vmatmul.mubr.bf16.vlgmr.msra.gmra.mxu1 %v6985_v54  ;;  %v2311_v3 = vmax.f32 %v2310_v21, %v2018_v45  ;;  %v2353_v17 = vmax.f32 %v2352_v63, %v2020_v7  ;;  %v2019_v13 = vmax.f32 %v1647_v22, 0.0  ;;  %v2021_v59 = vmax.f32 %v1840_v36, 0.0  ;;  %v1650_v19 = vpop.f32.mrf.mxu0  ;;  %v1843_v28 = vpop.f32.mrf.mxu1  ;;  %v5870_v25 = vld [vmem:[#allocation4 + $0x484] ss:$16 sps:$4 sm:$0xff]  }
 0x32b   :  { %v2026_v10 = vmax.f32 %v1649_v2, 0.0  ;;  %v1842_v56 = vadd.f32 %v1841_v44, %v6865_v24  ;;  %v1651_v9 = vadd.f32 %v1650_v19, %v6868_v15  ;;  %v1844_v34 = vadd.f32 %v1843_v28, %v6871_v16  ;;  %4215 = vmatpush1.bf16.msra.mxu0 %v5850_v43  ;;  %4256 = vmatpush1.bf16.msra.mxu1 %v5853_v5  ;;  %v5873_v7 = vld [vmem:[#allocation4 + $0x684] ss:$16 sps:$4 sm:$0xff]   ;;  %v5871_v28 = vld [vmem:[#allocation4 + $0x680] ss:$16 sps:$4 sm:$0xff]  }
 0x32c   :  { %v2332_v57 = vmax.f32 %v2331_v20, %v2019_v13  ;;  %v2374_v61 = vmax.f32 %v2373_v8, %v2021_v59  ;;  %v1654_v1 = vpop.f32.mrf.mxu0  ;;  %v1847_v39 = vpop.f32.mrf.mxu1  ;;  %4216 = vmatprep.subr.bf16.mxu0 %v5858_v55  ;;  %4257 = vmatprep.subr.bf16.mxu1 %v5861_v49 }
 0x32d   :  { %v2312_v11 = vmax.f32 %v2311_v3, %v2026_v10  ;;  %v2028_v46 = vmax.f32 %v1842_v56, 0.0  ;;  %v2027_v58 = vmax.f32 %v1651_v9, 0.0  ;;  %v2029_v42 = vmax.f32 %v1844_v34, 0.0  ;;  %v5868_v3 = vld [vmem:[#allocation4 + $0x480] ss:$16 sps:$4 sm:$0xff]  }
 0x32e   :  { %v1655_v26 = vadd.f32 %v1654_v1, %v6862_v18  ;;  %v1848_v27 = vadd.f32 %v1847_v39, %v6865_v24  ;;  %v1656_v38 = vpop.f32.mrf.mxu0  ;;  %v1849_v41 = vpop.f32.mrf.mxu1  ;;  %v5876_v10 = vld [vmem:[#allocation4 + $0x464] ss:$16 sps:$4 sm:$0xff]  }
 0x32f   :  { %v2354_v21 = vmax.f32 %v2353_v17, %v2028_v46  ;;  %v2333_v63 = vmax.f32 %v2332_v57, %v2027_v58  ;;  %v2375_v33 = vmax.f32 %v2374_v61, %v2029_v42  ;;  %v1657_v23 = vadd.f32 %v1656_v38, %v6868_v15  ;;  %4217 = vmatpush1.bf16.msra.mxu0 %v5856_v12  ;;  %v5879_v57 = vld [vmem:[#allocation4 + $0x664] ss:$16 sps:$4 sm:$0xff]   ;;  %v5874_v42 = vld [vmem:[#allocation4 + $0x460] ss:$16 sps:$4 sm:$0xff]  }
 0x330   :  { %v2034_v48 = vmax.f32 %v1655_v26, 0.0  ;;  %v2036_v37 = vmax.f32 %v1848_v27, 0.0  ;;  %v1850_v14 = vadd.f32 %v1849_v41, %v6871_v16  ;;  %v1658_v53 = vpop.f32.mrf.mxu0  ;;  %v1851_v29 = vpop.f32.mrf.mxu1  ;;  %4258 = vmatpush1.bf16.msra.mxu1 %v5859_v31  ;;  %4218 = vmatprep.subr.bf16.mxu0 %v5864_v32  ;;  %v5877_v41 = vld [vmem:[#allocation4 + $0x660] ss:$16 sps:$4 sm:$0xff]  }
 0x331   :  { %v2035_v43 = vmax.f32 %v1657_v23, 0.0  ;;  %v1659_v5 = vadd.f32 %v1658_v53, %v6862_v18  ;;  %v1852_v45 = vadd.f32 %v1851_v29, %v6865_v24  ;;  %4259 = vmatprep.subr.bf16.mxu1 %v5867_v30 }
 0x332   :  { %v2313_v22 = vmax.f32 %v2312_v11, %v2034_v48  ;;  %v2355_v36 = vmax.f32 %v2354_v21, %v2036_v37  ;;  %v2037_v40 = vmax.f32 %v1850_v14, 0.0  ;;  %v1660_v44 = vpop.f32.mrf.mxu0  ;;  %v1853_v55 = vpop.f32.mrf.mxu1  ;;  %v5882_v21 = vld [vmem:[#allocation4 + $0x444] ss:$16 sps:$4 sm:$0xff]  }
 0x333   :  { %v2334_v49 = vmax.f32 %v2333_v63, %v2035_v43  ;;  %v2042_v20 = vmax.f32 %v1659_v5, 0.0  ;;  %v2044_v8 = vmax.f32 %v1852_v45, 0.0  ;;  %v1661_v2 = vadd.f32 %v1660_v44, %v6868_v15  ;;  %4219 = vmatpush1.bf16.msra.mxu0 %v5862_v4  ;;  %v5885_v48 = vld [vmem:[#allocation4 + $0x644] ss:$16 sps:$4 sm:$0xff]   ;;  %v5880_v45 = vld [vmem:[#allocation4 + $0x440] ss:$16 sps:$4 sm:$0xff]  }
 0x334   :  { %v2376_v17 = vmax.f32 %v2375_v33, %v2037_v40  ;;  %v1854_v13 = vadd.f32 %v1853_v55, %v6871_v16  ;;  %v1664_v59 = vpop.f32.mrf.mxu0  ;;  %v1857_v19 = vpop.f32.mrf.mxu1  ;;  %4260 = vmatpush1.bf16.msra.mxu1 %v5865_v50  ;;  %4220 = vmatprep.subr.bf16.mxu0 %v5870_v25  ;;  %v5883_v44 = vld [vmem:[#allocation4 + $0x640] ss:$16 sps:$4 sm:$0xff]   ;;  %v5888_v55 = vld [vmem:[#allocation4 + $0x424] ss:$16 sps:$4 sm:$0xff]  }
 0x335   :  { %v2314_v56 = vmax.f32 %v2313_v22, %v2042_v20  ;;  %v2356_v9 = vmax.f32 %v2355_v36, %v2044_v8  ;;  %v2043_v34 = vmax.f32 %v1661_v2, 0.0  ;;  %v1665_v12 = vadd.f32 %v1664_v59, %v6862_v18  ;;  %4261 = vmatprep.subr.bf16.mxu1 %v5873_v7 }
 0x336   :  { %v2045_v61 = vmax.f32 %v1854_v13, 0.0  ;;  %v1858_v1 = vadd.f32 %v1857_v19, %v6865_v24  ;;  %v1666_v39 = vpop.f32.mrf.mxu0  ;;  %v1859_v31 = vpop.f32.mrf.mxu1 }
 0x337   :  { %v2335_v32 = vmax.f32 %v2334_v49, %v2043_v34  ;;  %v2050_v11 = vmax.f32 %v1665_v12, 0.0  ;;  %v1667_v46 = vadd.f32 %v1666_v39, %v6868_v15  ;;  %v1860_v58 = vadd.f32 %v1859_v31, %v6871_v16  ;;  %4221 = vmatpush1.bf16.msra.mxu0 %v5868_v3  ;;  %v5891_v3 = vld [vmem:[#allocation4 + $0x624] ss:$16 sps:$4 sm:$0xff]   ;;  %v5886_v34 = vld [vmem:[#allocation4 + $0x420] ss:$16 sps:$4 sm:$0xff]  }
 0x338   :  { %v2377_v30 = vmax.f32 %v2376_v17, %v2045_v61  ;;  %v2052_v26 = vmax.f32 %v1858_v1, 0.0  ;;  %v1668_v27 = vpop.f32.mrf.mxu0  ;;  %v1861_v38 = vpop.f32.mrf.mxu1  ;;  %4262 = vmatpush1.bf16.msra.mxu1 %v5871_v28  ;;  %4222 = vmatprep.subr.bf16.mxu0 %v5876_v10  ;;  %v5889_v39 = vld [vmem:[#allocation4 + $0x620] ss:$16 sps:$4 sm:$0xff]   ;;  %v5894_v31 = vld [vmem:[#allocation4 + $0x404] ss:$16 sps:$4 sm:$0xff]  }
 0x339   :  { %v2315_v63 = vmax.f32 %v2314_v56, %v2050_v11  ;;  %v2051_v33 = vmax.f32 %v1667_v46, 0.0  ;;  %v2053_v23 = vmax.f32 %v1860_v58, 0.0  ;;  %v1669_v4 = vadd.f32 %v1668_v27, %v6862_v18  ;;  %4263 = vmatprep.subr.bf16.mxu1 %v5879_v57 }
 0x33a   :  { %v2357_v37 = vmax.f32 %v2356_v9, %v2052_v26  ;;  %v1862_v14 = vadd.f32 %v1861_v38, %v6865_v24  ;;  %v1670_v53 = vpop.f32.mrf.mxu0  ;;  %v1863_v29 = vpop.f32.mrf.mxu1 }
 0x33b   :  { %v2336_v50 = vmax.f32 %v2335_v32, %v2051_v33  ;;  %v2378_v25 = vmax.f32 %v2377_v30, %v2053_v23  ;;  %v2058_v43 = vmax.f32 %v1669_v4, 0.0  ;;  %v1671_v5 = vadd.f32 %v1670_v53, %v6868_v15  ;;  %4223 = vmatpush1.bf16.msra.mxu0 %v5874_v42  ;;  %v5897_v42 = vld [vmem:[#allocation4 + $0x604] ss:$16 sps:$4 sm:$0xff]   ;;  %v5892_v23 = vld [vmem:[#allocation4 + $0x400] ss:$16 sps:$4 sm:$0xff]  }
 0x33c   :  { %v2060_v7 = vmax.f32 %v1862_v14, 0.0  ;;  %v1864_v22 = vadd.f32 %v1863_v29, %v6871_v16  ;;  %v1674_v36 = vpop.f32.mrf.mxu0  ;;  %v1867_v40 = vpop.f32.mrf.mxu1  ;;  %4264 = vmatpush1.bf16.msra.mxu1 %v5877_v41  ;;  %4224 = vmatprep.subr.bf16.mxu0 %v5882_v21  ;;  %v5895_v53 = vld [vmem:[#allocation4 + $0x600] ss:$16 sps:$4 sm:$0xff]   ;;  %v5900_v29 = vld [vmem:[#allocation4 + $0x5e4] ss:$16 sps:$4 sm:$0xff]  }
 0x33d   :  { %v2316_v49 = vmax.f32 %v2315_v63, %v2058_v43  ;;  %v2059_v20 = vmax.f32 %v1671_v5, 0.0  ;;  %v1675_v8 = vadd.f32 %v1674_v36, %v6862_v18  ;;  %v1868_v2 = vadd.f32 %v1867_v40, %v6865_v24  ;;  %4265 = vmatprep.subr.bf16.mxu1 %v5885_v48 }
 0x33e   :  { %v2358_v17 = vmax.f32 %v2357_v37, %v2060_v7  ;;  %v2061_v13 = vmax.f32 %v1864_v22, 0.0  ;;  %v1676_v59 = vpop.f32.mrf.mxu0  ;;  %v1869_v19 = vpop.f32.mrf.mxu1 }
 0x33f   :  { %v2337_v28 = vmax.f32 %v2336_v50, %v2059_v20  ;;  %v2066_v10 = vmax.f32 %v1675_v8, 0.0  ;;  %v2068_v56 = vmax.f32 %v1868_v2, 0.0  ;;  %v1677_v9 = vadd.f32 %v1676_v59, %v6868_v15  ;;  %4225 = vmatpush1.bf16.msra.mxu0 %v5880_v45  ;;  %v5903_v45 = vld [vmem:[#allocation4 + $0x7e4] ss:$16 sps:$4 sm:$0xff]   ;;  %v5898_v8 = vld [vmem:[#allocation4 + $0x5e0] ss:$16 sps:$4 sm:$0xff]  }
 0x340   :  { %v2379_v12 = vmax.f32 %v2378_v25, %v2061_v13  ;;  %v1870_v57 = vadd.f32 %v1869_v19, %v6871_v16  ;;  %v1678_v61 = vpop.f32.mrf.mxu0  ;;  %v1871_v1 = vpop.f32.mrf.mxu1  ;;  %4266 = vmatpush1.bf16.msra.mxu1 %v5883_v44  ;;  %4226 = vmatprep.subr.bf16.mxu0 %v5888_v55  ;;  %v5901_v59 = vld [vmem:[#allocation4 + $0x7e0] ss:$16 sps:$4 sm:$0xff]   ;;  %v5906_v19 = vld [vmem:[#allocation4 + $0x5c4] ss:$16 sps:$4 sm:$0xff]  }
 0x341   :  { %v2317_v32 = vmax.f32 %v2316_v49, %v2066_v10  ;;  %v2359_v11 = vmax.f32 %v2358_v17, %v2068_v56  ;;  %v2067_v46 = vmax.f32 %v1677_v9, 0.0  ;;  %v1679_v58 = vadd.f32 %v1678_v61, %v6862_v18  ;;  %4267 = vmatprep.subr.bf16.mxu1 %v5891_v3 }
 0x342   :  { %v2069_v30 = vmax.f32 %v1870_v57, 0.0  ;;  %v1872_v26 = vadd.f32 %v1871_v1, %v6865_v24  ;;  %v1680_v27 = vpop.f32.mrf.mxu0  ;;  %v1873_v38 = vpop.f32.mrf.mxu1 }
 0x343   :  { %v2338_v41 = vmax.f32 %v2337_v28, %v2067_v46  ;;  %v2074_v21 = vmax.f32 %v1679_v58, 0.0  ;;  %v1681_v63 = vadd.f32 %v1680_v27, %v6868_v15  ;;  %v1874_v33 = vadd.f32 %v1873_v38, %v6871_v16  ;;  %4227 = vmatpush1.bf16.msra.mxu0 %v5886_v34  ;;  %v5909_v34 = vld [vmem:[#allocation4 + $0x7c4] ss:$16 sps:$4 sm:$0xff]   ;;  %v5904_v46 = vld [vmem:[#allocation4 + $0x5c0] ss:$16 sps:$4 sm:$0xff]  }
 0x344   :  { %v2380_v4 = vmax.f32 %v2379_v12, %v2069_v30  ;;  %v2076_v48 = vmax.f32 %v1872_v26, 0.0  ;;  %v1684_v37 = vpop.f32.mrf.mxu0  ;;  %v1877_v14 = vpop.f32.mrf.mxu1  ;;  %4268 = vmatpush1.bf16.msra.mxu1 %v5889_v39  ;;  %4228 = vmatprep.subr.bf16.mxu0 %v5894_v31  ;;  %v5907_v27 = vld [vmem:[#allocation4 + $0x7c0] ss:$16 sps:$4 sm:$0xff]   ;;  %v5912_v38 = vld [vmem:[#allocation4 + $0x5a4] ss:$16 sps:$4 sm:$0xff]  }
 0x345   :  { %v2318_v50 = vmax.f32 %v2317_v32, %v2074_v21  ;;  %v2075_v25 = vmax.f32 %v1681_v63, 0.0  ;;  %v2077_v43 = vmax.f32 %v1874_v33, 0.0  ;;  %v1685_v5 = vadd.f32 %v1684_v37, %v6862_v18  ;;  %4269 = vmatprep.subr.bf16.mxu1 %v5897_v42  ;;  %v5915_v33 = vld [vmem:[#allocation4 + $0x7a4] ss:$16 sps:$4 sm:$0xff]  }
 0x346   :  { %v2360_v7 = vmax.f32 %v2359_v11, %v2076_v48  ;;  %v1878_v22 = vadd.f32 %v1877_v14, %v6865_v24  ;;  %v1686_v36 = vpop.f32.mrf.mxu0  ;;  %v1879_v40 = vpop.f32.mrf.mxu1  ;;  %v5910_v14 = vld [vmem:[#allocation4 + $0x5a0] ss:$16 sps:$4 sm:$0xff]  }
 0x347   :  { %v2339_v44 = vmax.f32 %v2338_v41, %v2075_v25  ;;  %v2381_v55 = vmax.f32 %v2380_v4, %v2077_v43  ;;  %v2082_v49 = vmax.f32 %v1685_v5, 0.0  ;;  %v1687_v20 = vadd.f32 %v1686_v36, %v6868_v15  ;;  %4229 = vmatpush1.bf16.msra.mxu0 %v5892_v23  ;;  %v5913_v25 = vld [vmem:[#allocation4 + $0x7a0] ss:$16 sps:$4 sm:$0xff]   ;;  %v5918_v43 = vld [vmem:[#allocation4 + $0x584] ss:$16 sps:$4 sm:$0xff]  }
 0x348   :  { %v2084_v2 = vmax.f32 %v1878_v22, 0.0  ;;  %v1880_v3 = vadd.f32 %v1879_v40, %v6871_v16  ;;  %v1688_v17 = vpop.f32.mrf.mxu0  ;;  %v1881_v13 = vpop.f32.mrf.mxu1  ;;  %4270 = vmatpush1.bf16.msra.mxu1 %v5895_v53  ;;  %4230 = vmatprep.subr.bf16.mxu0 %v5900_v29  ;;  %v5921_v5 = vld [vmem:[#allocation4 + $0x784] ss:$16 sps:$4 sm:$0xff]   ;;  %v5916_v22 = vld [vmem:[#allocation4 + $0x580] ss:$16 sps:$4 sm:$0xff]  }
 0x349   :  { %v2319_v28 = vmax.f32 %v2318_v50, %v2082_v49  ;;  %v2083_v10 = vmax.f32 %v1687_v20, 0.0  ;;  %v1689_v56 = vadd.f32 %v1688_v17, %v6862_v18  ;;  %v1882_v9 = vadd.f32 %v1881_v13, %v6865_v24  ;;  %4271 = vmatprep.subr.bf16.mxu1 %v5903_v45  ;;  %v5927_v49 = vld [vmem:[#allocation4 + $0x764] ss:$16 sps:$4 sm:$0xff]   ;;  %v5925_v13 = vld [vmem:[#allocation4 + $0x760] ss:$16 sps:$4 sm:$0xff]  }
 0x34a   :  { %v2361_v12 = vmax.f32 %v2360_v7, %v2084_v2  ;;  %v2085_v57 = vmax.f32 %v1880_v3, 0.0  ;;  %v1690_v61 = vpop.f32.mrf.mxu0  ;;  %v1883_v1 = vpop.f32.mrf.mxu1  ;;  %v5922_v2 = vld [vmem:[#allocation4 + $0x560] ss:$16 sps:$4 sm:$0xff]  }
 0x34b   :  { %v2340_v39 = vmax.f32 %v2339_v44, %v2083_v10  ;;  %v2090_v31 = vmax.f32 %v1689_v56, 0.0  ;;  %v2092_v32 = vmax.f32 %v1882_v9, 0.0  ;;  %v1691_v11 = vadd.f32 %v1690_v61, %v6868_v15  ;;  %4231 = vmatpush2.bf16.msra.mxu0 %v5898_v8  ;;  %v5919_v44 = vld [vmem:[#allocation4 + $0x780] ss:$16 sps:$4 sm:$0xff]  }
 0x34c   :  { %v2382_v58 = vmax.f32 %v2381_v55, %v2085_v57  ;;  %v1884_v42 = vadd.f32 %v1883_v1, %v6871_v16  ;;  %v1694_v30 = vpop.f32.mrf.mxu0  ;;  %v1887_v26 = vpop.f32.mrf.mxu1  ;;  %4272 = vmatpush2.bf16.msra.mxu1 %v5901_v59  ;;  %4232 = vmatprep.subr.bf16.mxu0 %v5906_v19  ;;  %v5924_v55 = vld [vmem:[#allocation4 + $0x564] ss:$16 sps:$4 sm:$0xff]   ;;  %v5928_v9 = vld [vmem:[#allocation4 + $0x540] ss:$16 sps:$4 sm:$0xff]  }
 0x34d   :  { %v7051_v41 = vmax.f32 %v2319_v28, %v2090_v31  ;;  %v7053_v21 = vmax.f32 %v2361_v12, %v2092_v32  ;;  %v2091_v63 = vmax.f32 %v1691_v11, 0.0  ;;  %4273 = vmatprep.subr.bf16.mxu1 %v5909_v34  ;;  %v5930_v59 = vld [vmem:[#allocation4 + $0x544] ss:$16 sps:$4 sm:$0xff]   ;;  %v7066_v56 = vadd.f32 %v1694_v30, %v6862_v18  ;;  %v5931_v61 = vld [vmem:[#allocation4 + $0x740] ss:$16 sps:$4 sm:$0xff]  }
 0x34e   :  { %v2093_v23 = vmax.f32 %v1884_v42, 0.0  ;;  %v1696_v4 = vpop.f32.mrf.mxu0  ;;  %v1889_v48 = vpop.f32.mrf.mxu1  ;;  %v5933_v19 = vld [vmem:[#allocation4 + $0x744] ss:$16 sps:$4 sm:$0xff]   ;;  %v7069_v34 = vadd.f32 %v1887_v26, %v6865_v24 }
 0x34f   :  { %v7055_v37 = vmax.f32 %v2340_v39, %v2091_v63  ;;  %4233 = vmatpush2.bf16.msra.mxu0 %v5904_v46  ;;  %v5936_v1 = vld [vmem:[#allocation4 + $0x524] ss:$16 sps:$4 sm:$0xff]   ;;  %v2321_v39 = vrot.slane %v7051_v41, 4  ;;  %v2363_v11 = vrot.slane %v7053_v21, 4  ;;  %v2098_v30 = vmax.f32 %v7066_v56, 0.0 }
 0x350   :  { %v7057_v53 = vmax.f32 %v2382_v58, %v2093_v23  ;;  %v1698_v29 = vpop.f32.mrf.mxu0  ;;  %v1891_v50 = vpop.f32.mrf.mxu1  ;;  %4274 = vmatpush2.bf16.msra.mxu1 %v5907_v27  ;;  %4234 = vmatprep.subr.bf16.mxu0 %v5912_v38  ;;  %v5939_v32 = vld [vmem:[#allocation4 + $0x724] ss:$16 sps:$4 sm:$0xff]   ;;  %v1697_v26 = vadd.f32 %v1696_v4, %v6868_v15  ;;  %v1890_v27 = vadd.f32 %v1889_v48, %v6871_v16  ;;  %v5934_v63 = vld [vmem:[#allocation4 + $0x520] ss:$16 sps:$4 sm:$0xff]  }
 0x351   :  { %4275 = vmatprep.subr.bf16.mxu1 %v5915_v33  ;;  %v1699_v31 = vadd.f32 %v1698_v29, %v6862_v18  ;;  %v1892_v46 = vadd.f32 %v1891_v50, %v6865_v24  ;;  %v5937_v33 = vld [vmem:[#allocation4 + $0x720] ss:$16 sps:$4 sm:$0xff]   ;;  %v2342_v23 = vrot.slane %v7055_v37, 4  ;;  %v2100_v29 = vmax.f32 %v7069_v34, 0.0  ;;  %v5942_v4 = vld [vmem:[#allocation4 + $0x504] ss:$16 sps:$4 sm:$0xff]  }
 0x352   :  { %v1700_v45 = vpop.f32.mrf.mxu0  ;;  %v1893_v7 = vpop.f32.mrf.mxu1  ;;  %v7094_v48 = vmax.f32 %v7051_v41, %v2321_v39  ;;  %v2101_v41 = vmax.f32 %v1890_v27, 0.0  ;;  %v5948_v39 = vld [vmem:[#allocation4 + $0xec] ss:$16 sps:$4 sm:$0xff]  }
 0x353   :  { %4235 = vmatpush2.bf16.msra.mxu0 %v5910_v14  ;;  %v1701_v38 = vadd.f32 %v1700_v45, %v6868_v15  ;;  %v2384_v14 = vrot.slane %v7057_v53, 4  ;;  %v1894_v50 = vadd.f32 %v1893_v7, %v6871_v16  ;;  %v2108_v7 = vmax.f32 %v1892_v46, 0.0 }
 0x354   :  { %v1704_v36 = vpop.f32.mrf.mxu0  ;;  %v1897_v40 = vpop.f32.mrf.mxu1  ;;  %4276 = vmatpush2.bf16.msra.mxu1 %v5913_v25  ;;  %4236 = vmatprep.subr.bf16.mxu0 %v5918_v43 }
 0x355   :  { %4277 = vmatprep.subr.bf16.mxu1 %v5921_v5  ;;  %v2106_v5 = vmax.f32 %v1699_v31, 0.0  ;;  %v1705_v45 = vadd.f32 %v1704_v36, %v6862_v18  ;;  %v2107_v56 = vmax.f32 %v1701_v38, 0.0  ;;  %v5940_v36 = vld [vmem:[#allocation4 + $0x500] ss:$16 sps:$4 sm:$0xff]   ;;  %v2109_v34 = vmax.f32 %v1894_v50, 0.0 }
 0x356   :  { %v1706_v20 = vpop.f32.mrf.mxu0  ;;  %v1899_v8 = vpop.f32.mrf.mxu1 }
 0x357   :  { %4237 = vmatpush2.bf16.msra.mxu0 %v5916_v22  ;;  %v1898_v22 = vadd.f32 %v1897_v40, %v6865_v24  ;;  %v7105_v40 = vmax.f32 %v7055_v37, %v2342_v23  ;;  %v2474_v31 = vmax.f32 %v2098_v30, %v2106_v5 }
 0x358   :  { %v1708_v3 = vpop.f32.mrf.mxu0  ;;  %v7059_v17 = vpop.f32.mrf.mxu1  ;;  %4278 = vmatpush2.bf16.msra.mxu1 %v5919_v44  ;;  %4238 = vmatprep.subr.bf16.mxu0 %v5924_v55  ;;  %v5945_v44 = vld [vmem:[#allocation4 + $0x704] ss:$16 sps:$4 sm:$0xff]   ;;  %v7099_v55 = vmax.f32 %v7053_v21, %v2363_v11  ;;  %v7108_v21 = vmax.f32 %v7057_v53, %v2384_v14  ;;  %v5951_v11 = vld [vmem:[#allocation4 + $0x2ec] ss:$16 sps:$4 sm:$0xff]   ;;  %v2516_v53 = vmax.f32 %v2100_v29, %v2108_v7 }
 0x359   :  { %4279 = vmatprep.subr.bf16.mxu1 %v5927_v49  ;;  %v1707_v49 = vadd.f32 %v1706_v20, %v6868_v15  ;;  %v1902_v20 = vadd.f32 %v7059_v17, %v6865_v24 }
 0x35a   :  { %v7061_v28 = vpop.f32.mrf.mxu0  ;;  %v7063_v10 = vpop.f32.mrf.mxu1 }
 0x35b   :  { %4239 = vmatpush2.bf16.msra.mxu0 %v5922_v2  ;;  %v1900_v2 = vadd.f32 %v1899_v8, %v6871_v16  ;;  %v1711_v37 = vadd.f32 %v7061_v28, %v6868_v15  ;;  %v2115_v46 = vmax.f32 %v1707_v49, 0.0  ;;  %v1904_v17 = vadd.f32 %v7063_v10, %v6871_v16 }
 0x35c   :  { %v7071_v12 = vpop.f32.mrf.mxu0  ;;  %v7073_v57 = vpop.f32.mrf.mxu1  ;;  %4280 = vmatpush2.bf16.msra.mxu1 %v5925_v13  ;;  %4240 = vmatprep.subr.bf16.mxu0 %v5930_v59  ;;  %v2537_v28 = vmax.f32 %v2101_v41, %v2109_v34  ;;  %v2124_v14 = vmax.f32 %v1902_v20, 0.0 }
 0x35d   :  { %4281 = vmatprep.subr.bf16.mxu1 %v5933_v19  ;;  %v2099_v19 = vmax.f32 %v1697_v26, 0.0  ;;  %v2117_v26 = vmax.f32 %v1900_v2, 0.0  ;;  %v1715_v30 = vadd.f32 %v7071_v12, %v6862_v18  ;;  %v1908_v23 = vadd.f32 %v7073_v57, %v6865_v24 }
 0x35e   :  { %v7079_v58 = vpop.f32.mrf.mxu0  ;;  %v7081_v42 = vpop.f32.mrf.mxu1  ;;  %v2125_v7 = vmax.f32 %v1904_v17, 0.0 }
 0x35f   :  { %4241 = vmatpush2.bf16.msra.mxu0 %v5928_v9  ;;  %v1709_v9 = vadd.f32 %v1708_v3, %v6862_v18  ;;  %v2114_v3 = vmax.f32 %v1705_v45, 0.0  ;;  %v1717_v29 = vadd.f32 %v7079_v58, %v6868_v15  ;;  %v1910_v50 = vadd.f32 %v7081_v42, %v6871_v16 }
 0x360   :  { %v1718_v25 = vpop.f32.mrf.mxu0  ;;  %v7091_v43 = vpop.f32.mrf.mxu1  ;;  %4282 = vmatpush2.bf16.msra.mxu1 %v5931_v61  ;;  %4242 = vmatprep.subr.bf16.mxu0 %v5936_v1  ;;  %v5943_v1 = vld [vmem:[#allocation4 + $0x700] ss:$16 sps:$4 sm:$0xff]   ;;  %v2130_v42 = vmax.f32 %v1715_v30, 0.0  ;;  %v2132_v41 = vmax.f32 %v1908_v23, 0.0 }
 0x361   :  { %4283 = vmatprep.subr.bf16.mxu1 %v5939_v32  ;;  %v2116_v32 = vmax.f32 %v1898_v22, 0.0  ;;  %v2475_v5 = vmax.f32 %v2474_v31, %v2114_v3  ;;  %v2123_v22 = vmax.f32 %v1711_v37, 0.0  ;;  %v1719_v12 = vadd.f32 %v1718_v25, %v6862_v18 }
 0x362   :  { %v1720_v13 = vpop.f32.mrf.mxu0  ;;  %v1913_v59 = vpop.f32.mrf.mxu1  ;;  %v1912_v49 = vadd.f32 %v7091_v43, %v6865_v24  ;;  %v2133_v34 = vmax.f32 %v1910_v50, 0.0 }
 0x363   :  { %4243 = vmatpush2.bf16.msra.mxu0 %v5934_v63  ;;  %v2495_v63 = vmax.f32 %v2099_v19, %v2107_v56  ;;  %v2517_v45 = vmax.f32 %v2516_v53, %v2116_v32  ;;  %v1721_v56 = vadd.f32 %v1720_v13, %v6868_v15  ;;  %v1914_v20 = vadd.f32 %v1913_v59, %v6871_v16 }
 0x364   :  { %v1724_v8 = vpop.f32.mrf.mxu0  ;;  %v1917_v61 = vpop.f32.mrf.mxu1  ;;  %4284 = vmatpush2.bf16.msra.mxu1 %v5937_v33  ;;  %4244 = vmatprep.subr.bf16.mxu0 %v5942_v4  ;;  %v2122_v33 = vmax.f32 %v1709_v9, 0.0 }
 0x365   :  { %4285 = vmatprep.subr.bf16.mxu1 %v5945_v44  ;;  %v2496_v57 = vmax.f32 %v2495_v63, %v2115_v46  ;;  %v2538_v44 = vmax.f32 %v2537_v28, %v2117_v26  ;;  %v2518_v9 = vmax.f32 %v2517_v45, %v2124_v14  ;;  %v1725_v31 = vadd.f32 %v1724_v8, %v6862_v18 }
 0x366   :  { %v1726_v27 = vpop.f32.mrf.mxu0  ;;  %v1919_v38 = vpop.f32.mrf.mxu1  ;;  %v2476_v19 = vmax.f32 %v2475_v5, %v2122_v33  ;;  %v1918_v3 = vadd.f32 %v1917_v61, %v6865_v24  ;;  %v2139_v63 = vmax.f32 %v1721_v56, 0.0  ;;  %v2141_v23 = vmax.f32 %v1914_v20, 0.0 }
 0x367   :  { %4245 = vmatpush2.bf16.msra.mxu0 %v5940_v36  ;;  %v2131_v36 = vmax.f32 %v1717_v29, 0.0  ;;  %v1727_v43 = vadd.f32 %v1726_v27, %v6868_v15  ;;  %v2497_v32 = vmax.f32 %v2496_v57, %v2123_v22  ;;  %v2539_v37 = vmax.f32 %v2538_v44, %v2125_v7 }
 0x368   :  { %v1728_v10 = vpop.f32.mrf.mxu0  ;;  %v1921_v4 = vpop.f32.mrf.mxu1  ;;  %4286 = vmatpush2.bf16.msra.mxu1 %v5943_v1  ;;  %4296 = vmatprep.subr.bf16.mxu0 %v5948_v39  ;;  %v2138_v39 = vmax.f32 %v1719_v12, 0.0  ;;  %v1920_v53 = vadd.f32 %v1919_v38, %v6871_v16  ;;  %v2477_v26 = vmax.f32 %v2476_v19, %v2130_v42  ;;  %v2519_v17 = vmax.f32 %v2518_v9, %v2132_v41 }
 0x369   :  { %4337 = vmatprep.subr.bf16.mxu1 %v5951_v11  ;;  %v2140_v11 = vmax.f32 %v1912_v49, 0.0  ;;  %v1729_v59 = vadd.f32 %v1728_v10, %v6862_v18  ;;  %v2498_v33 = vmax.f32 %v2497_v32, %v2131_v36  ;;  %v2540_v30 = vmax.f32 %v2539_v37, %v2133_v34 }
 0x36a   :  { %v1730_v58 = vpop.f32.mrf.mxu0  ;;  %v1923_v2 = vpop.f32.mrf.mxu1  ;;  %v1922_v8 = vadd.f32 %v1921_v4, %v6865_v24  ;;  %v2478_v27 = vmax.f32 %v2477_v26, %v2138_v39  ;;  %v2146_v14 = vmax.f32 %v1725_v31, 0.0  ;;  %v2148_v29 = vmax.f32 %v1918_v3, 0.0 }
 0x36b   :  { %v2147_v50 = vmax.f32 %v1727_v43, 0.0  ;;  %v2520_v5 = vmax.f32 %v2519_v17, %v2140_v11  ;;  %v2149_v38 = vmax.f32 %v1920_v53, 0.0  ;;  %v1731_v45 = vadd.f32 %v1730_v58, %v6868_v15 }
 0x36c   :  { %v1734_v25 = vpop.f32.mrf.mxu0  ;;  %v1927_v1 = vpop.f32.mrf.mxu1  ;;  %v1924_v22 = vadd.f32 %v1923_v2, %v6871_v16  ;;  %v2499_v10 = vmax.f32 %v2498_v33, %v2139_v63  ;;  %v2154_v44 = vmax.f32 %v1729_v59, 0.0  ;;  %v2541_v49 = vmax.f32 %v2540_v30, %v2141_v23 }
 0x36d   :  { %v1735_v7 = vadd.f32 %v1734_v25, %v6862_v18  ;;  %v1928_v4 = vadd.f32 %v1927_v1, %v6865_v24  ;;  %v2156_v19 = vmax.f32 %v1922_v8, 0.0  ;;  %v2479_v36 = vmax.f32 %v2478_v27, %v2146_v14 }
 0x36e   :  { %v1736_v13 = vpop.f32.mrf.mxu0  ;;  %v1929_v46 = vpop.f32.mrf.mxu1  ;;  %v2521_v58 = vmax.f32 %v2520_v5, %v2148_v29  ;;  %v2500_v34 = vmax.f32 %v2499_v10, %v2147_v50  ;;  %v2542_v20 = vmax.f32 %v2541_v49, %v2149_v38  ;;  %v2155_v39 = vmax.f32 %v1731_v45, 0.0 }
 0x36f   :  { %v1737_v42 = vadd.f32 %v1736_v13, %v6868_v15  ;;  %v1930_v41 = vadd.f32 %v1929_v46, %v6871_v16  ;;  %v2157_v31 = vmax.f32 %v1924_v22, 0.0  ;;  %v2480_v43 = vmax.f32 %v2479_v36, %v2154_v44 }
 0x370   :  { %v1738_v61 = vpop.f32.mrf.mxu0  ;;  %v1931_v28 = vpop.f32.mrf.mxu1  ;;  %v2162_v32 = vmax.f32 %v1735_v7, 0.0  ;;  %v2164_v37 = vmax.f32 %v1928_v4, 0.0  ;;  %v2522_v53 = vmax.f32 %v2521_v58, %v2156_v19  ;;  %v2501_v8 = vmax.f32 %v2500_v34, %v2155_v39 }
 0x371   :  { %v1739_v2 = vadd.f32 %v1738_v61, %v6862_v18  ;;  %v1932_v25 = vadd.f32 %v1931_v28, %v6865_v24  ;;  %v2163_v13 = vmax.f32 %v1737_v42, 0.0  ;;  %v2165_v46 = vmax.f32 %v1930_v41, 0.0 }
 0x372   :  { %v1740_v12 = vpop.f32.mrf.mxu0  ;;  %v1933_v57 = vpop.f32.mrf.mxu1  ;;  %v2543_v61 = vmax.f32 %v2542_v20, %v2157_v31  ;;  %v2481_v50 = vmax.f32 %v2480_v43, %v2162_v32  ;;  %v2523_v5 = vmax.f32 %v2522_v53, %v2164_v37 }
 0x373   :  { %v1741_v11 = vadd.f32 %v1740_v12, %v6868_v15  ;;  %v1934_v26 = vadd.f32 %v1933_v57, %v6871_v16  ;;  %v2170_v59 = vmax.f32 %v1739_v2, 0.0  ;;  %v2172_v28 = vmax.f32 %v1932_v25, 0.0 }
 0x374   :  { %v1744_v56 = vpop.f32.mrf.mxu0  ;;  %v1937_v9 = vpop.f32.mrf.mxu1  ;;  %v2502_v22 = vmax.f32 %v2501_v8, %v2163_v13  ;;  %v2544_v12 = vmax.f32 %v2543_v61, %v2165_v46 }
 0x375   :  { %v1745_v33 = vadd.f32 %v1744_v56, %v6862_v18  ;;  %v1938_v30 = vadd.f32 %v1937_v9, %v6865_v24  ;;  %v2171_v38 = vmax.f32 %v1741_v11, 0.0  ;;  %v2173_v57 = vmax.f32 %v1934_v26, 0.0 }
 0x376   :  { %v1746_v3 = vpop.f32.mrf.mxu0  ;;  %v1939_v1 = vpop.f32.mrf.mxu1  ;;  %v2482_v4 = vmax.f32 %v2481_v50, %v2170_v59  ;;  %v2524_v41 = vmax.f32 %v2523_v5, %v2172_v28 }
 0x377   :  { %v1747_v23 = vadd.f32 %v1746_v3, %v6868_v15  ;;  %v1940_v27 = vadd.f32 %v1939_v1, %v6871_v16  ;;  %v2178_v49 = vmax.f32 %v1745_v33, 0.0  ;;  %v2180_v19 = vmax.f32 %v1938_v30, 0.0 }
 0x378   :  { %v1748_v17 = vpop.f32.mrf.mxu0  ;;  %v1941_v63 = vpop.f32.mrf.mxu1  ;;  %v2503_v2 = vmax.f32 %v2502_v22, %v2171_v38  ;;  %v2545_v25 = vmax.f32 %v2544_v12, %v2173_v57 }
 0x379   :  { %v1749_v45 = vadd.f32 %v1748_v17, %v6862_v18  ;;  %v1942_v10 = vadd.f32 %v1941_v63, %v6865_v24  ;;  %v2179_v42 = vmax.f32 %v1747_v23, 0.0  ;;  %v2181_v56 = vmax.f32 %v1940_v27, 0.0 }
 0x37a   :  { %v1750_v14 = vpop.f32.mrf.mxu0  ;;  %v1943_v29 = vpop.f32.mrf.mxu1  ;;  %v2483_v11 = vmax.f32 %v2482_v4, %v2178_v49  ;;  %v2525_v53 = vmax.f32 %v2524_v41, %v2180_v19 }
 0x37b   :  { %v1751_v9 = vadd.f32 %v1750_v14, %v6868_v15  ;;  %v1944_v36 = vadd.f32 %v1943_v29, %v6871_v16  ;;  %v2186_v20 = vmax.f32 %v1749_v45, 0.0  ;;  %v2188_v3 = vmax.f32 %v1942_v10, 0.0 }
 0x37c   :  { %v1754_v44 = vpop.f32.mrf.mxu0  ;;  %v1947_v7 = vpop.f32.mrf.mxu1  ;;  %v2504_v13 = vmax.f32 %v2503_v2, %v2179_v42  ;;  %v2546_v26 = vmax.f32 %v2545_v25, %v2181_v56 }
 0x37d   :  { %v1755_v39 = vadd.f32 %v1754_v44, %v6862_v18  ;;  %v1948_v31 = vadd.f32 %v1947_v7, %v6865_v24  ;;  %v2187_v17 = vmax.f32 %v1751_v9, 0.0  ;;  %v2189_v63 = vmax.f32 %v1944_v36, 0.0 }
 0x37e   :  { %v1756_v58 = vpop.f32.mrf.mxu0  ;;  %v1949_v34 = vpop.f32.mrf.mxu1  ;;  %v2484_v23 = vmax.f32 %v2483_v11, %v2186_v20  ;;  %v2526_v27 = vmax.f32 %v2525_v53, %v2188_v3 }
 0x37f   :  { %v1757_v1 = vadd.f32 %v1756_v58, %v6868_v15  ;;  %v1950_v43 = vadd.f32 %v1949_v34, %v6871_v16  ;;  %v2194_v8 = vmax.f32 %v1755_v39, 0.0  ;;  %v2196_v61 = vmax.f32 %v1948_v31, 0.0 }
 0x380   :  { %v1758_v32 = vpop.f32.mrf.mxu0  ;;  %v1951_v37 = vpop.f32.mrf.mxu1  ;;  %v2505_v10 = vmax.f32 %v2504_v13, %v2187_v17  ;;  %v2547_v44 = vmax.f32 %v2546_v26, %v2189_v63 }
 0x381   :  { %v1759_v46 = vadd.f32 %v1758_v32, %v6862_v18  ;;  %v1952_v59 = vadd.f32 %v1951_v37, %v6865_v24  ;;  %v2195_v14 = vmax.f32 %v1757_v1, 0.0  ;;  %v2197_v29 = vmax.f32 %v1950_v43, 0.0 }
 0x382   :  { %v1760_v33 = vpop.f32.mrf.mxu0  ;;  %v1953_v30 = vpop.f32.mrf.mxu1  ;;  %v2485_v42 = vmax.f32 %v2484_v23, %v2194_v8  ;;  %v2527_v41 = vmax.f32 %v2526_v27, %v2196_v61  ;;  %v2365_v27 = vrot.slane %v7099_v55, 2 }
 0x383   :  { %v1761_v28 = vadd.f32 %v1760_v33, %v6868_v15  ;;  %v1954_v50 = vadd.f32 %v1953_v30, %v6871_v16  ;;  %v2202_v45 = vmax.f32 %v1759_v46, 0.0  ;;  %v2204_v22 = vmax.f32 %v1952_v59, 0.0 }
 0x384   :  { %v1764_v5 = vpop.f32.mrf.mxu0  ;;  %v1957_v38 = vpop.f32.mrf.mxu1  ;;  %v2506_v36 = vmax.f32 %v2505_v10, %v2195_v14  ;;  %v2548_v58 = vmax.f32 %v2547_v44, %v2197_v29  ;;  %v2386_v29 = vrot.slane %v7108_v21, 2 }
 0x385   :  { %v1765_v12 = vadd.f32 %v1764_v5, %v6862_v18  ;;  %v1958_v57 = vadd.f32 %v1957_v38, %v6865_v24  ;;  %v2203_v7 = vmax.f32 %v1761_v28, 0.0  ;;  %v2205_v4 = vmax.f32 %v1954_v50, 0.0 }
 0x386   :  { %v1766_v49 = vpop.f32.mrf.mxu0  ;;  %v1959_v19 = vpop.f32.mrf.mxu1  ;;  %v2486_v31 = vmax.f32 %v2485_v42, %v2202_v45  ;;  %v2528_v25 = vmax.f32 %v2527_v41, %v2204_v22  ;;  %v2323_v28 = vrot.slane %v7094_v48, 2 }
 0x387   :  { %v2210_v56 = vmax.f32 %v1765_v12, 0.0  ;;  %v1767_v9 = vadd.f32 %v1766_v49, %v6868_v15  ;;  %v2212_v34 = vmax.f32 %v1958_v57, 0.0  ;;  %v1960_v2 = vadd.f32 %v1959_v19, %v6871_v16 }
 0x388   :  { %v1768_v20 = vpop.f32.mrf.mxu0  ;;  %v1961_v39 = vpop.f32.mrf.mxu1  ;;  %v2507_v43 = vmax.f32 %v2506_v36, %v2203_v7  ;;  %v2549_v32 = vmax.f32 %v2548_v58, %v2205_v4  ;;  %v2324_v12 = vmax.f32 %v7094_v48, %v2323_v28  ;;  %v2366_v57 = vmax.f32 %v7099_v55, %v2365_v27  ;;  %v5952_v28 = vld [vmem:[#allocation4 + $0xc8] ss:$16 sps:$4 sm:$0xff]  }
 0x389   :  { %v2211_v3 = vmax.f32 %v1767_v9, 0.0  ;;  %v1769_v1 = vadd.f32 %v1768_v20, %v6862_v18  ;;  %v2213_v37 = vmax.f32 %v1960_v2, 0.0  ;;  %v1962_v11 = vadd.f32 %v1961_v39, %v6865_v24  ;;  %v5955_v27 = vld [vmem:[#allocation4 + $0x2c8] ss:$16 sps:$4 sm:$0xff]  }
 0x38a   :  { %v1770_v53 = vpop.f32.mrf.mxu0  ;;  %v1963_v13 = vpop.f32.mrf.mxu1  ;;  %v2487_v46 = vmax.f32 %v2486_v31, %v2210_v56  ;;  %v2529_v59 = vmax.f32 %v2528_v25, %v2212_v34  ;;  %v2344_v24 = vrot.slane %v7105_v40, 2  ;;  %v2387_v7 = vmax.f32 %v7108_v21, %v2386_v29  ;;  %v5958_v29 = vld [vmem:[#allocation4 + $0xa8] ss:$16 sps:$4 sm:$0xff]  }
 0x38b   :  { %v2218_v26 = vmax.f32 %v1769_v1, 0.0  ;;  %v1771_v17 = vadd.f32 %v1770_v53, %v6868_v15  ;;  %v1964_v63 = vadd.f32 %v1963_v13, %v6871_v16  ;;  %v2508_v33 = vmax.f32 %v2507_v43, %v2211_v3 }
 0x38c   :  { %v2220_v30 = vmax.f32 %v1962_v11, 0.0  ;;  %v2550_v23 = vmax.f32 %v2549_v32, %v2213_v37  ;;  %v2345_v10 = vmax.f32 %v7105_v40, %v2344_v24  ;;  %v2325_v36 = vrot.slane %v2324_v12, 1  ;;  %v5960_v24 = vld [vmem:[#allocation4 + $0xac] ss:$16 sps:$4 sm:$0xff]  }
 0x38d   :  { %v2488_v8 = vmax.f32 %v2487_v46, %v2218_v26  ;;  %v2219_v61 = vmax.f32 %v1771_v17, 0.0  ;;  %v2221_v18 = vmax.f32 %v1964_v63, 0.0  ;;  %v2367_v58 = vrot.slane %v2366_v57, 1 }
 0x38e   :  { %v2530_v14 = vmax.f32 %v2529_v59, %v2220_v30  ;;  %v2346_v34 = vrot.slane %v2345_v10, 1  ;;  %v2388_v20 = vrot.slane %v2387_v7, 1  ;;  %v2326_v21 = vmax.f32 %v2324_v12, %v2325_v36  ;;  %v5949_v30 = vld [vmem:[#allocation4 + $0x2e8] ss:$16 sps:$4 sm:$0xff]   ;;  %v5978_v12 = vld [vmem:[#allocation4 + $0x4c] ss:$16 sps:$4 sm:$0xff]  }
 0x38f   :  { %v2489_v50 = vrot.slane %v2488_v8, 4  ;;  %v2509_v15 = vmax.f32 %v2508_v33, %v2219_v61  ;;  %v2551_v5 = vmax.f32 %v2550_v23, %v2221_v18  ;;  %v2368_v1 = vmax.f32 %v2366_v57, %v2367_v58  ;;  %v5946_v33 = vld [vmem:[#allocation4 + $0xe8] ss:$16 sps:$4 sm:$0xff]   ;;  %v5954_v61 = vld [vmem:[#allocation4 + $0xcc] ss:$16 sps:$4 sm:$0xff]  }
 0x390   :  { %v2531_v16 = vrot.slane %v2530_v14, 4  ;;  %v2347_v32 = vmax.f32 %v2345_v10, %v2346_v34  ;;  %v2389_v11 = vmax.f32 %v2387_v7, %v2388_v20  ;;  %v5957_v18 = vld [vmem:[#allocation4 + $0x2cc] ss:$16 sps:$4 sm:$0xff]   ;;  %v5976_v10 = vld [vmem:[#allocation4 + $0x48] ss:$16 sps:$4 sm:$0xff]  }
 0x391   :  { %v2490_v38 = vmax.f32 %v2488_v8, %v2489_v50  ;;  %v2510_v45 = vrot.slane %v2509_v15, 4  ;;  %v2552_v22 = vrot.slane %v2551_v5, 4  ;;  %v5961_v50 = vld [vmem:[#allocation4 + $0x2a8] ss:$16 sps:$4 sm:$0xff]   ;;  %v5981_v57 = vld [vmem:[#allocation4 + $0x24c] ss:$16 sps:$4 sm:$0xff]  }
 0x392   :  { %v2532_v44 = vmax.f32 %v2530_v14, %v2531_v16  ;;  %v5963_v14 = vld [vmem:[#allocation4 + $0x2ac] ss:$16 sps:$4 sm:$0xff]   ;;  %v5964_v16 = vld [vmem:[#allocation4 + $0x88] ss:$16 sps:$4 sm:$0xff]  }
 0x393   :  { %v2491_v4 = vrot.slane %v2490_v38, 2  ;;  %v2511_v49 = vmax.f32 %v2509_v15, %v2510_v45  ;;  %v2553_v19 = vmax.f32 %v2551_v5, %v2552_v22  ;;  %v5966_v15 = vld [vmem:[#allocation4 + $0x8c] ss:$16 sps:$4 sm:$0xff]   ;;  %v5970_v45 = vld [vmem:[#allocation4 + $0x68] ss:$16 sps:$4 sm:$0xff]  }
 0x394   :  { %v2533_v42 = vrot.slane %v2532_v44, 2  ;;  %v5969_v5 = vld [vmem:[#allocation4 + $0x28c] ss:$16 sps:$4 sm:$0xff]   ;;  %v5973_v22 = vld [vmem:[#allocation4 + $0x268] ss:$16 sps:$4 sm:$0xff]  }
 0x395   :  { %v2492_v41 = vmax.f32 %v2490_v38, %v2491_v4  ;;  %v2512_v56 = vrot.slane %v2511_v49, 2  ;;  %v2554_v9 = vrot.slane %v2553_v19, 2  ;;  %v5967_v38 = vld [vmem:[#allocation4 + $0x288] ss:$16 sps:$4 sm:$0xff]   ;;  %v5984_v7 = vld [vmem:[#allocation4 + $0x2c] ss:$16 sps:$4 sm:$0xff]  }
 0x396   :  { %v2534_v2 = vmax.f32 %v2532_v44, %v2533_v42  ;;  %v5979_v44 = vld [vmem:[#allocation4 + $0x248] ss:$16 sps:$4 sm:$0xff]   ;;  %v5987_v4 = vld [vmem:[#allocation4 + $0x22c] ss:$16 sps:$4 sm:$0xff]  }
 0x397   :  { %v2493_v48 = vrot.slane %v2492_v41, 1  ;;  %v2513_v39 = vmax.f32 %v2511_v49, %v2512_v56  ;;  %v2555_v55 = vmax.f32 %v2553_v19, %v2554_v9  ;;  %v5982_v49 = vld [vmem:[#allocation4 + $0x28] ss:$16 sps:$4 sm:$0xff]   ;;  %v5990_v42 = vld [vmem:[#allocation4 + $0xc] ss:$16 sps:$4 sm:$0xff]  }
 0x398   :  { %v2535_v31 = vrot.slane %v2534_v2, 1  ;;  %v5985_v19 = vld [vmem:[#allocation4 + $0x228] ss:$16 sps:$4 sm:$0xff]   ;;  %v5996_v36 = vld [vmem:[#allocation4 + $0x1ec] ss:$16 sps:$4 sm:$0xff]  }
 0x399   :  { %v2494_v40 = vmax.f32 %v2492_v41, %v2493_v48  ;;  %v2514_v25 = vrot.slane %v2513_v39, 1  ;;  %v2556_v3 = vrot.slane %v2555_v55, 1  ;;  %v5993_v41 = vld [vmem:[#allocation4 + $0x20c] ss:$16 sps:$4 sm:$0xff]   ;;  %v5988_v56 = vld [vmem:[#allocation4 + $0x8] ss:$16 sps:$4 sm:$0xff]  }
 0x39a   :  { %v2536_v43 = vmax.f32 %v2534_v2, %v2535_v31  ;;  %v5991_v9 = vld [vmem:[#allocation4 + $0x208] ss:$16 sps:$4 sm:$0xff]   ;;  %v5999_v58 = vld [vmem:[#allocation4 + $0x3ec] ss:$16 sps:$4 sm:$0xff]  }
 0x39b   :  { %v2515_v37 = vmax.f32 %v2513_v39, %v2514_v25  ;;  %v2557_v53 = vmax.f32 %v2555_v55, %v2556_v3  ;;  %v2562_v13 = vsel %vm255_vm0, %v2326_v21, %v2494_v40  ;;  %v5994_v34 = vld [vmem:[#allocation4 + $0x1e8] ss:$16 sps:$4 sm:$0xff]   ;;  %v6002_v20 = vld [vmem:[#allocation4 + $0x1cc] ss:$16 sps:$4 sm:$0xff]  }
 0x39c   :  { %v2564_v46 = vsel %vm255_vm0, %v2368_v1, %v2536_v43  ;;  %v7185_v23 = vpack.c.bf16 %v2562_v13, %v2562_v13  ;;  %v5997_v2 = vld [vmem:[#allocation4 + $0x3e8] ss:$16 sps:$4 sm:$0xff]   ;;  %v6005_v48 = vld [vmem:[#allocation4 + $0x3cc] ss:$16 sps:$4 sm:$0xff]  }
 0x39d   :  { %v2563_v26 = vsel %vm255_vm0, %v2347_v32, %v2515_v37  ;;  %v2565_v17 = vsel %vm255_vm0, %v2389_v11, %v2557_v53  ;;  %v7187_v8 = vpack.c.bf16 %v2564_v46, %v2564_v46  ;;  %v6000_v39 = vld [vmem:[#allocation4 + $0x1c8] ss:$16 sps:$4 sm:$0xff]   ;;  %v6008_v31 = vld [vmem:[#allocation4 + $0x1ac] ss:$16 sps:$4 sm:$0xff]  }
 0x39e   :  { %v7181_v63 = vpack.c.bf16 %v2563_v26, %v2563_v26  ;;  %v7183_v59 = vpack.c.bf16 %v2565_v17, %v2565_v17  ;;  %v6003_v55 = vld [vmem:[#allocation4 + $0x3c8] ss:$16 sps:$4 sm:$0xff]   ;;  %v6011_v40 = vld [vmem:[#allocation4 + $0x3ac] ss:$16 sps:$4 sm:$0xff]  }
 0x39f   :  { %v6006_v25 = vld [vmem:[#allocation4 + $0x1a8] ss:$16 sps:$4 sm:$0xff]   ;;  %v6014_v21 = vld [vmem:[#allocation4 + $0x18c] ss:$16 sps:$4 sm:$0xff]  }
 0x3a0   :  { %4246 = vmatprep.mubr.bf16.mxu0 %v7181_v63  ;;  %4287 = vmatprep.mubr.bf16.mxu1 %v7183_v59  ;;  %v6009_v3 = vld [vmem:[#allocation4 + $0x3a8] ss:$16 sps:$4 sm:$0xff]   ;;  %v6017_v1 = vld [vmem:[#allocation4 + $0x38c] ss:$16 sps:$4 sm:$0xff]  }
 0x3a1   :  { %4247 = vmatmul.mubr.bf16.vlgmr.msra.gmra.mxu0 %v7185_v23  ;;  %4288 = vmatmul.mubr.bf16.vlgmr.msra.gmra.mxu1 %v7187_v8  ;;  %v6012_v43 = vld [vmem:[#allocation4 + $0x188] ss:$16 sps:$4 sm:$0xff]   ;;  %v6020_v37 = vld [vmem:[#allocation4 + $0x16c] ss:$16 sps:$4 sm:$0xff]  }
 0x3a2   :  { %4297 = vmatpush1.bf16.msra.mxu0 %v5946_v33  ;;  %4338 = vmatpush1.bf16.msra.mxu1 %v5949_v30  ;;  %v6015_v32 = vld [vmem:[#allocation4 + $0x388] ss:$16 sps:$4 sm:$0xff]   ;;  %v6023_v11 = vld [vmem:[#allocation4 + $0x36c] ss:$16 sps:$4 sm:$0xff]  }
 0x3a3   :  { %4328 = vmatprep.mubr.bf16.mxu0 %v7005_v6  ;;  %4369 = vmatprep.mubr.bf16.mxu1 %v7007_v0  ;;  %v5972_v6 = vld [vmem:[#allocation4 + $0x6c] ss:$16 sps:$4 sm:$0xff]   ;;  %v6018_v53 = vld [vmem:[#allocation4 + $0x168] ss:$16 sps:$4 sm:$0xff]  }
 0x3a4   :  { %4298 = vmatprep.subr.bf16.mxu0 %v5954_v61  ;;  %4339 = vmatprep.subr.bf16.mxu1 %v5957_v18  ;;  %v5975_v0 = vld [vmem:[#allocation4 + $0x26c] ss:$16 sps:$4 sm:$0xff]   ;;  %v6021_v13 = vld [vmem:[#allocation4 + $0x368] ss:$16 sps:$4 sm:$0xff]  }
 0x3a5   :  { %v6026_v46 = vld [vmem:[#allocation4 + $0x14c] ss:$16 sps:$4 sm:$0xff]   ;;  %v6024_v17 = vld [vmem:[#allocation4 + $0x148] ss:$16 sps:$4 sm:$0xff]  }
 0x3a6   :  { %4299 = vmatpush1.bf16.msra.mxu0 %v5952_v28  ;;  %4340 = vmatpush1.bf16.msra.mxu1 %v5955_v27  ;;  %v6029_v26 = vld [vmem:[#allocation4 + $0x34c] ss:$16 sps:$4 sm:$0xff]   ;;  %v6027_v33 = vld [vmem:[#allocation4 + $0x348] ss:$16 sps:$4 sm:$0xff]  }
 0x3a7   :  { %4300 = vmatprep.subr.bf16.mxu0 %v5960_v24  ;;  %4341 = vmatprep.subr.bf16.mxu1 %v5963_v14  ;;  %v6032_v30 = vld [vmem:[#allocation4 + $0x12c] ss:$16 sps:$4 sm:$0xff]   ;;  %v6030_v18 = vld [vmem:[#allocation4 + $0x128] ss:$16 sps:$4 sm:$0xff]  }
 0x3a8   :  { %v6035_v61 = vld [vmem:[#allocation4 + $0x32c] ss:$16 sps:$4 sm:$0xff]   ;;  %v6033_v28 = vld [vmem:[#allocation4 + $0x328] ss:$16 sps:$4 sm:$0xff]  }
 0x3a9   :  { %v6038_v27 = vld [vmem:[#allocation4 + $0x10c] ss:$16 sps:$4 sm:$0xff]   ;;  %v6036_v14 = vld [vmem:[#allocation4 + $0x108] ss:$16 sps:$4 sm:$0xff]  }
 0x3aa   :  { %4301 = vmatpush1.bf16.msra.mxu0 %v5958_v29  ;;  %4342 = vmatpush1.bf16.msra.mxu1 %v5961_v50  ;;  %v6041_v24 = vld [vmem:[#allocation4 + $0x30c] ss:$16 sps:$4 sm:$0xff]   ;;  %v6039_v29 = vld [vmem:[#allocation4 + $0x308] ss:$16 sps:$4 sm:$0xff]  }
 0x3ab   :  { %4302 = vmatprep.subr.bf16.mxu0 %v5966_v15  ;;  %4343 = vmatprep.subr.bf16.mxu1 %v5969_v5  ;;  %v6044_v50 = vld [vmem:[#allocation4 + $0x4ec] ss:$16 sps:$4 sm:$0xff]   ;;  %v6042_v5 = vld [vmem:[#allocation4 + $0x4e8] ss:$16 sps:$4 sm:$0xff]  }
 0x3ac   :  { %v6047_v15 = vld [vmem:[#allocation4 + $0x6ec] ss:$16 sps:$4 sm:$0xff]  }
 0x3ae   :  { %4303 = vmatpush1.bf16.msra.mxu0 %v5964_v16  ;;  %4344 = vmatpush1.bf16.msra.mxu1 %v5967_v38  ;;  %v6045_v16 = vld [vmem:[#allocation4 + $0x6e8] ss:$16 sps:$4 sm:$0xff]   ;;  %v6050_v38 = vld [vmem:[#allocation4 + $0x4cc] ss:$16 sps:$4 sm:$0xff]  }
 0x3af   :  { %4304 = vmatprep.subr.bf16.mxu0 %v5972_v6  ;;  %4345 = vmatprep.subr.bf16.mxu1 %v5975_v0  ;;  %v6053_v6 = vld [vmem:[#allocation4 + $0x6cc] ss:$16 sps:$4 sm:$0xff]   ;;  %v6048_v0 = vld [vmem:[#allocation4 + $0x4c8] ss:$16 sps:$4 sm:$0xff]  }
 0x3b2   :  { %4305 = vmatpush1.bf16.msra.mxu0 %v5970_v45  ;;  %4346 = vmatpush1.bf16.msra.mxu1 %v5973_v22  ;;  %v6051_v45 = vld [vmem:[#allocation4 + $0x6c8] ss:$16 sps:$4 sm:$0xff]   ;;  %v6056_v22 = vld [vmem:[#allocation4 + $0x4ac] ss:$16 sps:$4 sm:$0xff]  }
 0x3b3   :  { %4306 = vmatprep.subr.bf16.mxu0 %v5978_v12  ;;  %4347 = vmatprep.subr.bf16.mxu1 %v5981_v57  ;;  %v7202_v12 = vld [vmem:[%s7289_s8] sm:$0xf]  ;;  %v6059_v57 = vld [vmem:[#allocation4 + $0x6ac] ss:$16 sps:$4 sm:$0xff]  }
 0x3b6   :  { %4307 = vmatpush1.bf16.msra.mxu0 %v5976_v10  ;;  %4348 = vmatpush1.bf16.msra.mxu1 %v5979_v44  ;;  %v6062_v10 = vld [vmem:[#allocation4 + $0x48c] ss:$16 sps:$4 sm:$0xff]   ;;  %v2839_v44 = vrot.slane %v7202_v12, %v6736_v60 }
 0x3b7   :  { %4308 = vmatprep.subr.bf16.mxu0 %v5984_v7  ;;  %4349 = vmatprep.subr.bf16.mxu1 %v5987_v4 }
 0x3ba   :  { %4309 = vmatpush1.bf16.msra.mxu0 %v5982_v49  ;;  %4350 = vmatpush1.bf16.msra.mxu1 %v5985_v19  ;;  %v6060_v49 = vld [vmem:[#allocation4 + $0x488] ss:$16 sps:$4 sm:$0xff]  }
 0x3bb   :  { %4310 = vmatprep.subr.bf16.mxu0 %v5990_v42  ;;  %4351 = vmatprep.subr.bf16.mxu1 %v5993_v41  ;;  %v6063_v42 = vld [vmem:[#allocation4 + $0x688] ss:$16 sps:$4 sm:$0xff]   ;;  %v6068_v41 = vld [vmem:[#allocation4 + $0x46c] ss:$16 sps:$4 sm:$0xff]  }
 0x3be   :  { %4311 = vmatpush1.bf16.msra.mxu0 %v5988_v56  ;;  %4352 = vmatpush1.bf16.msra.mxu1 %v5991_v9 }
 0x3bf   :  { %4312 = vmatprep.subr.bf16.mxu0 %v5996_v36  ;;  %4353 = vmatprep.subr.bf16.mxu1 %v5999_v58  ;;  %v6071_v36 = vld [vmem:[#allocation4 + $0x66c] ss:$16 sps:$4 sm:$0xff]  }
 0x3c2   :  { %4313 = vmatpush2.bf16.msra.mxu0 %v5994_v34  ;;  %4354 = vmatpush2.bf16.msra.mxu1 %v5997_v2 }
 0x3c3   :  { %4314 = vmatprep.subr.bf16.mxu0 %v6002_v20  ;;  %4355 = vmatprep.subr.bf16.mxu1 %v6005_v48  ;;  %v6066_v48 = vld [vmem:[#allocation4 + $0x468] ss:$16 sps:$4 sm:$0xff]  }
 0x3c6   :  { %4315 = vmatpush2.bf16.msra.mxu0 %v6000_v39  ;;  %4356 = vmatpush2.bf16.msra.mxu1 %v6003_v55  ;;  %v6069_v55 = vld [vmem:[#allocation4 + $0x668] ss:$16 sps:$4 sm:$0xff]  }
 0x3c7   :  { %4316 = vmatprep.subr.bf16.mxu0 %v6008_v31  ;;  %4357 = vmatprep.subr.bf16.mxu1 %v6011_v40  ;;  %v6074_v31 = vld [vmem:[#allocation4 + $0x44c] ss:$16 sps:$4 sm:$0xff]  }
 0x3ca   :  { %4317 = vmatpush2.bf16.msra.mxu0 %v6006_v25  ;;  %4358 = vmatpush2.bf16.msra.mxu1 %v6009_v3  ;;  %v6077_v3 = vld [vmem:[#allocation4 + $0x64c] ss:$16 sps:$4 sm:$0xff]  }
 0x3cb   :  { %4318 = vmatprep.subr.bf16.mxu0 %v6014_v21  ;;  %4359 = vmatprep.subr.bf16.mxu1 %v6017_v1  ;;  %v6072_v21 = vld [vmem:[#allocation4 + $0x448] ss:$16 sps:$4 sm:$0xff]  }
 0x3cc   :  { %v6075_v1 = vld [vmem:[#allocation4 + $0x648] ss:$16 sps:$4 sm:$0xff]  }
 0x3ce   :  { %4319 = vmatpush2.bf16.msra.mxu0 %v6012_v43  ;;  %4360 = vmatpush2.bf16.msra.mxu1 %v6015_v32  ;;  %v6080_v43 = vld [vmem:[#allocation4 + $0x42c] ss:$16 sps:$4 sm:$0xff]  }
 0x3cf   :  { %4320 = vmatprep.subr.bf16.mxu0 %v6020_v37  ;;  %4361 = vmatprep.subr.bf16.mxu1 %v6023_v11  ;;  %v6083_v32 = vld [vmem:[#allocation4 + $0x62c] ss:$16 sps:$4 sm:$0xff]   ;;  %v6078_v37 = vld [vmem:[#allocation4 + $0x428] ss:$16 sps:$4 sm:$0xff]  }
 0x3d0   :  { %v6081_v11 = vld [vmem:[#allocation4 + $0x628] ss:$16 sps:$4 sm:$0xff]  }
 0x3d2   :  { %4321 = vmatpush2.bf16.msra.mxu0 %v6018_v53  ;;  %4362 = vmatpush2.bf16.msra.mxu1 %v6021_v13  ;;  %v6086_v53 = vld [vmem:[#allocation4 + $0x40c] ss:$16 sps:$4 sm:$0xff]  }
 0x3d3   :  { %4322 = vmatprep.subr.bf16.mxu0 %v6026_v46  ;;  %4363 = vmatprep.subr.bf16.mxu1 %v6029_v26  ;;  %v6089_v13 = vld [vmem:[#allocation4 + $0x60c] ss:$16 sps:$4 sm:$0xff]   ;;  %v6084_v46 = vld [vmem:[#allocation4 + $0x408] ss:$16 sps:$4 sm:$0xff]  }
 0x3d4   :  { %v6087_v26 = vld [vmem:[#allocation4 + $0x608] ss:$16 sps:$4 sm:$0xff]  }
 0x3d6   :  { %4323 = vmatpush2.bf16.msra.mxu0 %v6024_v17  ;;  %4364 = vmatpush2.bf16.msra.mxu1 %v6027_v33  ;;  %v6092_v17 = vld [vmem:[#allocation4 + $0x5ec] ss:$16 sps:$4 sm:$0xff]  }
 0x3d7   :  { %4324 = vmatprep.subr.bf16.mxu0 %v6032_v30  ;;  %4365 = vmatprep.subr.bf16.mxu1 %v6035_v61  ;;  %v6095_v33 = vld [vmem:[#allocation4 + $0x7ec] ss:$16 sps:$4 sm:$0xff]   ;;  %v6090_v30 = vld [vmem:[#allocation4 + $0x5e8] ss:$16 sps:$4 sm:$0xff]  }
 0x3d8   :  { %v6093_v61 = vld [vmem:[#allocation4 + $0x7e8] ss:$16 sps:$4 sm:$0xff]  }
 0x3da   :  { %4325 = vmatpush2.bf16.msra.mxu0 %v6030_v18  ;;  %4366 = vmatpush2.bf16.msra.mxu1 %v6033_v28  ;;  %v6098_v18 = vld [vmem:[#allocation4 + $0x5cc] ss:$16 sps:$4 sm:$0xff]  }
 0x3db   :  { %4326 = vmatprep.subr.bf16.mxu0 %v6038_v27  ;;  %4367 = vmatprep.subr.bf16.mxu1 %v6041_v24  ;;  %v6101_v28 = vld [vmem:[#allocation4 + $0x7cc] ss:$16 sps:$4 sm:$0xff]   ;;  %v6096_v27 = vld [vmem:[#allocation4 + $0x5c8] ss:$16 sps:$4 sm:$0xff]  }
 0x3dc   :  { %v6099_v24 = vld [vmem:[#allocation4 + $0x7c8] ss:$16 sps:$4 sm:$0xff]  }
 0x3de   :  { %4327 = vmatpush2.bf16.msra.mxu0 %v6036_v14  ;;  %4368 = vmatpush2.bf16.msra.mxu1 %v6039_v29  ;;  %v6104_v14 = vld [vmem:[#allocation4 + $0x5ac] ss:$16 sps:$4 sm:$0xff]  }
 0x3df   :  { %4378 = vmatprep.subr.bf16.mxu0 %v6044_v50  ;;  %4419 = vmatprep.subr.bf16.mxu1 %v6047_v15  ;;  %v6107_v29 = vld [vmem:[#allocation4 + $0x7ac] ss:$16 sps:$4 sm:$0xff]   ;;  %v6102_v50 = vld [vmem:[#allocation4 + $0x5a8] ss:$16 sps:$4 sm:$0xff]  }
 0x3e0   :  { %v6105_v15 = vld [vmem:[#allocation4 + $0x7a8] ss:$16 sps:$4 sm:$0xff]  }
 0x3e1   :  { %4329 = vmatmul.mubr.bf16.vlgmr.msra.gmra.mxu0 %v6983_v35  ;;  %4370 = vmatmul.mubr.bf16.vlgmr.msra.gmra.mxu1 %v6985_v54  ;;  %v6054_v35 = vld [vmem:[#allocation4 + $0x4a8] ss:$16 sps:$4 sm:$0xff]   ;;  %v2835_v54 = vrot.slane %v7202_v12, %v6727_v51 }
 0x3e2   :  { %4379 = vmatpush1.bf16.msra.mxu0 %v6042_v5  ;;  %4410 = vmatprep.mubr.bf16.mxu0 %v7181_v63  ;;  %v6057_v63 = vld [vmem:[#allocation4 + $0x6a8] ss:$16 sps:$4 sm:$0xff]   ;;  %v6110_v5 = vld [vmem:[#allocation4 + $0x58c] ss:$16 sps:$4 sm:$0xff]  }
 0x3e3   :  { %4420 = vmatpush1.bf16.msra.mxu1 %v6045_v16  ;;  %4451 = vmatprep.mubr.bf16.mxu1 %v7183_v59  ;;  %v6065_v59 = vld [vmem:[#allocation4 + $0x68c] ss:$16 sps:$4 sm:$0xff]  }
 0x3e4   :  { %4380 = vmatprep.subr.bf16.mxu0 %v6050_v38  ;;  %4421 = vmatprep.subr.bf16.mxu1 %v6053_v6  ;;  %v6113_v16 = vld [vmem:[#allocation4 + $0x78c] ss:$16 sps:$4 sm:$0xff]   ;;  %v6108_v38 = vld [vmem:[#allocation4 + $0x588] ss:$16 sps:$4 sm:$0xff]  }
 0x3e5   :  { %v6111_v6 = vld [vmem:[#allocation4 + $0x788] ss:$16 sps:$4 sm:$0xff]  }
 0x3e6   :  { %4381 = vmatpush1.bf16.msra.mxu0 %v6048_v0  ;;  %v6116_v0 = vld [vmem:[#allocation4 + $0x56c] ss:$16 sps:$4 sm:$0xff]  }
 0x3e7   :  { %4422 = vmatpush1.bf16.msra.mxu1 %v6051_v45  ;;  %4382 = vmatprep.subr.bf16.mxu0 %v6056_v22  ;;  %v6119_v45 = vld [vmem:[#allocation4 + $0x76c] ss:$16 sps:$4 sm:$0xff]   ;;  %v6114_v22 = vld [vmem:[#allocation4 + $0x568] ss:$16 sps:$4 sm:$0xff]  }
 0x3e8   :  { %4423 = vmatprep.subr.bf16.mxu1 %v6059_v57  ;;  %v6117_v57 = vld [vmem:[#allocation4 + $0x768] ss:$16 sps:$4 sm:$0xff]  }
 0x3ea   :  { %v4166_v7 = vpop.f32.mrf.mxu0  ;;  %v4207_v4 = vpop.f32.mrf.mxu1  ;;  %4383 = vmatpush1.bf16.msra.mxu0 %v6054_v35  ;;  %v6122_v35 = vld [vmem:[#allocation4 + $0x54c] ss:$16 sps:$4 sm:$0xff]  }
 0x3eb   :  { %v4167_v19 = vadd.f32 %v4166_v7, %v2835_v54  ;;  %4424 = vmatpush1.bf16.msra.mxu1 %v6057_v63  ;;  %4384 = vmatprep.subr.bf16.mxu0 %v6062_v10  ;;  %v6125_v54 = vld [vmem:[#allocation4 + $0x74c] ss:$16 sps:$4 sm:$0xff]   ;;  %v6120_v63 = vld [vmem:[#allocation4 + $0x548] ss:$16 sps:$4 sm:$0xff]  }
 0x3ec   :  { %v4168_v56 = vpop.f32.mrf.mxu0  ;;  %v4209_v9 = vpop.f32.mrf.mxu1  ;;  %4425 = vmatprep.subr.bf16.mxu1 %v6065_v59  ;;  %v6123_v10 = vld [vmem:[#allocation4 + $0x748] ss:$16 sps:$4 sm:$0xff]   ;;  %v6128_v59 = vld [vmem:[#allocation4 + $0x52c] ss:$16 sps:$4 sm:$0xff]  }
 0x3ed   :  { %v7208_v58 = vadd.f32 %v4207_v4, %v4167_v19  ;;  %v4169_v34 = vadd.f32 %v4168_v56, %v2839_v44  ;;  %v6131_v44 = vld [vmem:[#allocation4 + $0x72c] ss:$16 sps:$4 sm:$0xff]   ;;  %v6126_v7 = vld [vmem:[#allocation4 + $0x528] ss:$16 sps:$4 sm:$0xff]  }
 0x3ee   :  { %v4170_v2 = vpop.f32.mrf.mxu0  ;;  %v4211_v20 = vpop.f32.mrf.mxu1  ;;  %4385 = vmatpush1.bf16.msra.mxu0 %v6060_v49  ;;  %v6129_v4 = vld [vmem:[#allocation4 + $0x728] ss:$16 sps:$4 sm:$0xff]   ;;  %v6134_v49 = vld [vmem:[#allocation4 + $0x50c] ss:$16 sps:$4 sm:$0xff]  }
 0x3ef   :  { %v7210_v39 = vadd.f32 %v4209_v9, %v4169_v34  ;;  %4426 = vmatpush1.bf16.msra.mxu1 %v6063_v42  ;;  %4386 = vmatprep.subr.bf16.mxu0 %v6068_v41  ;;  %v6137_v19 = vld [vmem:[#allocation4 + $0x70c] ss:$16 sps:$4 sm:$0xff]   ;;  %v6132_v42 = vld [vmem:[#allocation4 + $0x508] ss:$16 sps:$4 sm:$0xff]  }
 0x3f0   :  { %v4171_v40 = vpop.f32.mrf.mxu0  ;;  %v4212_v25 = vpop.f32.mrf.mxu1  ;;  %4427 = vmatprep.subr.bf16.mxu1 %v6071_v36  ;;  %v6135_v41 = vld [vmem:[#allocation4 + $0x708] ss:$16 sps:$4 sm:$0xff]   ;;  %v6140_v56 = vld [vmem:[#allocation6 + $0x74] ss:$8 sps:$4 sm:$0xff]   ;;  %v6143_v36 = vld [vmem:[#allocation6 + $0x64] ss:$8 sps:$4 sm:$0xff]  }
 0x3f1   :  { %v6138_v9 = vld [vmem:[#allocation6 + $0x70] ss:$8 sps:$4 sm:$0xff]   ;;  %v6141_v34 = vld [vmem:[#allocation6 + $0x60] ss:$8 sps:$4 sm:$0xff]   ;;  %v6146_v2 = vld [vmem:[#allocation6 + $0x54] ss:$8 sps:$4 sm:$0xff]  }
 0x3f2   :  { %4387 = vmatpush1.bf16.msra.mxu0 %v6066_v48  ;;  %v6144_v20 = vld [vmem:[#allocation6 + $0x50] ss:$8 sps:$4 sm:$0xff]   ;;  %v6149_v48 = vld [vmem:[#allocation6 + $0x44] ss:$8 sps:$4 sm:$0xff]   ;;  %v6147_v25 = vld [vmem:[#allocation6 + $0x40] ss:$8 sps:$4 sm:$0xff]  }
 0x3f3   :  { %4428 = vmatpush1.bf16.msra.mxu1 %v6069_v55  ;;  %4388 = vmatprep.subr.bf16.mxu0 %v6074_v31  ;;  %v6186_v55 = vld [vmem:[#allocation6 + $0x170] ss:$8 sps:$4 sm:$0xff]   ;;  %v6188_v31 = vld [vmem:[#allocation6 + $0x174] ss:$8 sps:$4 sm:$0xff]   ;;  %v6191_v40 = vld [vmem:[#allocation6 + $0x164] ss:$8 sps:$4 sm:$0xff]  }
 0x3f4   :  { %4429 = vmatprep.subr.bf16.mxu1 %v6077_v3  ;;  %v6189_v3 = vld [vmem:[#allocation6 + $0x160] ss:$8 sps:$4 sm:$0xff]  }
 0x3f6   :  { %4389 = vmatpush1.bf16.msra.mxu0 %v6072_v21  ;;  %v6150_v21 = vld [vmem:[#allocation6 + $0x30] ss:$8 sps:$4 sm:$0xff]  }
 0x3f7   :  { %4430 = vmatpush1.bf16.msra.mxu1 %v6075_v1  ;;  %4390 = vmatprep.subr.bf16.mxu0 %v6080_v43  ;;  %v6192_v1 = vld [vmem:[#allocation6 + $0x150] ss:$8 sps:$4 sm:$0xff]   ;;  %v6155_v43 = vld [vmem:[#allocation6 + $0x24] ss:$8 sps:$4 sm:$0xff]  }
 0x3f8   :  { %4431 = vmatprep.subr.bf16.mxu1 %v6083_v32  ;;  %v6197_v32 = vld [vmem:[#allocation6 + $0x144] ss:$8 sps:$4 sm:$0xff]  }
 0x3fa   :  { %4391 = vmatpush1.bf16.msra.mxu0 %v6078_v37  ;;  %v6153_v37 = vld [vmem:[#allocation6 + $0x20] ss:$8 sps:$4 sm:$0xff]  }
 0x3fb   :  { %4432 = vmatpush1.bf16.msra.mxu1 %v6081_v11  ;;  %4392 = vmatprep.subr.bf16.mxu0 %v6086_v53  ;;  %v6195_v11 = vld [vmem:[#allocation6 + $0x140] ss:$8 sps:$4 sm:$0xff]   ;;  %v6158_v53 = vld [vmem:[#allocation6 + $0x14] ss:$8 sps:$4 sm:$0xff]  }
 0x3fc   :  { %4433 = vmatprep.subr.bf16.mxu1 %v6089_v13  ;;  %v6200_v13 = vld [vmem:[#allocation6 + $0x134] ss:$8 sps:$4 sm:$0xff]  }
 0x3fe   :  { %4393 = vmatpush1.bf16.msra.mxu0 %v6084_v46  ;;  %v6156_v46 = vld [vmem:[#allocation6 + $0x10] ss:$8 sps:$4 sm:$0xff]  }
 0x3ff   :  { %4434 = vmatpush1.bf16.msra.mxu1 %v6087_v26  ;;  %4394 = vmatprep.subr.bf16.mxu0 %v6092_v17  ;;  %v6198_v26 = vld [vmem:[#allocation6 + $0x130] ss:$8 sps:$4 sm:$0xff]   ;;  %v6161_v17 = vld [vmem:[#allocation6 + $0x4] ss:$8 sps:$4 sm:$0xff]  }
 0x400   :  { %4435 = vmatprep.subr.bf16.mxu1 %v6095_v33  ;;  %v6203_v33 = vld [vmem:[#allocation6 + $0x124] ss:$8 sps:$4 sm:$0xff]  }
 0x402   :  { %4395 = vmatpush2.bf16.msra.mxu0 %v6090_v30  ;;  %v6159_v30 = vld [vmem:[#allocation6] ss:$8 sps:$4 sm:$0xff]  }
 0x403   :  { %4436 = vmatpush2.bf16.msra.mxu1 %v6093_v61  ;;  %4396 = vmatprep.subr.bf16.mxu0 %v6098_v18  ;;  %v6201_v61 = vld [vmem:[#allocation6 + $0x120] ss:$8 sps:$4 sm:$0xff]   ;;  %v6164_v18 = vld [vmem:[#allocation6 + $0xf4] ss:$8 sps:$4 sm:$0xff]  }
 0x404   :  { %4437 = vmatprep.subr.bf16.mxu1 %v6101_v28  ;;  %v6206_v28 = vld [vmem:[#allocation6 + $0x114] ss:$8 sps:$4 sm:$0xff]  }
 0x406   :  { %4397 = vmatpush2.bf16.msra.mxu0 %v6096_v27  ;;  %v6162_v27 = vld [vmem:[#allocation6 + $0xf0] ss:$8 sps:$4 sm:$0xff]  }
 0x407   :  { %4438 = vmatpush2.bf16.msra.mxu1 %v6099_v24  ;;  %4398 = vmatprep.subr.bf16.mxu0 %v6104_v14  ;;  %v6204_v24 = vld [vmem:[#allocation6 + $0x110] ss:$8 sps:$4 sm:$0xff]   ;;  %v6167_v14 = vld [vmem:[#allocation6 + $0xe4] ss:$8 sps:$4 sm:$0xff]  }
 0x408   :  { %4439 = vmatprep.subr.bf16.mxu1 %v6107_v29  ;;  %v6209_v29 = vld [vmem:[#allocation6 + $0x104] ss:$8 sps:$4 sm:$0xff]  }
 0x40a   :  { %4399 = vmatpush2.bf16.msra.mxu0 %v6102_v50  ;;  %v6165_v50 = vld [vmem:[#allocation6 + $0xe0] ss:$8 sps:$4 sm:$0xff]  }
 0x40b   :  { %4440 = vmatpush2.bf16.msra.mxu1 %v6105_v15  ;;  %4400 = vmatprep.subr.bf16.mxu0 %v6110_v5  ;;  %v6207_v15 = vld [vmem:[#allocation6 + $0x100] ss:$8 sps:$4 sm:$0xff]   ;;  %v6170_v5 = vld [vmem:[#allocation6 + $0xd4] ss:$8 sps:$4 sm:$0xff]  }
 0x40c   :  { %4441 = vmatprep.subr.bf16.mxu1 %v6113_v16  ;;  %v6212_v16 = vld [vmem:[#allocation6 + $0x1f4] ss:$8 sps:$4 sm:$0xff]  }
 0x40e   :  { %4401 = vmatpush2.bf16.msra.mxu0 %v6108_v38  ;;  %v6168_v38 = vld [vmem:[#allocation6 + $0xd0] ss:$8 sps:$4 sm:$0xff]  }
 0x40f   :  { %4442 = vmatpush2.bf16.msra.mxu1 %v6111_v6  ;;  %4402 = vmatprep.subr.bf16.mxu0 %v6116_v0  ;;  %v6210_v6 = vld [vmem:[#allocation6 + $0x1f0] ss:$8 sps:$4 sm:$0xff]   ;;  %v6173_v0 = vld [vmem:[#allocation6 + $0xc4] ss:$8 sps:$4 sm:$0xff]  }
 0x410   :  { %4443 = vmatprep.subr.bf16.mxu1 %v6119_v45  ;;  %v6215_v45 = vld [vmem:[#allocation6 + $0x1e4] ss:$8 sps:$4 sm:$0xff]  }
 0x412   :  { %4403 = vmatpush2.bf16.msra.mxu0 %v6114_v22  ;;  %v6171_v22 = vld [vmem:[#allocation6 + $0xc0] ss:$8 sps:$4 sm:$0xff]  }
 0x413   :  { %4444 = vmatpush2.bf16.msra.mxu1 %v6117_v57  ;;  %4404 = vmatprep.subr.bf16.mxu0 %v6122_v35  ;;  %v6213_v57 = vld [vmem:[#allocation6 + $0x1e0] ss:$8 sps:$4 sm:$0xff]   ;;  %v6176_v35 = vld [vmem:[#allocation6 + $0xb4] ss:$8 sps:$4 sm:$0xff]  }
 0x414   :  { %4445 = vmatprep.subr.bf16.mxu1 %v6125_v54  ;;  %v6218_v54 = vld [vmem:[#allocation6 + $0x1d4] ss:$8 sps:$4 sm:$0xff]  }
 0x416   :  { %4405 = vmatpush2.bf16.msra.mxu0 %v6120_v63  ;;  %v6174_v63 = vld [vmem:[#allocation6 + $0xb0] ss:$8 sps:$4 sm:$0xff]  }
 0x417   :  { %4446 = vmatpush2.bf16.msra.mxu1 %v6123_v10  ;;  %4406 = vmatprep.subr.bf16.mxu0 %v6128_v59  ;;  %v6216_v10 = vld [vmem:[#allocation6 + $0x1d0] ss:$8 sps:$4 sm:$0xff]   ;;  %v6179_v59 = vld [vmem:[#allocation6 + $0xa4] ss:$8 sps:$4 sm:$0xff]  }
 0x418   :  { %4447 = vmatprep.subr.bf16.mxu1 %v6131_v44  ;;  %v6221_v44 = vld [vmem:[#allocation6 + $0x1c4] ss:$8 sps:$4 sm:$0xff]  }
 0x41a   :  { %4407 = vmatpush2.bf16.msra.mxu0 %v6126_v7  ;;  %v6177_v7 = vld [vmem:[#allocation6 + $0xa0] ss:$8 sps:$4 sm:$0xff]  }
 0x41b   :  { %4448 = vmatpush2.bf16.msra.mxu1 %v6129_v4  ;;  %4408 = vmatprep.subr.bf16.mxu0 %v6134_v49  ;;  %v6219_v4 = vld [vmem:[#allocation6 + $0x1c0] ss:$8 sps:$4 sm:$0xff]   ;;  %v6182_v49 = vld [vmem:[#allocation6 + $0x94] ss:$8 sps:$4 sm:$0xff]  }
 0x41c   :  { %4449 = vmatprep.subr.bf16.mxu1 %v6137_v19  ;;  %v6224_v19 = vld [vmem:[#allocation6 + $0x1b4] ss:$8 sps:$4 sm:$0xff]  }
 0x41e   :  { %4409 = vmatpush2.bf16.msra.mxu0 %v6132_v42  ;;  %v6180_v42 = vld [vmem:[#allocation6 + $0x90] ss:$8 sps:$4 sm:$0xff]  }
 0x41f   :  { %4450 = vmatpush2.bf16.msra.mxu1 %v6135_v41  ;;  %4864 = vmatprep.subr.bf16.mxu0 %v6140_v56  ;;  %v6222_v41 = vld [vmem:[#allocation6 + $0x1b0] ss:$8 sps:$4 sm:$0xff]   ;;  %v6185_v56 = vld [vmem:[#allocation6 + $0x84] ss:$8 sps:$4 sm:$0xff]  }
 0x420   :  { %4905 = vmatprep.subr.bf16.mxu1 %v6188_v31 }
 0x421   :  { %4411 = vmatmul.mubr.bf16.vlgmr.msra.gmra.mxu0 %v7185_v23  ;;  %v6152_v23 = vld [vmem:[#allocation6 + $0x34] ss:$8 sps:$4 sm:$0xff]  }
 0x422   :  { %4452 = vmatmul.mubr.bf16.vlgmr.msra.gmra.mxu1 %v7187_v8  ;;  %4865 = vmatpush1.bf16.msra.mxu0 %v6138_v9  ;;  %v6194_v8 = vld [vmem:[#allocation6 + $0x154] ss:$8 sps:$4 sm:$0xff]   ;;  %v6183_v9 = vld [vmem:[#allocation6 + $0x80] ss:$8 sps:$4 sm:$0xff]  }
 0x423   :  { %4866 = vmatprep.subr.bf16.mxu0 %v6143_v36  ;;  %4906 = vmatpush1.bf16.msra.mxu1 %v6186_v55 }
 0x424   :  { %4907 = vmatprep.subr.bf16.mxu1 %v6191_v40 }
 0x426   :  { %4867 = vmatpush1.bf16.msra.mxu0 %v6141_v34 }
 0x427   :  { %4868 = vmatprep.subr.bf16.mxu0 %v6146_v2  ;;  %4908 = vmatpush1.bf16.msra.mxu1 %v6189_v3 }
 0x428   :  { %4909 = vmatprep.subr.bf16.mxu1 %v6194_v8 }
 0x42a   :  { %4869 = vmatpush1.bf16.msra.mxu0 %v6144_v20 }
 0x42b   :  { %4870 = vmatprep.subr.bf16.mxu0 %v6149_v48  ;;  %4910 = vmatpush1.bf16.msra.mxu1 %v6192_v1  ;;  %v6227_v1 = vld [vmem:[#allocation6 + $0x1a4] ss:$8 sps:$4 sm:$0xff]  }
 0x42c   :  { %4911 = vmatprep.subr.bf16.mxu1 %v6197_v32  ;;  %v6225_v32 = vld [vmem:[#allocation6 + $0x1a0] ss:$8 sps:$4 sm:$0xff]  }
 0x42e   :  { %4871 = vmatpush1.bf16.msra.mxu0 %v6147_v25 }
 0x42f   :  { %4872 = vmatprep.subr.bf16.mxu0 %v6152_v23  ;;  %4912 = vmatpush1.bf16.msra.mxu1 %v6195_v11  ;;  %v6228_v11 = vld [vmem:[#allocation6 + $0x190] ss:$8 sps:$4 sm:$0xff]  }
 0x430   :  { %4913 = vmatprep.subr.bf16.mxu1 %v6200_v13  ;;  %v6233_v13 = vld [vmem:[#allocation6 + $0x184] ss:$8 sps:$4 sm:$0xff]  }
 0x432   :  { %4873 = vmatpush1.bf16.msra.mxu0 %v6150_v21 }
 0x433   :  { %4874 = vmatprep.subr.bf16.mxu0 %v6155_v43  ;;  %4914 = vmatpush1.bf16.msra.mxu1 %v6198_v26 }
 0x434   :  { %4915 = vmatprep.subr.bf16.mxu1 %v6203_v33 }
 0x436   :  { %4875 = vmatpush1.bf16.msra.mxu0 %v6153_v37 }
 0x437   :  { %4876 = vmatprep.subr.bf16.mxu0 %v6158_v53  ;;  %4916 = vmatpush1.bf16.msra.mxu1 %v6201_v61  ;;  %v6230_v53 = vld [vmem:[#allocation6 + $0x194] ss:$8 sps:$4 sm:$0xff]  }
 0x438   :  { %4917 = vmatprep.subr.bf16.mxu1 %v6206_v28 }
 0x43a   :  { %4877 = vmatpush1.bf16.msra.mxu0 %v6156_v46 }
 0x43b   :  { %4878 = vmatprep.subr.bf16.mxu0 %v6161_v17  ;;  %4918 = vmatpush1.bf16.msra.mxu1 %v6204_v24  ;;  %v6235_v24 = vld [vmem:[%s7292_s11 + $0x38] sm:$0xff]  }
 0x43c   :  { %4919 = vmatprep.subr.bf16.mxu1 %v6209_v29  ;;  %v6237_v29 = vld [vmem:[%s7292_s11 + $0x30] sm:$0xff]  }
 0x43e   :  { %4879 = vmatpush1.bf16.msra.mxu0 %v6159_v30 }
 0x43f   :  { %4880 = vmatprep.subr.bf16.mxu0 %v6164_v18  ;;  %4920 = vmatpush1.bf16.msra.mxu1 %v6207_v15  ;;  %v6239_v15 = vld [vmem:[%s7292_s11 + $0x28] sm:$0xff]  }
 0x440   :  { %4921 = vmatprep.subr.bf16.mxu1 %v6212_v16  ;;  %v6241_v16 = vld [vmem:[%s7292_s11 + $0x20] sm:$0xff]  }
 0x442   :  { %4881 = vmatpush2.bf16.msra.mxu0 %v6162_v27  ;;  %v6234_v27 = vld [vmem:[%s7292_s11 + $0x78] sm:$0xff]  }
 0x443   :  { %4882 = vmatprep.subr.bf16.mxu0 %v6167_v14  ;;  %4922 = vmatpush2.bf16.msra.mxu1 %v6210_v6  ;;  %v6236_v14 = vld [vmem:[%s7292_s11 + $0x70] sm:$0xff]   ;;  %v6243_v6 = vld [vmem:[%s7292_s11 + $0x18] sm:$0xff]  }
 0x444   :  { %4923 = vmatprep.subr.bf16.mxu1 %v6215_v45  ;;  %v6245_v45 = vld [vmem:[%s7292_s11 + $0x10] sm:$0xff]  }
 0x446   :  { %4883 = vmatpush2.bf16.msra.mxu0 %v6165_v50  ;;  %v6238_v50 = vld [vmem:[%s7292_s11 + $0x68] sm:$0xff]  }
 0x447   :  { %4884 = vmatprep.subr.bf16.mxu0 %v6170_v5  ;;  %4924 = vmatpush2.bf16.msra.mxu1 %v6213_v57  ;;  %v6240_v5 = vld [vmem:[%s7292_s11 + $0x60] sm:$0xff]   ;;  %v2847_v57 = vrot.slane %v7202_v12, %v848_v62 }
 0x448   :  { %4925 = vmatprep.subr.bf16.mxu1 %v6218_v54 }
 0x44a   :  { %4885 = vmatpush2.bf16.msra.mxu0 %v6168_v38  ;;  %v6242_v38 = vld [vmem:[%s7292_s11 + $0x58] sm:$0xff]  }
 0x44b   :  { %4886 = vmatprep.subr.bf16.mxu0 %v6173_v0  ;;  %4926 = vmatpush2.bf16.msra.mxu1 %v6216_v10  ;;  %v6244_v0 = vld [vmem:[%s7292_s11 + $0x50] sm:$0xff]  }
 0x44c   :  { %4927 = vmatprep.subr.bf16.mxu1 %v6221_v44 }
 0x44e   :  { %4887 = vmatpush2.bf16.msra.mxu0 %v6171_v22  ;;  %v2843_v22 = vrot.slane %v7202_v12, %v844_v52 }
 0x44f   :  { %4888 = vmatprep.subr.bf16.mxu0 %v6176_v35  ;;  %4928 = vmatpush2.bf16.msra.mxu1 %v6219_v4 }
 0x450   :  { %4929 = vmatprep.subr.bf16.mxu1 %v6224_v19 }
 0x452   :  { %4889 = vmatpush2.bf16.msra.mxu0 %v6174_v63 }
 0x453   :  { %4890 = vmatprep.subr.bf16.mxu0 %v6179_v59  ;;  %4930 = vmatpush2.bf16.msra.mxu1 %v6222_v41 }
 0x454   :  { %4931 = vmatprep.subr.bf16.mxu1 %v6227_v1 }
 0x456   :  { %4891 = vmatpush2.bf16.msra.mxu0 %v6177_v7 }
 0x457   :  { %4892 = vmatprep.subr.bf16.mxu0 %v6182_v49  ;;  %4932 = vmatpush2.bf16.msra.mxu1 %v6225_v32 }
 0x458   :  { %4933 = vmatprep.subr.bf16.mxu1 %v6230_v53 }
 0x45a   :  { %4893 = vmatpush2.bf16.msra.mxu0 %v6180_v42 }
 0x45b   :  { %4894 = vmatprep.subr.bf16.mxu0 %v6185_v56  ;;  %4934 = vmatpush2.bf16.msra.mxu1 %v6228_v11 }
 0x45c   :  { %4935 = vmatprep.subr.bf16.mxu1 %v6233_v13 }
 0x45e   :  { %4895 = vmatpush2.bf16.msra.mxu0 %v6183_v9 }
 0x45f   :  { %5625 = vmatprep.subr.bf16.mxu0 %v6234_v27 }
 0x461   :  { %v4248_v36 = vpop.f32.mrf.mxu0  ;;  %v4289_v34 = vpop.f32.mrf.mxu1 }
 0x462   :  { %v4249_v2 = vadd.f32 %v4248_v36, %v7208_v58 }
 0x463   :  { %v4250_v20 = vpop.f32.mrf.mxu0  ;;  %v4291_v48 = vpop.f32.mrf.mxu1 }
 0x464   :  { %v4290_v55 = vadd.f32 %v4289_v34, %v4249_v2  ;;  %v4251_v31 = vadd.f32 %v4250_v20, %v7210_v39  ;;  %v6231_v39 = vld [vmem:[#allocation6 + $0x180] ss:$8 sps:$4 sm:$0xff]  }
 0x465   :  { %v4252_v40 = vpop.f32.mrf.mxu0  ;;  %v4293_v25 = vpop.f32.mrf.mxu1  ;;  %4936 = vmatpush2.bf16.msra.mxu1 %v6231_v39 }
 0x466   :  { %v4292_v3 = vadd.f32 %v4291_v48, %v4251_v31  ;;  %v4460_v23 = vmax.f32 %v4290_v55, 0.0  ;;  %v6246_v31 = vld [vmem:[%s7292_s11 + $0x48] sm:$0xff]   ;;  %v6248_v25 = vld [vmem:[%s7292_s11 + $0x40] sm:$0xff]  }
 0x467   :  { %v4253_v8 = vpop.f32.mrf.mxu0  ;;  %v4294_v21 = vpop.f32.mrf.mxu1  ;;  %v6247_v40 = vld [vmem:[%s7292_s11 + $0x8] sm:$0xff]  }
 0x468   :  { %v4461_v43 = vmax.f32 %v4292_v3, 0.0  ;;  %v4464_v58 = vpack.c.bf16 %v4460_v23, %v4460_v23  ;;  %v6249_v3 = vld [vmem:[%s7292_s11] sm:$0xff]  }
 0x469   :  { %v4532_v23 = vld [vmem:[%s7291_s10] sm:$0x3] }
 0x46a   :  { %v4465_v37 = vpack.c.bf16 %v4461_v43, %v4461_v43  ;;  %v4537_v8 = vrot.slane %v4532_v23, %v6727_v51  ;;  %v4541_v21 = vrot.slane %v4532_v23, %v6736_v60  ;;  %v5571_v51 = vld [vmem:[%s7293_s12] ss:$0 sm:$0xff] }
 0x46c   :  { %4896 = vmatprep.mubr.bf16.mxu0 %v4465_v37 }
 0x46d   :  { %4897 = vmatmul.mubr.bf16.vlgmr.msra.gmra.mxu0 %v4464_v58 }
 0x46e   :  { %5626 = vmatpush3.bf16.msra.mxu0 %v6235_v24 }
 0x46f   :  { %5627 = vmatprep.subr.bf16.mxu0 %v6236_v14 }
 0x472   :  { %5628 = vmatpush3.bf16.msra.mxu0 %v6237_v29 }
 0x473   :  { %5629 = vmatprep.subr.bf16.mxu0 %v6238_v50 }
 0x476   :  { %5630 = vmatpush3.bf16.msra.mxu0 %v6239_v15 }
 0x477   :  { %5631 = vmatprep.subr.bf16.mxu0 %v6240_v5 }
 0x47a   :  { %5632 = vmatpush3.bf16.msra.mxu0 %v6241_v16 }
 0x47b   :  { %5633 = vmatprep.subr.bf16.mxu0 %v6242_v38 }
 0x47e   :  { %5634 = vmatpush3.bf16.msra.mxu0 %v6243_v6 }
 0x47f   :  { %5635 = vmatprep.subr.bf16.mxu0 %v6244_v0 }
 0x482   :  { %5636 = vmatpush3.bf16.msra.mxu0 %v6245_v45 }
 0x483   :  { %5637 = vmatprep.subr.bf16.mxu0 %v6246_v31 }
 0x486   :  { %5638 = vmatpush3.bf16.msra.mxu0 %v6247_v40 }
 0x487   :  { %5639 = vmatprep.subr.bf16.mxu0 %v6248_v25 }
 0x48a   :  { %5640 = vmatpush3.bf16.msra.mxu0 %v6249_v3 }
 0x4a1   :  { %v4330_v46 = vpop.f32.mrf.mxu0  ;;  %v4371_v26 = vpop.f32.mrf.mxu1 }
 0x4a2   :  { %v4331_v35 = vadd.f32 %v4330_v46, %v2843_v22 }
 0x4a3   :  { %v4332_v17 = vpop.f32.mrf.mxu0  ;;  %v4373_v33 = vpop.f32.mrf.mxu1 }
 0x4a4   :  { %v4333_v54 = vadd.f32 %v4332_v17, %v2847_v57  ;;  %v4372_v63 = vadd.f32 %v4371_v26, %v4331_v35 }
 0x4a5   :  { %v4334_v30 = vpop.f32.mrf.mxu0  ;;  %v4375_v61 = vpop.f32.mrf.mxu1 }
 0x4a6   :  { %v4374_v59 = vadd.f32 %v4373_v33, %v4333_v54 }
 0x4a7   :  { %v4335_v18 = vpop.f32.mrf.mxu0  ;;  %v4376_v28 = vpop.f32.mrf.mxu1 }
 0x4e1   :  { %v4412_v10 = vpop.f32.mrf.mxu0 }
 0x4e2   :  { %v4413_v44 = vadd.f32 %v4412_v10, %v4372_v63  ;;  %v4453_v7 = vpop.f32.mrf.mxu1 }
 0x4e3   :  { %v4414_v4 = vpop.f32.mrf.mxu0 }
 0x4e4   :  { %v4454_v49 = vadd.f32 %v4453_v7, %v4413_v44  ;;  %v4415_v19 = vadd.f32 %v4414_v4, %v4374_v59  ;;  %v4455_v42 = vpop.f32.mrf.mxu1 }
 0x4e5   :  { %v4416_v41 = vpop.f32.mrf.mxu0 }
 0x4e6   :  { %v4456_v56 = vadd.f32 %v4455_v42, %v4415_v19  ;;  %v4457_v9 = vpop.f32.mrf.mxu1  ;;  %v4462_v36 = vmax.f32 %v4454_v49, 0.0 }
 0x4e7   :  { %v4417_v52 = vpop.f32.mrf.mxu0 }
 0x4e8   :  { %v4463_v34 = vmax.f32 %v4456_v56, 0.0  ;;  %v4458_v47 = vpop.f32.mrf.mxu1  ;;  %v4466_v62 = vpack.c.bf16 %v4462_v36, %v4462_v36 }
 0x4ea   :  { %v4467_v2 = vpack.c.bf16 %v4463_v34, %v4463_v34 }
 0x4ec   :  { %4937 = vmatprep.mubr.bf16.mxu1 %v4467_v2 }
 0x4ed   :  { %4938 = vmatmul.mubr.bf16.vlgmr.msra.gmra.mxu1 %v4466_v62 }
 0x52d   :  { %v4898_v12 = vpop.f32.mrf.mxu0 }
 0x52e   :  { %v4899_v1 = vadd.f32 %v4898_v12, %v4537_v8 }
 0x52f   :  { %v4900_v20 = vpop.f32.mrf.mxu0 }
 0x530   :  { %v4901_v32 = vadd.f32 %v4900_v20, %v4541_v21 }
 0x531   :  { %v4902_v48 = vpop.f32.mrf.mxu0 }
 0x533   :  { %v4903_v55 = vpop.f32.mrf.mxu0 }
 0x5ad   :  { %v4939_v43 = vpop.f32.mrf.mxu1 }
 0x5ae   :  { %v4940_v37 = vadd.f32 %v4939_v43, %v4899_v1 }
 0x5af   :  { %v4941_v11 = vpop.f32.mrf.mxu1 }
 0x5b0   :  { %v4942_v53 = vadd.f32 %v4941_v11, %v4901_v32  ;;  %v4946_v58 = vmax.f32 %v4940_v37, 0.0 }
 0x5b1   :  { %v4943_v13 = vpop.f32.mrf.mxu1 }
 0x5b2   :  { %v4947_v39 = vmax.f32 %v4942_v53, 0.0  ;;  %v4948_v17 = vpack.c.bf16 %v4946_v58, %v4946_v58 }
 0x5b3   :  { %v4944_v46 = vpop.f32.mrf.mxu1 }
 0x5b4   :  { %v4949_v26 = vpack.c.bf16 %v4947_v39, %v4947_v39 }
 0x5b6   :  { %5117 = vmatprep.mubr.bf16.mxu0 %v4949_v26 }
 0x5b7   :  { %5118 = vmatmul.mubr.bf16.vlgmr.msra.gmra.mxu0 %v4948_v17 }
 0x677   :  { %v5641_v33 = vpop.f32.mrf.mxu0 }
 0x679   :  { %v5642_v60 = vpop.f32.mrf.mxu0 }
 0x67a   :  { %v5643_v30 = vadd.f32 %v5642_v60, %v5641_v33 }
 0x67b   :  { %v5644_v61 = vpop.f32.mrf.mxu0 }
 0x67c   :  { %v5120_v18 = vadd.f32 %v5643_v30, %v5571_v51 }
 0x67d   :  { %v5645_v28 = vpop.f32.mrf.mxu0 }
 0x67e   :  { %5126 = vst.msk [vmem:[%s7294_s13] sm:$0x3] %vm5125_vm4, %v5120_v18 }
 0x67f   :  { %5131 = vsyncpa [#allocation3], 1 }
 0x680   :  { %5132 = vsyncpa [#allocation5], 1 }

</bundles_post_ra>
